<compile_context>
chip_gen: v7x
topology: tpu7x:2x2x1
jax: 0.10.0
libtpu: 0.0.40
codegen_flags: <defaults>
</compile_context>

<pallas_src>
import functools

import jax
import jax.numpy as jnp
from jax.experimental import pallas as pl
from jax.experimental.pallas import tpu as pltpu

LANE = 128
HIGHEST = jax.lax.Precision.HIGHEST


def _round_up(v, m):
    return -(-v // m) * m


# -----------------------------------------------------------------------------
# Pallas kernel: DoubleConv on one (channel-padded, halo-padded) image.
# -----------------------------------------------------------------------------
def _double_conv_kernel(xp_ref, w1_ref, b1_ref, w2_ref, b2_ref,
                        o_ref, pad2_ref, col1_ref, col2_ref,
                        *, H, W, Cp_in, Cp_out, cdt):
    """One image per grid step.

    xp_ref  : (H+2, W+2, Cp_in)     bf16, halo pre-padded in the wrapper
    w*_ref  : (3, 3*Cp, Cp_out)     bf16, dy-major / (dx, ci)-flattened packed
                                    conv weights with the BN scale folded in
    b*_ref  : (1, Cp_out)           f32 folded BatchNorm bias
    o_ref   : (H, W, Cp_out)        f32 output tile (lane-dense, Cp_out%128==0)
    pad2_ref: (H+2, W+2, Cp_out)    bf16 scratch: spatially padded intermediate
    col*_ref: ((H+2)*W, 3*Cp)       bf16 scratch: dx-shift slabs
    """
    HW = H * W

    def conv3x3(src_ref, col_ref, w_ref, Cp):
        # Build the 3-shift slab: col[y*W + x, dx*Cp:(dx+1)*Cp] = src[y, x+dx, :].
        for dx in range(3):
            col_ref[:, dx * Cp:(dx + 1) * Cp] = (
                src_ref[:, dx:dx + W, :].reshape((H + 2) * W, Cp))
        # Three row-shifted dots over K = 3*Cp accumulate the dy taps in f32.
        acc = jnp.dot(col_ref[0:HW, :], w_ref[0, :, :],
                      preferred_element_type=jnp.float32)
        acc += jnp.dot(col_ref[W:W + HW, :], w_ref[1, :, :],
                       preferred_element_type=jnp.float32)
        acc += jnp.dot(col_ref[2 * W:2 * W + HW, :], w_ref[2, :, :],
                       preferred_element_type=jnp.float32)
        return acc

    # ---- conv1 + (folded) BN + ReLU ----
    h = jnp.maximum(conv3x3(xp_ref, col1_ref, w1_ref, Cp_in) + b1_ref[...], 0.0)

    # ---- write intermediate into padded scratch (halo-only zeroing) ----
    pad2_ref[0:1, :, :] = jnp.zeros((1, W + 2, Cp_out), cdt)
    pad2_ref[H + 1:H + 2, :, :] = jnp.zeros((1, W + 2, Cp_out), cdt)
    pad2_ref[:, 0:1, :] = jnp.zeros((H + 2, 1, Cp_out), cdt)
    pad2_ref[:, W + 1:W + 2, :] = jnp.zeros((H + 2, 1, Cp_out), cdt)
    pad2_ref[1:H + 1, 1:W + 1, :] = h.reshape(H, W, Cp_out).astype(cdt)

    # ---- conv2 + (folded) BN + ReLU ----
    out = jnp.maximum(conv3x3(pad2_ref, col2_ref, w2_ref, Cp_out) + b2_ref[...], 0.0)
    o_ref[...] = out.reshape(H, W, Cp_out).astype(o_ref.dtype)


def double_conv_pallas(x_nhwc, p, eps=1e-5, compute_dtype=jnp.bfloat16):
    """x_nhwc: (N, H, W, Cin) f32.  p = {'w1','bn1','w2','bn2'}, torch-layout
    conv weights (Cout, Cin, 3, 3), bn = (gamma, beta, running_mean, running_var).
    Returns (N, H, W, Cout) f32."""
    N, H, W, Cin = x_nhwc.shape
    w1, bn1, w2, bn2 = p["w1"], p["bn1"], p["w2"], p["bn2"]
    Cout = w1.shape[0]
    Cp_in = _round_up(Cin, LANE)
    Cp_out = _round_up(Cout, LANE)

    # Pre-pad once in the wrapper: 1-pixel spatial halo + channel pad to 128 lanes.
    xp = jnp.pad(x_nhwc, ((0, 0), (1, 1), (1, 1), (0, Cp_in - Cin))).astype(compute_dtype)

    def fold_bn(bn):
        g, b, rm, rv = bn
        s = g / jnp.sqrt(rv + eps)                 # (Cout,) scale -> folded into W
        t = b - rm * s                             # (Cout,) bias  -> in-kernel add
        t = jnp.pad(t, (0, Cp_out - Cout)).reshape(1, Cp_out).astype(jnp.float32)
        return s, t

    def pack_w(w, Ci, Cpi, scale):
        # (Cout, Ci, 3, 3) -> (ky, kx, Ci, Cout), fold BN scale (f32), pad
        # channels, -> (3, 3*Cpi, Cp_out) with (kx, ci) flattened row-major.
        wk = jnp.transpose(w, (2, 3, 1, 0)) * scale[None, None, None, :]
        wk = jnp.pad(wk, ((0, 0), (0, 0), (0, Cpi - Ci), (0, Cp_out - Cout)))
        return wk.reshape(3, 3 * Cpi, Cp_out).astype(compute_dtype)

    s1, b1 = fold_bn(bn1)
    s2, b2 = fold_bn(bn2)
    w1p = pack_w(w1, Cin, Cp_in, s1)
    w2p = pack_w(w2, Cout, Cp_out, s2)

    kernel = functools.partial(_double_conv_kernel, H=H, W=W,
                               Cp_in=Cp_in, Cp_out=Cp_out, cdt=compute_dtype)

    out = pl.pallas_call(
        kernel,
        out_shape=jax.ShapeDtypeStruct((N, H, W, Cp_out), jnp.float32),
        grid_spec=pltpu.PrefetchScalarGridSpec(
            num_scalar_prefetch=0,
            grid=(N,),
            in_specs=[
                pl.BlockSpec((None, H + 2, W + 2, Cp_in), lambda n: (n, 0, 0, 0)),
                pl.BlockSpec((3, 3 * Cp_in, Cp_out), lambda n: (0, 0, 0)),
                pl.BlockSpec((1, Cp_out), lambda n: (0, 0)),
                pl.BlockSpec((3, 3 * Cp_out, Cp_out), lambda n: (0, 0, 0)),
                pl.BlockSpec((1, Cp_out), lambda n: (0, 0)),
            ],
            out_specs=pl.BlockSpec((None, H, W, Cp_out), lambda n: (n, 0, 0, 0)),
            scratch_shapes=[
                pltpu.VMEM((H + 2, W + 2, Cp_out), compute_dtype),   # padded intermediate
                pltpu.VMEM(((H + 2) * W, 3 * Cp_in), compute_dtype),  # dx-shift slab, conv1
                pltpu.VMEM(((H + 2) * W, 3 * Cp_out), compute_dtype), # dx-shift slab, conv2
            ],
        ),
        compiler_params=pltpu.CompilerParams(
            dimension_semantics=("parallel",),
            vmem_limit_bytes=64 * 1024 * 1024),
    )(xp, w1p, b1, w2p, b2)

    # Drop the zero-padded channels (lane-dense inside the kernel, true Cout outside).
    return out[:, :, :, :Cout]


# -----------------------------------------------------------------------------
# Plain-JAX Unet glue ops (NHWC).
# -----------------------------------------------------------------------------
def _max_pool_2x2_nhwc(x):
    # TODO(synk): MaxPool2d kept as a plain JAX reduce_window, not a Pallas kernel.
    return jax.lax.reduce_window(x, jnp.array(-jnp.inf, x.dtype), jax.lax.max,
                                 (1, 2, 2, 1), (1, 2, 2, 1), "VALID")


def _conv_transpose_2x2_nhwc(x, w, b):
    # TODO(synk): ConvTranspose2d(k=2, s=2) kept as a plain JAX einsum (no overlap).
    # out[n, 2h+j, 2w+k, o] = sum_i x[n,h,w,i] * w[i,o,j,k] + b[o]
    N, H, W, _ = x.shape
    Co = w.shape[1]
    y = jnp.einsum("nhwi,iojk->nhjwko", x, w, precision=HIGHEST)
    return y.reshape(N, 2 * H, 2 * W, Co) + b[None, None, None, :]


def _final_conv_1x1_nhwc(x, p):
    # TODO(synk): final 1x1 Conv2d kept as a plain JAX matmul.
    w = p["w"][:, :, 0, 0]  # (Cout, Cin)
    return jnp.einsum("nhwi,oi->nhwo", x, w, precision=HIGHEST) + p["b"][None, None, None, :]


def unet_forward_pallas(x_nchw, params):
    """Full Unet forward; all DoubleConv blocks run through the Pallas kernel."""
    x = jnp.transpose(x_nchw, (0, 2, 3, 1)).astype(jnp.float32)  # one-time NCHW -> NHWC
    skips = []
    for dc in params["downs"]:
        x = double_conv_pallas(x, dc)
        skips.append(x)
        x = _max_pool_2x2_nhwc(x)
    x = double_conv_pallas(x, params["bottleneck"])
    for up_t, up_dc, skip in zip(params["ups_t"], params["ups_dc"], skips[::-1]):
        x = _conv_transpose_2x2_nhwc(x, up_t["w"], up_t["b"])
        if x.shape[1:3] != skip.shape[1:3]:
            # TODO(synk): torchvision TF.resize uses antialiased bilinear; plain bilinear here.
            x = jax.image.resize(x, (x.shape[0],) + skip.shape[1:3] + (x.shape[3],),
                                 "bilinear")
        x = jnp.concatenate([skip, x], axis=-1)      # torch.cat((skip, x), dim=1)
        x = double_conv_pallas(x, up_dc)
    out = _final_conv_1x1_nhwc(x, params["final"])
    return jnp.transpose(out, (0, 3, 1, 2))          # back to NCHW


# -----------------------------------------------------------------------------
# Pure-JAX f32 reference (NCHW, lax.conv), mirroring the PyTorch module (eval BN).
# -----------------------------------------------------------------------------
def _double_conv_ref_nchw(x, p, eps=1e-5):
    def conv(a, w):
        return jax.lax.conv_general_dilated(
            a, w, (1, 1), ((1, 1), (1, 1)),
            dimension_numbers=("NCHW", "OIHW", "NCHW"), precision=HIGHEST)

    def bn(a, q):
        g, b, rm, rv = q
        c = lambda v: v[None, :, None, None]
        return (a - c(rm)) / jnp.sqrt(c(rv) + eps) * c(g) + c(b)

    h = jax.nn.relu(bn(conv(x, p["w1"]), p["bn1"]))
    return jax.nn.relu(bn(conv(h, p["w2"]), p["bn2"]))


def unet_forward_ref(x, params):
    skips = []
    for dc in params["downs"]:
        x = _double_conv_ref_nchw(x, dc)
        skips.append(x)
        x = jax.lax.reduce_window(x, jnp.array(-jnp.inf, x.dtype), jax.lax.max,
                                  (1, 1, 2, 2), (1, 1, 2, 2), "VALID")
    x = _double_conv_ref_nchw(x, params["bottleneck"])
    for up_t, up_dc, skip in zip(params["ups_t"], params["ups_dc"], skips[::-1]):
        w, b = up_t["w"], up_t["b"]
        y = jnp.einsum("nihw,iojk->nohjwk", x, w, precision=HIGHEST)
        N, Co, H, _, W, _ = y.shape
        x = y.reshape(N, Co, 2 * H, 2 * W) + b[None, :, None, None]
        if x.shape[2:] != skip.shape[2:]:
            x = jax.image.resize(x, x.shape[:2] + skip.shape[2:], "bilinear")
        x = jnp.concatenate([skip, x], axis=1)
        x = _double_conv_ref_nchw(x, up_dc)
    wf = params["final"]["w"][:, :, 0, 0]
    return (jnp.einsum("nihw,oi->nohw", x, wf, precision=HIGHEST)
            + params["final"]["b"][None, :, None, None])


# -----------------------------------------------------------------------------
# Deterministic parameter construction (torch layouts, eval-mode BN stats).
# -----------------------------------------------------------------------------
def _init_double_conv(key, cin, cout):
    ks = jax.random.split(key, 10)
    w1 = jax.random.normal(ks[0], (cout, cin, 3, 3), jnp.float32) * jnp.sqrt(2.0 / (9 * cin))
    w2 = jax.random.normal(ks[1], (cout, cout, 3, 3), jnp.float32) * jnp.sqrt(2.0 / (9 * cout))
    bn1 = (1.0 + 0.1 * jax.random.normal(ks[2], (cout,), jnp.float32),
           0.05 * jax.random.normal(ks[3], (cout,), jnp.float32),
           0.05 * jax.random.normal(ks[4], (cout,), jnp.float32),
           1.0 + 0.2 * jax.random.uniform(ks[5], (cout,), jnp.float32))
    bn2 = (1.0 + 0.1 * jax.random.normal(ks[6], (cout,), jnp.float32),
           0.05 * jax.random.normal(ks[7], (cout,), jnp.float32),
           0.05 * jax.random.normal(ks[8], (cout,), jnp.float32),
           1.0 + 0.2 * jax.random.uniform(ks[9], (cout,), jnp.float32))
    return {"w1": w1, "bn1": bn1, "w2": w2, "bn2": bn2}


def init_unet_params(key, in_channels=3, out_channels=1, features=(8, 16, 32, 64)):
    keys = iter(jax.random.split(key, 4 * len(features) + 8))
    params = {"downs": [], "ups_t": [], "ups_dc": []}
    cin = in_channels
    for f in features:
        params["downs"].append(_init_double_conv(next(keys), cin, f))
        cin = f
    params["bottleneck"] = _init_double_conv(next(keys), features[-1], 2 * features[-1])
    for f in reversed(features):
        kw, kb = jax.random.split(next(keys))
        wt = jax.random.normal(kw, (2 * f, f, 2, 2), jnp.float32) * jnp.sqrt(1.0 / (8 * f))
        bt = 0.05 * jax.random.normal(kb, (f,), jnp.float32)
        params["ups_t"].append({"w": wt, "b": bt})
        params["ups_dc"].append(_init_double_conv(next(keys), 2 * f, f))
    kw, kb = jax.random.split(next(keys))
    wf = jax.random.normal(kw, (out_channels, features[0], 1, 1), jnp.float32) * jnp.sqrt(
        1.0 / features[0])
    bf = 0.05 * jax.random.normal(kb, (out_channels,), jnp.float32)
    params["final"] = {"w": wf, "b": bf}
    return params


if __name__ == "__main__":
    key = jax.random.PRNGKey(0)
    k_params, k_x = jax.random.split(key)

    # Small Unet consistent with the module: in_channels=3, out_channels=1,
    # reduced features for a quick self-test, batch=2, 16x16 images.
    features = (8, 16, 32, 64)
    params = init_unet_params(k_params, in_channels=3, out_channels=1, features=features)
    x = jax.random.normal(k_x, (2, 3, 16, 16), jnp.float32)

    # 1) Tight check of the Pallas DoubleConv kernel against the f32 lax.conv
    #    reference (tolerance loosened for bf16 inputs/weights, f32 accumulation).
    x_nhwc = jnp.transpose(x, (0, 2, 3, 1))
    dc_out = jax.block_until_ready(double_conv_pallas(x_nhwc, params["downs"][0]))
    dc_ref = jnp.transpose(_double_conv_ref_nchw(x, params["downs"][0]), (0, 2, 3, 1))
    assert dc_out.shape == dc_ref.shape, (dc_out.shape, dc_ref.shape)
    assert jnp.allclose(dc_out, dc_ref, atol=5e-2, rtol=5e-2), float(
        jnp.max(jnp.abs(dc_out - dc_ref)))

    # 2) Full Unet forward: every DoubleConv block runs through the Pallas kernel.
    unet_jit = jax.jit(unet_forward_pallas)
    out = jax.block_until_ready(unet_jit(x, params))
    ref = unet_forward_ref(x, params)
    assert out.shape == (2, 1, 16, 16), out.shape
    max_err = float(jnp.max(jnp.abs(out - ref)))
    rel_err = float(jnp.linalg.norm(out - ref) / (jnp.linalg.norm(ref) + 1e-12))
    assert max_err < 2.5e-1, max_err     # bf16 compute across 18 convs
    assert rel_err < 1e-1, rel_err

    print("KERNEL_OK")
</pallas_src>

<mosaic_0001>
module attributes {stable_mosaic.version = 11 : i64} {
  func.func @_double_conv_kernel(%arg0: i32, %arg1: memref<1x18x18x128xbf16, #tpu.memory_space<vmem>>, %arg2: memref<3x384x128xbf16, #tpu.memory_space<vmem>>, %arg3: memref<1x128xf32, #tpu.memory_space<vmem>>, %arg4: memref<3x384x128xbf16, #tpu.memory_space<vmem>>, %arg5: memref<1x128xf32, #tpu.memory_space<vmem>>, %arg6: memref<1x16x16x128xf32, #tpu.memory_space<vmem>>, %arg7: memref<18x18x128xbf16, #tpu.memory_space<vmem>>, %arg8: memref<288x384xbf16, #tpu.memory_space<vmem>>, %arg9: memref<288x384xbf16, #tpu.memory_space<vmem>>) attributes {dimension_semantics = [#tpu.dimension_semantics<parallel>], iteration_bounds = array<i64: 2>, scalar_prefetch = 0 : i64, scratch_operands = 3 : i64, tpu.core_type = #tpu.core_type<tc>, window_params = [{transform_indices = @transform_0, window_bounds = array<i64: 1, 18, 18, 128>}, {pipeline_mode = #tpu.pipeline_mode<synchronous>, transform_indices = @transform_1, window_bounds = array<i64: 3, 384, 128>}, {pipeline_mode = #tpu.pipeline_mode<synchronous>, transform_indices = @transform_2, window_bounds = array<i64: 1, 128>}, {pipeline_mode = #tpu.pipeline_mode<synchronous>, transform_indices = @transform_3, window_bounds = array<i64: 3, 384, 128>}, {pipeline_mode = #tpu.pipeline_mode<synchronous>, transform_indices = @transform_4, window_bounds = array<i64: 1, 128>}, {transform_indices = @transform_5, window_bounds = array<i64: 1, 16, 16, 128>}]} {
    %c0 = arith.constant 0 : index
    %c0_0 = arith.constant 0 : index
    %c0_1 = arith.constant 0 : index
    %c0_2 = arith.constant 0 : index
    %0 = vector.load %arg1[%c0, %c0_0, %c0_1, %c0_2] : memref<1x18x18x128xbf16, #tpu.memory_space<vmem>>, vector<1x18x16x128xbf16>
    %1 = vector.shape_cast %0 : vector<1x18x16x128xbf16> to vector<18x16x128xbf16>
    %2 = vector.shape_cast %1 : vector<18x16x128xbf16> to vector<288x128xbf16>
    %c0_3 = arith.constant 0 : index
    %c0_4 = arith.constant 0 : index
    %3 = vector.load %arg8[%c0_3, %c0_4] : memref<288x384xbf16, #tpu.memory_space<vmem>>, vector<288x128xbf16>
    tpu.vector_store %arg8[%c0_3, %c0_4], %2 {strides = array<i32>} : memref<288x384xbf16, #tpu.memory_space<vmem>>, vector<288x128xbf16>,
    %c0_5 = arith.constant 0 : index
    %c0_6 = arith.constant 0 : index
    %c1 = arith.constant 1 : index
    %c0_7 = arith.constant 0 : index
    %4 = vector.load %arg1[%c0_5, %c0_6, %c1, %c0_7] : memref<1x18x18x128xbf16, #tpu.memory_space<vmem>>, vector<1x18x16x128xbf16>
    %5 = vector.shape_cast %4 : vector<1x18x16x128xbf16> to vector<18x16x128xbf16>
    %6 = vector.shape_cast %5 : vector<18x16x128xbf16> to vector<288x128xbf16>
    %c0_8 = arith.constant 0 : index
    %c128 = arith.constant 128 : index
    %7 = vector.load %arg8[%c0_8, %c128] : memref<288x384xbf16, #tpu.memory_space<vmem>>, vector<288x128xbf16>
    tpu.vector_store %arg8[%c0_8, %c128], %6 {strides = array<i32>} : memref<288x384xbf16, #tpu.memory_space<vmem>>, vector<288x128xbf16>,
    %c0_9 = arith.constant 0 : index
    %c0_10 = arith.constant 0 : index
    %c2 = arith.constant 2 : index
    %c0_11 = arith.constant 0 : index
    %8 = vector.load %arg1[%c0_9, %c0_10, %c2, %c0_11] : memref<1x18x18x128xbf16, #tpu.memory_space<vmem>>, vector<1x18x16x128xbf16>
    %9 = vector.shape_cast %8 : vector<1x18x16x128xbf16> to vector<18x16x128xbf16>
    %10 = vector.shape_cast %9 : vector<18x16x128xbf16> to vector<288x128xbf16>
    %c0_12 = arith.constant 0 : index
    %c256 = arith.constant 256 : index
    %11 = vector.load %arg8[%c0_12, %c256] : memref<288x384xbf16, #tpu.memory_space<vmem>>, vector<288x128xbf16>
    tpu.vector_store %arg8[%c0_12, %c256], %10 {strides = array<i32>} : memref<288x384xbf16, #tpu.memory_space<vmem>>, vector<288x128xbf16>,
    %c0_13 = arith.constant 0 : index
    %c0_14 = arith.constant 0 : index
    %12 = vector.load %arg8[%c0_13, %c0_14] : memref<288x384xbf16, #tpu.memory_space<vmem>>, vector<256x384xbf16>
    %c0_15 = arith.constant 0 : index
    %c0_16 = arith.constant 0 : index
    %c0_17 = arith.constant 0 : index
    %13 = vector.load %arg2[%c0_15, %c0_16, %c0_17] : memref<3x384x128xbf16, #tpu.memory_space<vmem>>, vector<1x384x128xbf16>
    %14 = vector.shape_cast %13 : vector<1x384x128xbf16> to vector<384x128xbf16>
    %cst = arith.constant dense<0.000000e+00> : vector<256x128xf32>
    %15 = tpu.matmul %12, %14, %cst {dimension_numbers = #tpu.dot_dimension_numbers<[1], [0], [0], [1], [0, 0, 1, 1], [], []>} : vector<256x384xbf16>, vector<384x128xbf16>, vector<256x128xf32> -> vector<256x128xf32>
    %c16 = arith.constant 16 : index
    %c0_18 = arith.constant 0 : index
    %16 = vector.load %arg8[%c16, %c0_18] : memref<288x384xbf16, #tpu.memory_space<vmem>>, vector<256x384xbf16>
    %c1_19 = arith.constant 1 : index
    %c0_20 = arith.constant 0 : index
    %c0_21 = arith.constant 0 : index
    %17 = vector.load %arg2[%c1_19, %c0_20, %c0_21] : memref<3x384x128xbf16, #tpu.memory_space<vmem>>, vector<1x384x128xbf16>
    %18 = vector.shape_cast %17 : vector<1x384x128xbf16> to vector<384x128xbf16>
    %cst_22 = arith.constant dense<0.000000e+00> : vector<256x128xf32>
    %19 = tpu.matmul %16, %18, %cst_22 {dimension_numbers = #tpu.dot_dimension_numbers<[1], [0], [0], [1], [0, 0, 1, 1], [], []>} : vector<256x384xbf16>, vector<384x128xbf16>, vector<256x128xf32> -> vector<256x128xf32>
    %20 = arith.addf %15, %19 : vector<256x128xf32>
    %c32 = arith.constant 32 : index
    %c0_23 = arith.constant 0 : index
    %21 = vector.load %arg8[%c32, %c0_23] : memref<288x384xbf16, #tpu.memory_space<vmem>>, vector<256x384xbf16>
    %c2_24 = arith.constant 2 : index
    %c0_25 = arith.constant 0 : index
    %c0_26 = arith.constant 0 : index
    %22 = vector.load %arg2[%c2_24, %c0_25, %c0_26] : memref<3x384x128xbf16, #tpu.memory_space<vmem>>, vector<1x384x128xbf16>
    %23 = vector.shape_cast %22 : vector<1x384x128xbf16> to vector<384x128xbf16>
    %cst_27 = arith.constant dense<0.000000e+00> : vector<256x128xf32>
    %24 = tpu.matmul %21, %23, %cst_27 {dimension_numbers = #tpu.dot_dimension_numbers<[1], [0], [0], [1], [0, 0, 1, 1], [], []>} : vector<256x384xbf16>, vector<384x128xbf16>, vector<256x128xf32> -> vector<256x128xf32>
    %25 = arith.addf %20, %24 : vector<256x128xf32>
    %c0_28 = arith.constant 0 : index
    %c0_29 = arith.constant 0 : index
    %26 = vector.load %arg3[%c0_28, %c0_29] : memref<1x128xf32, #tpu.memory_space<vmem>>, vector<1x128xf32>
    %27 = vector.broadcast %26 : vector<1x128xf32> to vector<256x128xf32>
    %28 = arith.addf %25, %27 : vector<256x128xf32>
    %cst_30 = arith.constant 0.000000e+00 : f32
    %29 = vector.broadcast %cst_30 : f32 to vector<256x128xf32>
    %30 = arith.maximumf %28, %29 : vector<256x128xf32>
    %cst_31 = arith.constant 0.000000e+00 : bf16
    %31 = vector.broadcast %cst_31 : bf16 to vector<1x18x128xbf16>
    %c0_32 = arith.constant 0 : index
    %c0_33 = arith.constant 0 : index
    %c0_34 = arith.constant 0 : index
    %32 = vector.load %arg7[%c0_32, %c0_33, %c0_34] : memref<18x18x128xbf16, #tpu.memory_space<vmem>>, vector<1x18x128xbf16>
    tpu.vector_store %arg7[%c0_32, %c0_33, %c0_34], %31 {strides = array<i32>} : memref<18x18x128xbf16, #tpu.memory_space<vmem>>, vector<1x18x128xbf16>,
    %cst_35 = arith.constant 0.000000e+00 : bf16
    %33 = vector.broadcast %cst_35 : bf16 to vector<1x18x128xbf16>
    %c17 = arith.constant 17 : index
    %c0_36 = arith.constant 0 : index
    %c0_37 = arith.constant 0 : index
    %34 = vector.load %arg7[%c17, %c0_36, %c0_37] : memref<18x18x128xbf16, #tpu.memory_space<vmem>>, vector<1x18x128xbf16>
    tpu.vector_store %arg7[%c17, %c0_36, %c0_37], %33 {strides = array<i32>} : memref<18x18x128xbf16, #tpu.memory_space<vmem>>, vector<1x18x128xbf16>,
    %cst_38 = arith.constant 0.000000e+00 : bf16
    %35 = vector.broadcast %cst_38 : bf16 to vector<18x1x128xbf16>
    %c0_39 = arith.constant 0 : index
    %c0_40 = arith.constant 0 : index
    %c0_41 = arith.constant 0 : index
    %36 = vector.load %arg7[%c0_39, %c0_40, %c0_41] : memref<18x18x128xbf16, #tpu.memory_space<vmem>>, vector<18x1x128xbf16>
    tpu.vector_store %arg7[%c0_39, %c0_40, %c0_41], %35 {strides = array<i32>} : memref<18x18x128xbf16, #tpu.memory_space<vmem>>, vector<18x1x128xbf16>,
    %cst_42 = arith.constant 0.000000e+00 : bf16
    %37 = vector.broadcast %cst_42 : bf16 to vector<18x1x128xbf16>
    %c0_43 = arith.constant 0 : index
    %c17_44 = arith.constant 17 : index
    %c0_45 = arith.constant 0 : index
    %38 = vector.load %arg7[%c0_43, %c17_44, %c0_45] : memref<18x18x128xbf16, #tpu.memory_space<vmem>>, vector<18x1x128xbf16>
    tpu.vector_store %arg7[%c0_43, %c17_44, %c0_45], %37 {strides = array<i32>} : memref<18x18x128xbf16, #tpu.memory_space<vmem>>, vector<18x1x128xbf16>,
    %39 = vector.shape_cast %30 : vector<256x128xf32> to vector<16x16x128xf32>
    %40 = arith.truncf %39 : vector<16x16x128xf32> to vector<16x16x128xbf16>
    %c1_46 = arith.constant 1 : index
    %c1_47 = arith.constant 1 : index
    %c0_48 = arith.constant 0 : index
    %41 = vector.load %arg7[%c1_46, %c1_47, %c0_48] : memref<18x18x128xbf16, #tpu.memory_space<vmem>>, vector<16x16x128xbf16>
    tpu.vector_store %arg7[%c1_46, %c1_47, %c0_48], %40 {strides = array<i32>} : memref<18x18x128xbf16, #tpu.memory_space<vmem>>, vector<16x16x128xbf16>,
    %c0_49 = arith.constant 0 : index
    %c0_50 = arith.constant 0 : index
    %c0_51 = arith.constant 0 : index
    %42 = vector.load %arg7[%c0_49, %c0_50, %c0_51] : memref<18x18x128xbf16, #tpu.memory_space<vmem>>, vector<18x16x128xbf16>
    %43 = vector.shape_cast %42 : vector<18x16x128xbf16> to vector<288x128xbf16>
    %c0_52 = arith.constant 0 : index
    %c0_53 = arith.constant 0 : index
    %44 = vector.load %arg9[%c0_52, %c0_53] : memref<288x384xbf16, #tpu.memory_space<vmem>>, vector<288x128xbf16>
    tpu.vector_store %arg9[%c0_52, %c0_53], %43 {strides = array<i32>} : memref<288x384xbf16, #tpu.memory_space<vmem>>, vector<288x128xbf16>,
    %c0_54 = arith.constant 0 : index
    %c1_55 = arith.constant 1 : index
    %c0_56 = arith.constant 0 : index
    %45 = vector.load %arg7[%c0_54, %c1_55, %c0_56] : memref<18x18x128xbf16, #tpu.memory_space<vmem>>, vector<18x16x128xbf16>
    %46 = vector.shape_cast %45 : vector<18x16x128xbf16> to vector<288x128xbf16>
    %c0_57 = arith.constant 0 : index
    %c128_58 = arith.constant 128 : index
    %47 = vector.load %arg9[%c0_57, %c128_58] : memref<288x384xbf16, #tpu.memory_space<vmem>>, vector<288x128xbf16>
    tpu.vector_store %arg9[%c0_57, %c128_58], %46 {strides = array<i32>} : memref<288x384xbf16, #tpu.memory_space<vmem>>, vector<288x128xbf16>,
    %c0_59 = arith.constant 0 : index
    %c2_60 = arith.constant 2 : index
    %c0_61 = arith.constant 0 : index
    %48 = vector.load %arg7[%c0_59, %c2_60, %c0_61] : memref<18x18x128xbf16, #tpu.memory_space<vmem>>, vector<18x16x128xbf16>
    %49 = vector.shape_cast %48 : vector<18x16x128xbf16> to vector<288x128xbf16>
    %c0_62 = arith.constant 0 : index
    %c256_63 = arith.constant 256 : index
    %50 = vector.load %arg9[%c0_62, %c256_63] : memref<288x384xbf16, #tpu.memory_space<vmem>>, vector<288x128xbf16>
    tpu.vector_store %arg9[%c0_62, %c256_63], %49 {strides = array<i32>} : memref<288x384xbf16, #tpu.memory_space<vmem>>, vector<288x128xbf16>,
    %c0_64 = arith.constant 0 : index
    %c0_65 = arith.constant 0 : index
    %51 = vector.load %arg9[%c0_64, %c0_65] : memref<288x384xbf16, #tpu.memory_space<vmem>>, vector<256x384xbf16>
    %c0_66 = arith.constant 0 : index
    %c0_67 = arith.constant 0 : index
    %c0_68 = arith.constant 0 : index
    %52 = vector.load %arg4[%c0_66, %c0_67, %c0_68] : memref<3x384x128xbf16, #tpu.memory_space<vmem>>, vector<1x384x128xbf16>
    %53 = vector.shape_cast %52 : vector<1x384x128xbf16> to vector<384x128xbf16>
    %cst_69 = arith.constant dense<0.000000e+00> : vector<256x128xf32>
    %54 = tpu.matmul %51, %53, %cst_69 {dimension_numbers = #tpu.dot_dimension_numbers<[1], [0], [0], [1], [0, 0, 1, 1], [], []>} : vector<256x384xbf16>, vector<384x128xbf16>, vector<256x128xf32> -> vector<256x128xf32>
    %c16_70 = arith.constant 16 : index
    %c0_71 = arith.constant 0 : index
    %55 = vector.load %arg9[%c16_70, %c0_71] : memref<288x384xbf16, #tpu.memory_space<vmem>>, vector<256x384xbf16>
    %c1_72 = arith.constant 1 : index
    %c0_73 = arith.constant 0 : index
    %c0_74 = arith.constant 0 : index
    %56 = vector.load %arg4[%c1_72, %c0_73, %c0_74] : memref<3x384x128xbf16, #tpu.memory_space<vmem>>, vector<1x384x128xbf16>
    %57 = vector.shape_cast %56 : vector<1x384x128xbf16> to vector<384x128xbf16>
    %cst_75 = arith.constant dense<0.000000e+00> : vector<256x128xf32>
    %58 = tpu.matmul %55, %57, %cst_75 {dimension_numbers = #tpu.dot_dimension_numbers<[1], [0], [0], [1], [0, 0, 1, 1], [], []>} : vector<256x384xbf16>, vector<384x128xbf16>, vector<256x128xf32> -> vector<256x128xf32>
    %59 = arith.addf %54, %58 : vector<256x128xf32>
    %c32_76 = arith.constant 32 : index
    %c0_77 = arith.constant 0 : index
    %60 = vector.load %arg9[%c32_76, %c0_77] : memref<288x384xbf16, #tpu.memory_space<vmem>>, vector<256x384xbf16>
    %c2_78 = arith.constant 2 : index
    %c0_79 = arith.constant 0 : index
    %c0_80 = arith.constant 0 : index
    %61 = vector.load %arg4[%c2_78, %c0_79, %c0_80] : memref<3x384x128xbf16, #tpu.memory_space<vmem>>, vector<1x384x128xbf16>
    %62 = vector.shape_cast %61 : vector<1x384x128xbf16> to vector<384x128xbf16>
    %cst_81 = arith.constant dense<0.000000e+00> : vector<256x128xf32>
    %63 = tpu.matmul %60, %62, %cst_81 {dimension_numbers = #tpu.dot_dimension_numbers<[1], [0], [0], [1], [0, 0, 1, 1], [], []>} : vector<256x384xbf16>, vector<384x128xbf16>, vector<256x128xf32> -> vector<256x128xf32>
    %64 = arith.addf %59, %63 : vector<256x128xf32>
    %c0_82 = arith.constant 0 : index
    %c0_83 = arith.constant 0 : index
    %65 = vector.load %arg5[%c0_82, %c0_83] : memref<1x128xf32, #tpu.memory_space<vmem>>, vector<1x128xf32>
    %66 = vector.broadcast %65 : vector<1x128xf32> to vector<256x128xf32>
    %67 = arith.addf %64, %66 : vector<256x128xf32>
    %cst_84 = arith.constant 0.000000e+00 : f32
    %68 = vector.broadcast %cst_84 : f32 to vector<256x128xf32>
    %69 = arith.maximumf %67, %68 : vector<256x128xf32>
    %70 = vector.shape_cast %69 : vector<256x128xf32> to vector<16x16x128xf32>
    %c0_85 = arith.constant 0 : index
    %c0_86 = arith.constant 0 : index
    %c0_87 = arith.constant 0 : index
    %c0_88 = arith.constant 0 : index
    %71 = vector.load %arg6[%c0_85, %c0_86, %c0_87, %c0_88] : memref<1x16x16x128xf32, #tpu.memory_space<vmem>>, vector<1x16x16x128xf32>
    %72 = vector.shape_cast %71 : vector<1x16x16x128xf32> to vector<16x16x128xf32>
    %73 = vector.shape_cast %70 : vector<16x16x128xf32> to vector<1x16x16x128xf32>
    tpu.vector_store %arg6[%c0_85, %c0_86, %c0_87, %c0_88], %73 {strides = array<i32>} : memref<1x16x16x128xf32, #tpu.memory_space<vmem>>, vector<1x16x16x128xf32>,
    return
  }
  func.func @transform_0(%arg0: i32) -> (i32, i32, i32, i32) {
    %c0_i32 = arith.constant 0 : i32
    %c0_i32_0 = arith.constant 0 : i32
    %c0_i32_1 = arith.constant 0 : i32
    %c0_i32_2 = arith.constant 0 : i32
    return %arg0, %c0_i32, %c0_i32_0, %c0_i32_1 : i32, i32, i32, i32
  }
  func.func @transform_1(%arg0: i32) -> (i32, i32, i32) {
    %c0_i32 = arith.constant 0 : i32
    %c0_i32_0 = arith.constant 0 : i32
    %c0_i32_1 = arith.constant 0 : i32
    %c0_i32_2 = arith.constant 0 : i32
    return %c0_i32, %c0_i32_0, %c0_i32_1 : i32, i32, i32
  }
  func.func @transform_2(%arg0: i32) -> (i32, i32) {
    %c0_i32 = arith.constant 0 : i32
    %c0_i32_0 = arith.constant 0 : i32
    %c0_i32_1 = arith.constant 0 : i32
    return %c0_i32, %c0_i32_0 : i32, i32
  }
  func.func @transform_3(%arg0: i32) -> (i32, i32, i32) {
    %c0_i32 = arith.constant 0 : i32
    %c0_i32_0 = arith.constant 0 : i32
    %c0_i32_1 = arith.constant 0 : i32
    %c0_i32_2 = arith.constant 0 : i32
    return %c0_i32, %c0_i32_0, %c0_i32_1 : i32, i32, i32
  }
  func.func @transform_4(%arg0: i32) -> (i32, i32) {
    %c0_i32 = arith.constant 0 : i32
    %c0_i32_0 = arith.constant 0 : i32
    %c0_i32_1 = arith.constant 0 : i32
    return %c0_i32, %c0_i32_0 : i32, i32
  }
  func.func @transform_5(%arg0: i32) -> (i32, i32, i32, i32) {
    %c0_i32 = arith.constant 0 : i32
    %c0_i32_0 = arith.constant 0 : i32
    %c0_i32_1 = arith.constant 0 : i32
    %c0_i32_2 = arith.constant 0 : i32
    return %arg0, %c0_i32, %c0_i32_0, %c0_i32_1 : i32, i32, i32, i32
  }
}

</mosaic_0001>

<bundles_post_ra>
// kernel: tpu_custom_call.1
= control target key start
LH: loop header
LB: loop body
LE: loop exit
PB: predicated region body
PF: predicated region fallthrough
CT: control target
= control target key end

     0   :  { %10 = vsyncpa [#allocation6], 0  ;;  %s11659_s0 = inlined_call_operand.hbm [shape: bf16[2,18,18,128], index: 0, kind: input, shape index: {}]   ;;  %s11660_s1 = inlined_call_operand.hbm [shape: bf16[3,384,128], index: 1, kind: input, shape index: {}]   ;;  %s11661_s2 = inlined_call_operand.hbm [shape: f32[1,128], index: 2, kind: input, shape index: {}]   ;;  %s11662_s3 = inlined_call_operand.hbm [shape: bf16[3,384,128], index: 3, kind: input, shape index: {}]   ;;  %s11663_s4 = inlined_call_operand.hbm [shape: f32[1,128], index: 4, kind: input, shape index: {}]   ;;  %s11664_s5 = inlined_call_operand.hbm [shape: f32[2,16,16,128], index: 5, kind: output, shape index: {}]  }
   0x1   :  { %12 = vsyncpa [#allocation6 + $0x1], 0 }
   0x2   :  { %13 = vsyncpa [#allocation9], 0 }
   0x3   :  { %14 = vsyncpa [#allocation12], 0 }
   0x4   :  { %15 = vsyncpa [#allocation7], 0 }
   0x5   :  { %17 = vsyncpa [#allocation7 + $0x1], 0  ;;  %s9087_s18 = smov 0   ;;  %s9089_s19 = smov 0  }
   0x6   :  { %s9091_s20 = smov 0   ;;  %s9093_s21 = smov 0  }
   0x7 LB: > { %s9108_s22 = sadd.s32 4294967295, %s9044_s21   ;;  %s6730_s23 = sadd.s32 4294967294, %s9044_s21   ;;  %s9044_s21 = sphi %s9093_s21, %s11901_s21   ;;  %s9040_s20 = sphi %s9091_s20, %s11900_s20   ;;  %s9036_s19 = sphi %s9089_s19, %s11899_s19   ;;  %s9032_s18 = sphi %s9087_s18, %s11898_s18  }
   0x8   : > { %p43_p0 = scmp.ne.s32.totalorder %s9036_s19, %s9032_s18  ;;  %p11665_p1 = scmp.eq.s32.totalorder %s9108_s22, 0 }
   0x9   : > { %p157_p3 = scmp.eq.s32.totalorder %s6730_s23, 1  ;;  %p6731_p5 = scmp.ge.s32.totalorder %s9044_s21, 1 }
   0xa   : > { %p9117_p4 = por %p11665_p1, %p43_p0  ;;  %p164_p7 = scmp.lt.s32.totalorder %s9044_s21, 3 }
   0xb   : > { %p9122_p6 = por %p157_p3, %p43_p0  ;;  %s9046_s27 = smov [#allocation8]  }
   0xc   : > { %s11709_s24 = scalar_select %p9117_p4, 1, 0 }
   0xd   : > { %s11710_s25 = scalar_select %p9122_p6, 1, 0 }
   0xe   : > { %p9127_p8 = pnand %p6731_p5, %p164_p7  ;;  %s176_s28 = sshll.u32 %s9046_s27, 4  ;;  %s9131_s28 = int_to_ptr.vmem [resolvable:$true] %s176_s28 }
   0xf   : > { %s9047_s30 = smov [#allocation11]   ;;  %s9048_s7 = smov [#allocation10]  }
  0x10   : > { %s11711_s26 = scalar_select %p9127_p8, 1, 0 }
  0x11   : > { %p8551_p9 = pneg %p9127_p8  ;;  %s200_s6 = sshll.u32 %s9047_s30, 4  ;;  %s9142_s6 = int_to_ptr.vmem [resolvable:$true] %s200_s6 }
  0x12   : > { %s9144_s8 = sshll.u32 %s9048_s7, 4  ;;  %s8828_s11 = scalar_lea.hbm %s11660_s1, 9216  ;;  %s191_s8 = int_to_ptr.vmem [resolvable:$true] %s9144_s8 }
  0x13   : > { %p9138_p11 = pnand %p8551_p9, %p11665_p1  ;;  %p8829_p12 = scmp.ne.s32.totalorder %s11660_s1, %s8828_s11 }
  0x14   : > { %p8835_p5 = scmp.lt.u32.totalorder %s8828_s11, %s11660_s1 }
  0x15   : > { %p9154_p13 = pneg %p9138_p11 }
  0x17   : > { %p8831_p0 = pnand %p9154_p13, %p8829_p12 }
  0x19   : > { %p8832_p3 = pneg %p8831_p0 }
  0x1b   : > { %p8837_p7 = pnand %p8835_p5, %p8832_p3 }
  0x1d   : > { %8840 = shalt.err (!%p8837_p7)
}
  0x1e   : > { %s8841_s17 = scalar_lea.vmem %s9131_s28, 9216  ;;  %p8849_p2 = scmp.lt.s32.totalorder %s9131_s28, %s9131_s28 }
  0x1f   : > { %p8842_p9 = scmp.ne.s32.totalorder %s9131_s28, %s8841_s17  ;;  %p8850_p6 = scmp.lt.s32.totalorder %s8841_s17, %s8841_s17 }
  0x21   : > { %p8844_p10 = pnand %p8842_p9, %p9154_p13  ;;  %p8851_p12 = por %p8850_p6, %p8849_p2 }
  0x23   : > { %p8845_p1 = pneg %p8844_p10 }
  0x25   : > { %p8852_p0 = pnand %p8851_p12, %p8845_p1 }
  0x27   : > { %8855 = shalt.err (!%p8852_p0)
}
  0x28   : > { %s11668_s23 = smov 64   ;;  %s9050_s27 = smov 4  }
  0x29   : > { %8554 = dma.hbm_to_vmem [thread:$0]  (!%p9138_p11), %s11660_s1, 9216, %s9131_s28, [#allocation9], %s11668_s23, %s11668_s23, %s9050_s27  }
  0x2a   : > { %s8856_s11 = scalar_lea.hbm %s11662_s3, 9216 }
  0x2b   : > { %p8857_p1 = scmp.ne.s32.totalorder %s11662_s3, %s8856_s11  ;;  %p8863_p10 = scmp.lt.u32.totalorder %s8856_s11, %s11662_s3 }
  0x2d   : > { %p8859_p2 = pnand %p8857_p1, %p9154_p13 }
  0x2f   : > { %p8860_p6 = pneg %p8859_p2 }
  0x31   : > { %p8865_p3 = pnand %p8863_p10, %p8860_p6 }
  0x33   : > { %8868 = shalt.err (!%p8865_p3)
}
  0x34   : > { %s8869_s28 = scalar_lea.vmem %s9142_s6, 9216  ;;  %p8877_p12 = scmp.lt.s32.totalorder %s9142_s6, %s9142_s6 }
  0x35   : > { %p8870_p5 = scmp.ne.s32.totalorder %s9142_s6, %s8869_s28  ;;  %p8878_p0 = scmp.lt.s32.totalorder %s8869_s28, %s8869_s28 }
  0x37   : > { %p8872_p7 = pnand %p8870_p5, %p9154_p13  ;;  %p8879_p1 = por %p8878_p0, %p8877_p12 }
  0x39   : > { %p8873_p9 = pneg %p8872_p7 }
  0x3b   : > { %p8880_p2 = pnand %p8879_p1, %p8873_p9 }
  0x3d   : > { %8883 = shalt.err (!%p8880_p2)
}
  0x3e   : > { %8560 = dma.hbm_to_vmem [thread:$0]  (!%p9138_p11), %s11662_s3, 9216, %s9142_s6, [#allocation12], %s11668_s23, %s11668_s23, %s9050_s27  }
  0x3f   : > { %s8884_s10 = scalar_lea.hbm %s11661_s2, 16 }
  0x40   : > { %p8885_p6 = scmp.ne.s32.totalorder %s11661_s2, %s8884_s10  ;;  %p8891_p5 = scmp.lt.u32.totalorder %s8884_s10, %s11661_s2 }
  0x42   : > { %p8887_p10 = pnand %p8885_p6, %p9154_p13 }
  0x44   : > { %p8888_p3 = pneg %p8887_p10 }
  0x46   : > { %p8893_p7 = pnand %p8891_p5, %p8888_p3 }
  0x48   : > { %8896 = shalt.err (!%p8893_p7)
}
  0x49   : > { %s8897_s16 = scalar_lea.vmem %s191_s8, 16  ;;  %s8904_s6 = scalar_lea.vmem %s191_s8, 32 }
  0x4a   : > { %p8898_p9 = scmp.ne.s32.totalorder %s191_s8, %s8897_s16  ;;  %p8905_p1 = scmp.lt.s32.totalorder %s191_s8, %s191_s8 }
  0x4b   : > { %p8906_p2 = scmp.lt.s32.totalorder %s8904_s6, %s8897_s16 }
  0x4c   : > { %p8900_p12 = pnand %p8898_p9, %p9154_p13 }
  0x4d   : > { %p8907_p4 = por %p8906_p2, %p8905_p1 }
  0x4e   : > { %p8901_p0 = pneg %p8900_p12 }
  0x50   : > { %p8908_p8 = pnand %p8907_p4, %p8901_p0 }
  0x52   : > { %8911 = shalt.err (!%p8908_p8)
}
  0x53   : > { %8557 = dma.hbm_to_vmem [thread:$0]  (!%p9138_p11), %s11661_s2, 16, %s191_s8, [#allocation9]  }
  0x54   : > { %s9051_s30 = smov [#allocation13]   ;;  %s8912_s11 = scalar_lea.hbm %s11663_s4, 16 }
  0x55   : > { %s214_s7 = sshll.u32 %s9051_s30, 4  ;;  %p8913_p6 = scmp.ne.s32.totalorder %s11663_s4, %s8912_s11  ;;  %s215_s7 = int_to_ptr.vmem [resolvable:$true] %s214_s7 }
  0x56   : > { %p8919_p10 = scmp.lt.u32.totalorder %s8912_s11, %s11663_s4 }
  0x57   : > { %p8915_p4 = pnand %p8913_p6, %p9154_p13 }
  0x59   : > { %p8916_p8 = pneg %p8915_p4 }
  0x5b   : > { %p8921_p3 = pnand %p8919_p10, %p8916_p8 }
  0x5d   : > { %8924 = shalt.err (!%p8921_p3)
}
  0x5e   : > { %s8925_s8 = scalar_lea.vmem %s215_s7, 16  ;;  %s8932_s6 = scalar_lea.vmem %s215_s7, 32 }
  0x5f   : > { %p8926_p5 = scmp.ne.s32.totalorder %s215_s7, %s8925_s8  ;;  %p8933_p12 = scmp.lt.s32.totalorder %s215_s7, %s215_s7 }
  0x60   : > { %p8934_p0 = scmp.lt.s32.totalorder %s8932_s6, %s8925_s8 }
  0x61   : > { %p8928_p7 = pnand %p8926_p5, %p9154_p13 }
  0x62   : > { %p8935_p1 = por %p8934_p0, %p8933_p12 }
  0x63   : > { %p8929_p9 = pneg %p8928_p7 }
  0x65   : > { %p8936_p2 = pnand %p8935_p1, %p8929_p9 }
  0x67   : > { %8939 = shalt.err (!%p8936_p2)
}
  0x68   : > { %8563 = dma.hbm_to_vmem [thread:$0]  (!%p9138_p11), %s11663_s4, 16, %s215_s7, [#allocation12]  }
  0x69   : > { %s9242_s14 = sadd.s32 1, %s9044_s21   ;;  %s30_s30 = sadd.s32 1, %s9040_s20 }
  0x6a   : > { %s27_s29 = ssub.s32 %s9044_s21, %s9242_s14  ;;  %p37_p13 = scmp.ne.s32.totalorder %s9040_s20, %s9036_s19 }
  0x6b   : > { %p28_p6 = scmp.eq.s32.totalorder %s27_s29, 0  ;;  %p38_p4 = scmp.eq.s32.totalorder %s9044_s21, 0 }
  0x6c   : > { %p11714_p8 = scmp.eq.s32.totalorder %s9108_s22, 1  ;;  %p8576_p3 = scmp.lt.s32.totalorder %s9044_s21, 2 }
  0x6d   : > { %s9258_s10 = scalar_select %p28_p6, %s9040_s20, %s30_s30  }
  0x6e   : > { %p9252_p10 = por %p11714_p8, %p37_p13  ;;  %p39_p5 = por %p38_p4, %p37_p13 }
  0x6f   : > { %s225_s11 = sand.u32 1, %s9040_s20   ;;  %s8529_s7 = smul.u32 3456, %s9044_s21 }
  0x70   : > { %s8528_s12 = smul.u32 216, %s225_s11  ;;  %p9262_p11 = pnand %p8576_p3, %p39_p5 }
  0x71   : > { %s9269_s8 = scalar_lea.hbm %s11659_s0, %s8529_s7  ;;  %s9273_s17 = scalar_lea.sflag [#allocation6], %s225_s11 }
  0x72   : > { %s229_s6 = scalar_lea.vmem [#allocation5], %s8528_s12  ;;  %s8940_s30 = scalar_lea.hbm %s9269_s8, 3456 }
  0x73   : > { %s236_s28 = sshll.u32 %s229_s6, 4  ;;  %p8941_p7 = scmp.ne.s32.totalorder %s9269_s8, %s8940_s30  ;;  %s9271_s28 = int_to_ptr.vmem [resolvable:$true] %s236_s28 }
  0x74   : > { %p8942_p9 = pneg %p9262_p11  ;;  %s8945_s15 = scalar_lea.hbm %s11659_s0, 6912 }
  0x75   : > { %p8946_p1 = scmp.lt.u32.totalorder %s9269_s8, %s11659_s0  ;;  %p8947_p2 = scmp.lt.u32.totalorder %s8945_s15, %s8940_s30 }
  0x76   : > { %p8943_p12 = pnand %p8942_p9, %p8941_p7  ;;  %p8949_p6 = scmp.lt.u32.totalorder %s8940_s30, %s9269_s8 }
  0x77   : > { %p8948_p13 = por %p8947_p2, %p8946_p1 }
  0x78   : > { %p8944_p0 = pneg %p8943_p12 }
  0x79   : > { %p8950_p4 = por %p8949_p6, %p8948_p13 }
  0x7b   : > { %p8951_p8 = pnand %p8950_p4, %p8944_p0 }
  0x7d   : > { %8954 = shalt.err (!%p8951_p8)
}
  0x7e   : > { %s8955_s11 = scalar_lea.vmem %s9271_s28, 3456  ;;  %s9052_s12 = smov [#allocation5]  }
  0x7f   : > { %p8956_p3 = scmp.ne.s32.totalorder %s9271_s28, %s8955_s11  ;;  %s8960_s6 = sshll.u32 %s9052_s12, 4  ;;  %s8961_s6 = int_to_ptr.vmem [resolvable:$false] %s8960_s6 }
  0x80   : > { %s8962_s23 = scalar_lea.vmem %s8961_s6, 6912  ;;  %p8963_p12 = scmp.lt.s32.totalorder %s9271_s28, %s8961_s6 }
  0x81   : > { %p8958_p5 = pnand %p8956_p3, %p8942_p9  ;;  %p8964_p1 = scmp.lt.s32.totalorder %s8962_s23, %s8955_s11 }
  0x83   : > { %p8959_p7 = pneg %p8958_p5  ;;  %p8965_p2 = por %p8964_p1, %p8963_p12 }
  0x85   : > { %p8966_p13 = pnand %p8965_p2, %p8959_p7 }
  0x87   : > { %8969 = shalt.err (!%p8966_p13)
}
  0x88   : > { %s11717_s30 = smov 64   ;;  %p11718_p9 = scmp.ne.s32.totalorder %s11711_s26, 0 }
  0x89   : > { %8567 = dma.hbm_to_vmem [thread:$0]  (!%p9262_p11), %s9269_s8, 3456, %s9271_s28, %s9273_s17, %s11717_s30, %s11717_s30, %s9050_s27  }
  0x8a   : > { %248 = sbr.rel (%p11718_p9) target bundleno = 1312 (0x520), region = 40 }
  0x91   : > { %s9307_s29 = sand.u32 1, %s9036_s19   ;;  %p11719_p0 = scmp.ne.s32.totalorder %s11709_s24, 0 }
  0x92   : > { %s8530_s7 = smul.u32 216, %s9307_s29  ;;  %s251_s15 = scalar_lea.sflag [#allocation6], %s9307_s29 }
  0x94   : > { %s9311_s16 = scalar_lea.vmem [#allocation5], %s8530_s7 }
  0x95   : > { %9015 = dma.done.wait (%p11719_p0), %s251_s15, 3456  }
  0x96   : > { %9017 = vsyncadd (%p11719_p0), %s251_s15, 4294963840  ;;  %p11720_p11 = scmp.eq.s32.totalorder %s9108_s22, 0 }
  0x98   : > { %9019 = dma.done.wait (%p11720_p11), [#allocation9], 9232   ;;  %p11721_p6 = pmov %p11720_p11 }
  0x9a   : > { %9021 = vsyncadd (%p11721_p6), [#allocation9], 4294958064  ;;  %p11722_p4 = pmov %p11721_p6 }
  0x9c   : > { %9023 = dma.done.wait (%p11722_p4), [#allocation12], 9232   ;;  %p11723_p8 = pmov %p11722_p4 }
  0x9d   : > { %v8623_v0 = vld [vmem:[#allocation8 + $0x100] sm:$0xff]   ;;  %v8627_v4 = vld [vmem:[#allocation8 + $0x108] sm:$0xff]   ;;  %v8631_v8 = vld [vmem:[#allocation8 + $0x110] sm:$0xff]   ;;  %vm514_vm0 = vsmask.f32 3328  ;;  %v11724_v53 = vmov 0 }
  0x9e   : > { %9025 = vsyncadd (%p11723_p8), [#allocation12], 4294958064  ;;  %v8624_v1 = vld [vmem:[#allocation8 + $0xc0] sm:$0xff]   ;;  %7104 = vmatprep.subr.bf16.mxu0 %v8623_v0  ;;  %v8628_v5 = vld [vmem:[#allocation8 + $0xc8] sm:$0xff]   ;;  %vm515_vm1 = vsmask.f32 7440 }
  0x9f   : > { %v8625_v2 = vld [vmem:[#allocation8 + $0x40] sm:$0xff]   ;;  %7105 = vmatpush3.bf16.msra.mxu0 %v8624_v1  ;;  %v8629_v6 = vld [vmem:[#allocation8 + $0x48] sm:$0xff]   ;;  %v8632_v9 = vld [vmem:[#allocation8 + $0xd0] sm:$0xff]   ;;  %vm1147_vm3 = vcmask 1042432   ;;  %vm1148_vm4 = vcmask 1046532   ;;  %vm3119_vm6 = vcmask 1040384  }
  0xa0   : > { %v8626_v3 = vld [vmem:[#allocation8] sm:$0xff]   ;;  %7240 = vmatprep.subr.bf16.mxu1 %v8625_v2  ;;  %7106 = vmatprep.subr.bf16.mxu0 %v8627_v4  ;;  %v8630_v7 = vld [vmem:[#allocation8 + $0x8] sm:$0xff]   ;;  %v8633_v10 = vld [vmem:[#allocation8 + $0x50] sm:$0xff]   ;;  %vm3120_vm7 = vsmask.f32 256  ;;  %vm3651_vm11 = vcmask 1043456  }
  0xa1   : > { %7241 = vmatpush3.bf16.msra.mxu1 %v8626_v3  ;;  %v8634_v11 = vld [vmem:[#allocation8 + $0x10] sm:$0xff]   ;;  %v8635_v12 = vld [vmem:[#allocation8 + $0x118] sm:$0xff]   ;;  %v8639_v16 = vld [vmem:[#allocation8 + $0x120] sm:$0xff]   ;;  %vm3176_vm9 = vsmask.f32 7938  ;;  %s6743_s24 = sshll.u32 %s9307_s29, 8 }
  0xa2   : > { %7242 = vmatprep.subr.bf16.mxu1 %v8629_v6  ;;  %v8636_v13 = vld [vmem:[#allocation8 + $0xd8] sm:$0xff]   ;;  %v8640_v17 = vld [vmem:[#allocation8 + $0xe0] sm:$0xff]   ;;  %v8643_v20 = vld [vmem:[#allocation8 + $0x128] sm:$0xff]   ;;  %vm3328_vm12 = vsmask.f32 4368  ;;  %s11518_s26 = scalar_lea.vmem [#allocation14], %s6743_s24 }
  0xa3   : > { %7107 = vmatpush3.bf16.msra.mxu0 %v8628_v5  ;;  %v8637_v14 = vld [vmem:[#allocation8 + $0x58] sm:$0xff]   ;;  %v8641_v18 = vld [vmem:[#allocation8 + $0x60] sm:$0xff]   ;;  %v8644_v21 = vld [vmem:[#allocation8 + $0xe8] sm:$0xff]   ;;  %s7103_s27 = sshll.u32 %s9108_s22, 12  ;;  %s6619_s13 = sshll.u32 %s11518_s26, 4  ;;  %s11612_s13 = int_to_ptr.vmem [resolvable:$true] %s6619_s13 }
  0xa4   : > { %7108 = vmatprep.subr.bf16.mxu0 %v8631_v8  ;;  %v8638_v15 = vld [vmem:[#allocation8 + $0x18] sm:$0xff]   ;;  %v8642_v19 = vld [vmem:[#allocation8 + $0x20] sm:$0xff]   ;;  %v8645_v22 = vld [vmem:[#allocation8 + $0x68] sm:$0xff]   ;;  %s11610_s17 = scalar_lea.hbm %s11664_s5, %s7103_s27  ;;  %s6606_s22 = scalar_lea.sflag [#allocation7], %s9307_s29 }
  0xa5   : > { %7243 = vmatpush3.bf16.msra.mxu1 %v8630_v7  ;;  %v8646_v23 = vld [vmem:[#allocation8 + $0x28] sm:$0xff]   ;;  %v8647_v24 = vld [vmem:[#allocation8 + $0x130] sm:$0xff]   ;;  %v8651_v28 = vld [vmem:[#allocation8 + $0x138] sm:$0xff]   ;;  %s8970_s11 = scalar_lea.vmem %s11612_s13, 4096  ;;  %s9054_s12 = smov [#allocation14]  }
  0xa6   : > { %7244 = vmatprep.subr.bf16.mxu1 %v8633_v10  ;;  %v8648_v25 = vld [vmem:[#allocation8 + $0xf0] sm:$0xff]   ;;  %v8652_v29 = vld [vmem:[#allocation8 + $0xf8] sm:$0xff]   ;;  %v8656_v45 = vld [vmem:[#allocation8 + $0x140] sm:$0xff]   ;;  %p8971_p3 = scmp.ne.s32.totalorder %s11612_s13, %s8970_s11  ;;  %s8974_s6 = sshll.u32 %s9054_s12, 4  ;;  %s8975_s6 = int_to_ptr.vmem [resolvable:$false] %s8974_s6 }
  0xa7   : > { %7109 = vmatpush3.bf16.msra.mxu0 %v8632_v9  ;;  %v8649_v26 = vld [vmem:[#allocation8 + $0x70] sm:$0xff]   ;;  %v8653_v30 = vld [vmem:[#allocation8 + $0x78] sm:$0xff]   ;;  %vm9333_vm2 = vmor %vm514_vm0, %vm515_vm1  ;;  %s8976_s23 = scalar_lea.vmem %s8975_s6, 8192  ;;  %p8977_p12 = scmp.lt.s32.totalorder %s11612_s13, %s8975_s6 }
  0xa8   : > { %7110 = vmatprep.subr.bf16.mxu0 %v8635_v12  ;;  %v8650_v27 = vld [vmem:[#allocation8 + $0x30] sm:$0xff]   ;;  %v8654_v31 = vld [vmem:[#allocation8 + $0x38] sm:$0xff]   ;;  %v11725_v53 = vsel %vm9333_vm2, 4294967295, %v11724_v53  ;;  %v466_v61 = vld [vmem:[%s9311_s16 + $0x18] sm:$0xf]  ;;  %p8972_p5 = pnand %p8971_p3, %p9252_p10  ;;  %p8978_p1 = scmp.lt.s32.totalorder %s8976_s23, %s8970_s11 }
  0xa9   : > { %7245 = vmatpush3.bf16.msra.mxu1 %v8634_v11  ;;  %v463_v32 = vld [vmem:[%s9311_s16 + $0xc] sm:$0xf]  ;;  %v464_v33 = vld [vmem:[%s9311_s16 + $0x10] sm:$0xf]  ;;  %v465_v34 = vld [vmem:[%s9311_s16 + $0x14] sm:$0x1] }
  0xaa   : > { %7246 = vmatprep.subr.bf16.mxu1 %v8637_v14  ;;  %v542_v35 = vshrl.u32 %v463_v32, 16  ;;  %v545_v36 = vshll.u32 %v463_v32, 16  ;;  %v551_v37 = vshll.u32 %v464_v33, 16  ;;  %v555_v38 = vshrl.u32 %v464_v33, 16  ;;  %v460_v46 = vld [vmem:[%s9311_s16] sm:$0xf]  ;;  %vm9791_vm5 = vmor %vm1147_vm3, %vm1148_vm4  ;;  %p8973_p7 = pneg %p8972_p5  ;;  %p8979_p2 = por %p8978_p1, %p8977_p12 }
  0xab   : > { %7111 = vmatpush3.bf16.msra.mxu0 %v8636_v13  ;;  %v561_v39 = vshll.u32 %v465_v34, 16  ;;  %v461_v47 = vld [vmem:[%s9311_s16 + $0x4] sm:$0xf]  ;;  %v462_v50 = vld [vmem:[%s9311_s16 + $0x8] sm:$0x1]  ;;  %v518_v51 = vshrl.u32 %v460_v46, 16  ;;  %vm10223_vm8 = vmand %vm3119_vm6, %vm3120_vm7 }
  0xac   : > { %7112 = vmatprep.subr.bf16.mxu0 %v8639_v16  ;;  %v544_v40 = vrot.slane %v542_v35, 4  ;;  %v547_v41 = vrot.slane %v545_v36, 5  ;;  %v553_v42 = vrot.slane %v551_v37, 5  ;;  %v557_v43 = vrot.slane %v555_v38, 4  ;;  %11726 = vst [vmem:[#allocation19_spill] sm:$0xff] %v11725_v53  ;;  %v9344_v5 = vld [vmem:[%s9311_s16 + $0xc] sm:$0xff]   ;;  %vm10237_vm10 = vmand %vm3119_vm6, %vm3176_vm9  ;;  %p8980_p13 = pnand %p8979_p2, %p8973_p7 }
  0xad   : > { %7247 = vmatpush3.bf16.msra.mxu1 %v8638_v15  ;;  %v563_v44 = vrot.slane %v561_v39, 5  ;;  %v521_v52 = vshll.u32 %v460_v46, 16  ;;  %v527_v54 = vshll.u32 %v461_v47, 16  ;;  %v531_v55 = vshrl.u32 %v461_v47, 16  ;;  %v467_v1 = vld [vmem:[%s9311_s16 + $0x1c] sm:$0xf]  ;;  %vm10492_vm13 = vmand %vm3651_vm11, %vm3176_vm9 }
  0xae   : > { %7248 = vmatprep.subr.bf16.mxu1 %v8641_v18  ;;  %v548_v48 = vor.u32 %v547_v41, %v544_v40  ;;  %v558_v49 = vor.u32 %v557_v43, %v553_v42  ;;  %v537_v56 = vshll.u32 %v462_v50, 16  ;;  %v520_v59 = vrot.slane %v518_v51, 4  ;;  %v468_v7 = vld [vmem:[%s9311_s16 + $0x20] sm:$0x1]  ;;  %v469_v13 = vld [vmem:[%s9311_s16 + $0x24] sm:$0xf]  ;;  %vm10498_vm14 = vmor %vm3120_vm7, %vm3328_vm12 }
  0xaf   : > { %7113 = vmatpush3.bf16.msra.mxu0 %v8640_v17  ;;  %v523_v60 = vrot.slane %v521_v52, 5  ;;  %v529_v62 = vrot.slane %v527_v54, 5  ;;  %v533_v63 = vrot.slane %v531_v55, 4  ;;  %v566_v2 = vshrl.u32 %v466_v61, 16  ;;  %v470_v18 = vld [vmem:[%s9311_s16 + $0x28] sm:$0xf] }
  0xb0   : > { %7114 = vmatprep.subr.bf16.mxu0 %v8643_v20  ;;  %v549_v57 = vrot.slane %v548_v48, 4  ;;  %v559_v58 = vrot.slane %v558_v49, 4  ;;  %v539_v0 = vrot.slane %v537_v56, 5  ;;  %v569_v8 = vshll.u32 %v466_v61, 16  ;;  %v8660_v37 = vld [vmem:[#allocation8 + $0x148] sm:$0xff]  }
  0xb1   : > { %7249 = vmatpush3.bf16.msra.mxu1 %v8642_v19  ;;  %v524_v6 = vor.u32 %v523_v60, %v520_v59  ;;  %v534_v10 = vor.u32 %v533_v63, %v529_v62  ;;  %v568_v11 = vrot.slane %v566_v2, 4  ;;  %v575_v12 = vshll.u32 %v467_v1, 16  ;;  %v472_v41 = vld [vmem:[%s9311_s16 + $0x30] sm:$0xf]  ;;  %v474_v47 = vld [vmem:[%s9311_s16 + $0x38] sm:$0x1] }
  0xb2   : > { %7250 = vmatprep.subr.bf16.mxu1 %v8645_v22  ;;  %v554_v3 = vsel %vm9333_vm2, %v549_v57, %v553_v42  ;;  %v564_v4 = vsel %vm9333_vm2, %v559_v58, %v563_v44  ;;  %v571_v15 = vrot.slane %v569_v8, 5  ;;  %v579_v16 = vshrl.u32 %v467_v1, 16  ;;  %v473_v42 = vld [vmem:[%s9311_s16 + $0x34] sm:$0xf]  ;;  %v475_v58 = vld [vmem:[%s9311_s16 + $0x3c] sm:$0xf] }
  0xb3   : > { %7115 = vmatpush3.bf16.msra.mxu0 %v8644_v21  ;;  %v6763_v9 = vcombine.low %v554_v3, %v564_v4  ;;  %v525_v14 = vrot.slane %v524_v6, 4  ;;  %v585_v17 = vshll.u32 %v468_v7, 16  ;;  %v535_v19 = vrot.slane %v534_v10, 4  ;;  %v471_v21 = vld [vmem:[%s9311_s16 + $0x2c] sm:$0x1]  ;;  %v8681_v53 = vld [vmem:[%s9311_s16 + $0xb4] sm:$0xff]  }
  0xb4   : > { %7116 = vmatprep.subr.bf16.mxu0 %v8647_v24  ;;  %v577_v20 = vrot.slane %v575_v12, 5  ;;  %v590_v22 = vshrl.u32 %v469_v13, 16  ;;  %v599_v32 = vshll.u32 %v470_v18, 16  ;;  %v603_v36 = vshrl.u32 %v470_v18, 16  ;;  %v476_v63 = vld [vmem:[%s9311_s16 + $0x40] sm:$0xf] }
  0xb5   : > { %7251 = vmatpush3.bf16.msra.mxu1 %v8646_v23  ;;  %1690 = vmatprep.mubr.bf16.mxu0 %v6763_v9  ;;  %v593_v23 = vshll.u32 %v469_v13, 16  ;;  %v530_v24 = vsel %vm9333_vm2, %v525_v14, %v529_v62  ;;  %v609_v40 = vshll.u32 %v471_v21, 16  ;;  %v614_v48 = vshrl.u32 %v472_v41, 16  ;;  %v8663_v10 = vld [vmem:[#allocation8 + $0x150] sm:$0xff]  }
  0xb6   : > { %7252 = vmatprep.subr.bf16.mxu1 %v8649_v26  ;;  %v581_v26 = vrot.slane %v579_v16, 4  ;;  %v601_v39 = vrot.slane %v599_v32, 5  ;;  %v605_v46 = vrot.slane %v603_v36, 4  ;;  %v617_v51 = vshll.u32 %v472_v41, 16  ;;  %v482_v41 = vld [vmem:[%s9311_s16 + $0x58] sm:$0xf] }
  0xb7   : > { %7117 = vmatpush3.bf16.msra.mxu0 %v8648_v25  ;;  %v572_v25 = vor.u32 %v571_v15, %v568_v11  ;;  %v611_v50 = vrot.slane %v609_v40, 5  ;;  %v623_v52 = vshll.u32 %v473_v42, 16  ;;  %v616_v56 = vrot.slane %v614_v48, 4 }
  0xb8   : > { %7118 = vmatprep.subr.bf16.mxu0 %v8651_v28  ;;  %v540_v28 = vsel %vm9333_vm2, %v535_v19, %v539_v0  ;;  %v582_v35 = vor.u32 %v581_v26, %v577_v20  ;;  %v606_v55 = vor.u32 %v605_v46, %v601_v39  ;;  %v627_v57 = vshrl.u32 %v473_v42, 16  ;;  %v477_v0 = vld [vmem:[%s9311_s16 + $0x44] sm:$0x1]  ;;  %v478_v19 = vld [vmem:[%s9311_s16 + $0x48] sm:$0xf] }
  0xb9   : > { %7253 = vmatpush3.bf16.msra.mxu1 %v8650_v27  ;;  %v587_v27 = vrot.slane %v585_v17, 5  ;;  %v6762_v33 = vcombine.low %v530_v24, %v540_v28  ;;  %v573_v34 = vrot.slane %v572_v25, 4  ;;  %v619_v61 = vrot.slane %v617_v51, 5  ;;  %v8666_v46 = vld [vmem:[#allocation8 + $0x158] sm:$0xff]  }
  0xba   : > { %7254 = vmatprep.subr.bf16.mxu1 %v8653_v30  ;;  %v592_v30 = vrot.slane %v590_v22, 4  ;;  %v583_v44 = vrot.slane %v582_v35, 4  ;;  %v625_v62 = vrot.slane %v623_v52, 5  ;;  %v607_v1 = vrot.slane %v606_v55, 4  ;;  %v481_v35 = vld [vmem:[%s9311_s16 + $0x54] sm:$0xf] }
  0xbb   : > { %7119 = vmatpush3.bf16.msra.mxu0 %v8652_v29  ;;  %v8657_v29 = vld [vmem:[%s9311_s16] sm:$0xff]   ;;  %2156 = vmatprep.mubr.bf16.mxu1 %v6762_v33  ;;  %v578_v43 = vsel %vm9333_vm2, %v573_v34, %v577_v20  ;;  %v629_v2 = vrot.slane %v627_v57, 4  ;;  %v633_v3 = vshll.u32 %v474_v47, 16  ;;  %v638_v4 = vshrl.u32 %v475_v58, 16  ;;  %v8661_v55 = vld [vmem:[%s9311_s16 + $0x30] sm:$0xff]  }
  0xbc   : > { %7920 = vmatprep.subr.bf16.mxu0 %v8656_v45  ;;  %v588_v54 = vsel %vm9333_vm2, %v583_v44, %v587_v27  ;;  %v620_v6 = vor.u32 %v619_v61, %v616_v56  ;;  %v641_v7 = vshll.u32 %v475_v58, 16  ;;  %v647_v8 = vshll.u32 %v476_v63, 16  ;;  %v483_v61 = vld [vmem:[%s9311_s16 + $0x5c] sm:$0x1] }
  0xbd   : > { %7255 = vmatpush3.bf16.msra.mxu1 %v8654_v31  ;;  %v595_v31 = vrot.slane %v593_v23, 5  ;;  %v9367_v59 = vcombine.low %v578_v43, %v588_v54  ;;  %v612_v11 = vsel %vm9333_vm2, %v607_v1, %v611_v50  ;;  %v630_v12 = vor.u32 %v629_v2, %v625_v62  ;;  %v479_v23 = vld [vmem:[%s9311_s16 + $0x4c] sm:$0xf]  ;;  %v484_v2 = vld [vmem:[%s9311_s16 + $0x60] sm:$0xf] }
  0xbe   : > { %1691 = vmatmul.mubr.bf16.vlgmr.msra.gmra.mrb[0].mxu0 %v9344_v5  ;;  %v635_v13 = vrot.slane %v633_v3, 5  ;;  %v640_v14 = vrot.slane %v638_v4, 4  ;;  %v621_v16 = vrot.slane %v620_v6, 4  ;;  %v643_v17 = vrot.slane %v641_v7, 5  ;;  %v485_v3 = vld [vmem:[%s9311_s16 + $0x64] sm:$0xf] }
  0xbf   : > { %7921 = vmatpush3.bf16.msra.mxu0 %v8656_v45  ;;  %v596_v38 = vor.u32 %v595_v31, %v592_v30  ;;  %v9361_v45 = vld [vmem:[%s9311_s16 + $0x18] sm:$0xff]   ;;  %11727 = vst [vmem:[#allocation20_spill] sm:$0xff] %v9367_v59  ;;  %1698 = vmatprep.mubr.bf16.mxu0 %v9367_v59  ;;  %v649_v18 = vrot.slane %v647_v8, 5  ;;  %v631_v20 = vrot.slane %v630_v12, 4  ;;  %v657_v22 = vshll.u32 %v477_v0, 16 }
  0xc0   : > { %7922 = vmatprep.subr.bf16.mxu0 %v8660_v37  ;;  %2157 = vmatmul.mubr.bf16.vlgmr.msra.gmra.mrb[0].mxu1 %v8657_v29  ;;  %v662_v24 = vshrl.u32 %v478_v19, 16  ;;  %v626_v25 = vsel %vm9333_vm2, %v621_v16, %v625_v62  ;;  %v644_v26 = vor.u32 %v643_v17, %v640_v14  ;;  %v665_v27 = vshll.u32 %v478_v19, 16  ;;  %v8659_v29 = vld [vmem:[%s9311_s16 + $0x24] sm:$0xff]   ;;  %v8670_v14 = vld [vmem:[#allocation8 + $0x80] sm:$0xff]  }
  0xc1   : > { %v597_v49 = vrot.slane %v596_v38, 4  ;;  %2164 = vmatprep.mubr.bf16.mxu1 %v6763_v9  ;;  %v651_v9 = vshrl.u32 %v476_v63, 16  ;;  %v671_v28 = vshll.u32 %v479_v23, 16  ;;  %v636_v30 = vsel %vm9333_vm2, %v631_v20, %v635_v13  ;;  %v480_v38 = vld [vmem:[%s9311_s16 + $0x50] sm:$0x1]  ;;  %v8662_v16 = vld [vmem:[%s9311_s16 + $0x3c] sm:$0xff]   ;;  %7968 = vmatprep.subr.bf16.mxu1 %v8670_v14 }
  0xc2   : > { %v9389_v32 = vcombine.low %v626_v25, %v636_v30  ;;  %v664_v33 = vrot.slane %v662_v24, 4  ;;  %v667_v34 = vrot.slane %v665_v27, 5  ;;  %v675_v40 = vshrl.u32 %v479_v23, 16  ;;  %7969 = vmatpush3.bf16.msra.mxu1 %v8670_v14  ;;  %v488_v27 = vld [vmem:[%s9311_s16 + $0x70] sm:$0xf] }
  0xc3   : > { %7923 = vmatpush3.bf16.msra.mxu0 %v8660_v37  ;;  %v602_v60 = vsel %vm9333_vm2, %v597_v49, %v601_v39  ;;  %v653_v21 = vrot.slane %v651_v9, 4  ;;  %v659_v37 = vrot.slane %v657_v22, 5  ;;  %v673_v39 = vrot.slane %v671_v28, 5  ;;  %v8669_v9 = vld [vmem:[#allocation8 + $0x160] sm:$0xff]   ;;  %v487_v22 = vld [vmem:[%s9311_s16 + $0x6c] sm:$0xf] }
  0xc4   : > { %v9377_v15 = vcombine.low %v602_v60, %v612_v11  ;;  %7924 = vmatprep.subr.bf16.mxu0 %v8663_v10  ;;  %11729 = vst [vmem:[#allocation22_spill] sm:$0xff] %v9389_v32  ;;  %v677_v42 = vrot.slane %v675_v40, 4  ;;  %v686_v43 = vshrl.u32 %v481_v35, 16  ;;  %v689_v44 = vshll.u32 %v481_v35, 16  ;;  %v9426_v40 = vld [vmem:[%s9311_s16 + $0x48] sm:$0xff]  }
  0xc5   : > { %v654_v31 = vor.u32 %v653_v21, %v649_v18  ;;  %v668_v48 = vor.u32 %v667_v34, %v664_v33  ;;  %v681_v49 = vshll.u32 %v480_v38, 16  ;;  %v695_v52 = vshll.u32 %v482_v41, 16  ;;  %v8673_v33 = vld [vmem:[#allocation8 + $0x168] sm:$0xff]  }
  0xc6   : > { %1699 = vmatmul.mubr.bf16.gmra.mrb[4].mxu0 %v9361_v45  ;;  %11728 = vst [vmem:[#allocation21_spill] sm:$0xff] %v9377_v15  ;;  %v678_v51 = vor.u32 %v677_v42, %v673_v39  ;;  %v699_v54 = vshrl.u32 %v482_v41, 16  ;;  %v688_v56 = vrot.slane %v686_v43, 4  ;;  %v691_v57 = vrot.slane %v689_v44, 5  ;;  %v490_v38 = vld [vmem:[%s9311_s16 + $0x78] sm:$0xf] }
  0xc7   : > { %7925 = vmatpush3.bf16.msra.mxu0 %v8663_v10  ;;  %1706 = vmatprep.mubr.bf16.mxu0 %v9377_v15  ;;  %v655_v36 = vrot.slane %v654_v31, 4  ;;  %v669_v60 = vrot.slane %v668_v48, 4  ;;  %v683_v63 = vrot.slane %v681_v49, 5  ;;  %v697_v0 = vrot.slane %v695_v52, 5  ;;  %v489_v42 = vld [vmem:[%s9311_s16 + $0x74] sm:$0x1] }
  0xc8   : > { %2165 = vmatmul.mubr.bf16.gmra.mrb[4].mxu1 %v9344_v5  ;;  %v645_v5 = vrot.slane %v644_v26, 4  ;;  %7926 = vmatprep.subr.bf16.mxu0 %v8666_v46  ;;  %v679_v62 = vrot.slane %v678_v51, 4  ;;  %v701_v1 = vrot.slane %v699_v54, 4  ;;  %v692_v4 = vor.u32 %v691_v57, %v688_v56  ;;  %v491_v43 = vld [vmem:[%s9311_s16 + $0x7c] sm:$0xf] }
  0xc9   : > { %2172 = vmatprep.mubr.bf16.mxu1 %v9367_v59  ;;  %v660_v50 = vsel %vm9333_vm2, %v655_v36, %v659_v37  ;;  %v705_v6 = vshll.u32 %v483_v61, 16  ;;  %v710_v7 = vshrl.u32 %v484_v2, 16  ;;  %v713_v8 = vshll.u32 %v484_v2, 16  ;;  %v492_v61 = vld [vmem:[%s9311_s16 + $0x80] sm:$0x1] }
  0xca   : > { %v650_v47 = vsel %vm9333_vm2, %v645_v5, %v649_v18  ;;  %v684_v10 = vsel %vm9333_vm2, %v679_v62, %v683_v63  ;;  %v702_v11 = vor.u32 %v701_v1, %v697_v0  ;;  %v719_v12 = vshll.u32 %v485_v3, 16  ;;  %v486_v18 = vld [vmem:[%s9311_s16 + $0x68] sm:$0x1]  ;;  %v9441_v62 = vld [vmem:[%s9311_s16 + $0x54] sm:$0xff]   ;;  %v9832_v59 = vld [vmem:[%s9311_s16 + $0x9c] sm:$0xe] }
  0xcb   : > { %7927 = vmatpush3.bf16.msra.mxu0 %v8666_v46  ;;  %v9402_v58 = vcombine.low %v650_v47, %v660_v50  ;;  %v723_v13 = vshrl.u32 %v485_v3, 16  ;;  %v693_v17 = vrot.slane %v692_v4, 4  ;;  %v712_v20 = vrot.slane %v710_v7, 4  ;;  %v493_v3 = vld [vmem:[%s9311_s16 + $0x84] sm:$0xf] }
  0xcc   : > { %7928 = vmatprep.subr.bf16.mxu0 %v8669_v9  ;;  %v715_v21 = vrot.slane %v713_v8, 5  ;;  %v703_v23 = vrot.slane %v702_v11, 4  ;;  %v707_v24 = vrot.slane %v705_v6, 5  ;;  %v721_v25 = vrot.slane %v719_v12, 5  ;;  %v8677_v4 = vld [vmem:[#allocation8 + $0x170] sm:$0xff]  }
  0xcd   : > { %11730 = vst [vmem:[#allocation23_spill] sm:$0xff] %v9402_v58  ;;  %v725_v26 = vrot.slane %v723_v13, 4  ;;  %v729_v28 = vshll.u32 %v486_v18, 16  ;;  %v734_v31 = vshrl.u32 %v487_v22, 16  ;;  %v737_v5 = vshll.u32 %v487_v22, 16 }
  0xce   : > { %1707 = vmatmul.mubr.bf16.gmra.mrb[8].mxu0 %v8659_v29  ;;  %v716_v30 = vor.u32 %v715_v21, %v712_v20  ;;  %v708_v34 = vsel %vm9333_vm2, %v703_v23, %v707_v24  ;;  %v743_v36 = vshll.u32 %v488_v27, 16  ;;  %v747_v37 = vshrl.u32 %v488_v27, 16  ;;  %v494_v8 = vld [vmem:[%s9311_s16 + $0x88] sm:$0xf]  ;;  %v496_v24 = vld [vmem:[%s9311_s16 + $0x90] sm:$0xf] }
  0xcf   : > { %1714 = vmatprep.mubr.bf16.mxu0 %v9389_v32  ;;  %7929 = vmatpush3.bf16.msra.mxu0 %v8669_v9  ;;  %v726_v35 = vor.u32 %v725_v26, %v721_v25  ;;  %v731_v41 = vrot.slane %v729_v28, 5  ;;  %v736_v47 = vrot.slane %v734_v31, 4  ;;  %v739_v48 = vrot.slane %v737_v5, 5  ;;  %v8678_v9 = vld [vmem:[#allocation8 + $0x90] sm:$0xff]  }
  0xd0   : > { %2173 = vmatmul.mubr.bf16.gmra.mrb[8].mxu1 %v9361_v45  ;;  %v674_v45 = vsel %vm9333_vm2, %v669_v60, %v673_v39  ;;  %7930 = vmatprep.subr.bf16.mxu0 %v8673_v33  ;;  %v8674_v39 = vld [vmem:[#allocation8 + $0x88] sm:$0xff]   ;;  %v717_v46 = vrot.slane %v716_v30, 4  ;;  %v9433_v50 = vrot.slane %v743_v36, 5  ;;  %v749_v51 = vrot.slane %v747_v37, 4  ;;  %v495_v31 = vld [vmem:[%s9311_s16 + $0x8c] sm:$0x1] }
  0xd1   : > { %2180 = vmatprep.mubr.bf16.mxu1 %v9377_v15  ;;  %v9415_v19 = vcombine.low %v674_v45, %v684_v10  ;;  %7970 = vmatprep.subr.bf16.mxu1 %v8674_v39  ;;  %v727_v49 = vrot.slane %v726_v35, 4  ;;  %v758_v52 = vshrl.u32 %v490_v38, 16  ;;  %v761_v54 = vshll.u32 %v490_v38, 16  ;;  %v9459_v26 = vld [vmem:[%s9311_s16 + $0x60] sm:$0xff]  }
  0xd2   : > { %7971 = vmatpush3.bf16.msra.mxu1 %v8674_v39  ;;  %v771_v56 = vshrl.u32 %v491_v43, 16  ;;  %v722_v57 = vsel %vm9333_vm2, %v717_v46, %v721_v25  ;;  %v753_v60 = vshll.u32 %v489_v42, 16  ;;  %v750_v1 = vor.u32 %v749_v51, %v9433_v50  ;;  %v497_v25 = vld [vmem:[%s9311_s16 + $0x94] sm:$0xf] }
  0xd3   : > { %11731 = vst [vmem:[#allocation24_spill] sm:$0xff] %v9415_v19  ;;  %7931 = vmatpush3.bf16.msra.mxu0 %v8673_v33  ;;  %v732_v63 = vsel %vm9333_vm2, %v727_v49, %v731_v41  ;;  %v760_v2 = vrot.slane %v758_v52, 4  ;;  %v763_v45 = vrot.slane %v761_v54, 5  ;;  %v777_v14 = vshll.u32 %v492_v61, 16  ;;  %7972 = vmatprep.subr.bf16.mxu1 %v8678_v9  ;;  %v8683_v52 = vld [vmem:[#allocation8 + $0xa0] sm:$0xff]  }
  0xd4   : > { %v773_v7 = vrot.slane %v771_v56, 4  ;;  %7932 = vmatprep.subr.bf16.mxu0 %v8677_v4  ;;  %v9451_v10 = vcombine.low %v722_v57, %v732_v63  ;;  %v755_v11 = vrot.slane %v753_v60, 5  ;;  %v751_v13 = vrot.slane %v750_v1, 4  ;;  %v8684_v60 = vld [vmem:[#allocation8 + $0xa8] sm:$0xff]   ;;  %v9486_v61 = vld [vmem:[%s9311_s16 + $0x6c] sm:$0xff]  }
  0xd5   : > { %v782_v18 = vshrl.u32 %v493_v3, 16  ;;  %v785_v20 = vshll.u32 %v493_v3, 16  ;;  %v791_v21 = vshll.u32 %v494_v8, 16  ;;  %v795_v23 = vshrl.u32 %v494_v8, 16  ;;  %v9491_v3 = vld [vmem:[%s9311_s16 + $0xa4] sm:$0x1] }
  0xd6   : > { %1715 = vmatmul.mubr.bf16.gmra.mrb[12].mxu0 %v8661_v55  ;;  %11733 = vst [vmem:[#allocation26_spill] sm:$0xff] %v9451_v10  ;;  %7973 = vmatpush3.bf16.msra.mxu1 %v8678_v9  ;;  %v756_v28 = vsel %vm9333_vm2, %v751_v13, %v755_v11  ;;  %v806_v36 = vshrl.u32 %v496_v24, 16  ;;  %v809_v37 = vshll.u32 %v496_v24, 16  ;;  %v815_v38 = vshll.u32 %v497_v25, 16  ;;  %v502_v8 = vld [vmem:[%s9311_s16 + $0xa8] sm:$0xf] }
  0xd7   : > { %1722 = vmatprep.mubr.bf16.mxu0 %v9402_v58  ;;  %7933 = vmatpush3.bf16.msra.mxu0 %v8677_v4  ;;  %v784_v5 = vrot.slane %v782_v18, 4  ;;  %v787_v33 = vrot.slane %v785_v20, 5  ;;  %v797_v41 = vrot.slane %v795_v23, 4  ;;  %v819_v42 = vshrl.u32 %v497_v25, 16  ;;  %v8686_v13 = vld [vmem:[#allocation8 + $0xb0] sm:$0xff]  }
  0xd8   : > { %2181 = vmatmul.mubr.bf16.gmra.mrb[12].mxu1 %v8659_v29  ;;  %v698_v29 = vsel %vm9333_vm2, %v693_v17, %v697_v0  ;;  %v740_v0 = vor.u32 %v739_v48, %v736_v47  ;;  %v764_v17 = vor.u32 %v763_v45, %v760_v2  ;;  %v499_v47 = vld [vmem:[%s9311_s16 + $0x9c] sm:$0xf]  ;;  %v8682_v48 = vld [vmem:[#allocation8 + $0x178] sm:$0xff]   ;;  %v808_v49 = vrot.slane %v806_v36, 4  ;;  %v508_v36 = vld [vmem:[%s9311_s16 + $0xc0] sm:$0xf] }
  0xd9   : > { %2188 = vmatprep.mubr.bf16.mxu1 %v9389_v32  ;;  %v9431_v44 = vcombine.low %v698_v29, %v708_v34  ;;  %v779_v29 = vrot.slane %v777_v14, 5  ;;  %v9468_v34 = vrot.slane %v791_v21, 5  ;;  %v788_v46 = vor.u32 %v787_v33, %v784_v5  ;;  %7934 = vmatprep.subr.bf16.mxu0 %v8682_v48  ;;  %v505_v24 = vld [vmem:[%s9311_s16 + $0xb4] sm:$0xf]  ;;  %v9514_v5 = vld [vmem:[%s9311_s16 + $0x78] sm:$0xff]  }
  0xda   : > { %v741_v12 = vrot.slane %v740_v0, 4  ;;  %v765_v30 = vrot.slane %v764_v17, 4  ;;  %v9476_v51 = vrot.slane %v815_v38, 5  ;;  %v821_v57 = vrot.slane %v819_v42, 4  ;;  %v500_v0 = vld [vmem:[%s9311_s16 + $0xa0] sm:$0xf] }
  0xdb   : > { %11732 = vst [vmem:[#allocation25_spill] sm:$0xff] %v9431_v44  ;;  %v798_v56 = vor.u32 %v797_v41, %v9468_v34  ;;  %7935 = vmatpush3.bf16.msra.mxu0 %v8682_v48  ;;  %v789_v1 = vrot.slane %v788_v46, 4  ;;  %v503_v17 = vld [vmem:[%s9311_s16 + $0xac] sm:$0xf]  ;;  %v854_v18 = vshrl.u32 %v502_v8, 16  ;;  %v849_v23 = vshll.u32 %v9491_v3, 16 }
  0xdc   : > { %v746_v27 = vsel %vm9333_vm2, %v741_v12, %v9433_v50  ;;  %v811_v50 = vrot.slane %v809_v37, 5  ;;  %v822_v11 = vor.u32 %v821_v57, %v9476_v51  ;;  %v839_v12 = vshll.u32 %v500_v0, 16  ;;  %v9828_v32 = vld [vmem:[%s9311_s16 + $0x98] sm:$0x1] }
  0xdd   : > { %v9471_v39 = vcombine.low %v746_v27, %v756_v28  ;;  %v799_v9 = vrot.slane %v798_v56, 4  ;;  %v794_v14 = vsel %vm9333_vm2, %v789_v1, %v9468_v34  ;;  %v504_v34 = vld [vmem:[%s9311_s16 + $0xb0] sm:$0x1]  ;;  %v856_v37 = vrot.slane %v854_v18, 4  ;;  %v507_v1 = vld [vmem:[%s9311_s16 + $0xbc] sm:$0x1] }
  0xde   : > { %1723 = vmatmul.mubr.bf16.gmra.mrb[16].mxu0 %v8662_v16  ;;  %v812_v45 = vor.u32 %v811_v50, %v808_v49  ;;  %v823_v27 = vrot.slane %v822_v11, 4  ;;  %v9510_v28 = vrot.slane %v839_v12, 5  ;;  %v867_v38 = vshrl.u32 %v503_v17, 16  ;;  %v8672_v18 = vld [vmem:[%s9311_s16 + $0x84] sm:$0xff]  }
  0xdf   : > { %1730 = vmatprep.mubr.bf16.mxu0 %v9415_v19  ;;  %11734 = vst [vmem:[#allocation27_spill] sm:$0xff] %v9471_v39  ;;  %v878_v41 = vshrl.u32 %v505_v24, 16  ;;  %v881_v42 = vshll.u32 %v505_v24, 16  ;;  %v902_v50 = vshrl.u32 %v508_v36, 16  ;;  %v897_v24 = vshll.u32 %v507_v1, 16 }
  0xe0   : > { %2189 = vmatmul.mubr.bf16.gmra.mrb[16].mxu1 %v8661_v55  ;;  %v767_v55 = vshll.u32 %v491_v43, 16  ;;  %v498_v43 = vld [vmem:[%s9311_s16 + $0x98] sm:$0x1]  ;;  %v813_v20 = vrot.slane %v812_v45, 4 }
  0xe1   : > { %2196 = vmatprep.mubr.bf16.mxu1 %v9402_v58  ;;  %v825_v2 = vshll.u32 %v498_v43, 16  ;;  %v883_v3 = vrot.slane %v881_v42, 5  ;;  %v9756_v42 = vld [vmem:[%s9311_s16 + $0x84] sm:$0xe]  ;;  %v9811_v58 = vld [vmem:[%s9311_s16 + $0x8c] sm:$0x1] }
  0xe2   : > { %v9447_v6 = vrot.slane %v767_v55, 5  ;;  %v818_v48 = vsel %vm9333_vm2, %v813_v20, %v9476_v51  ;;  %v873_v51 = vshll.u32 %v504_v34, 16  ;;  %11741 = vst [vmem:[#allocation34_spill] sm:$0xff] %v9756_v42 }
  0xe4   : > { %v774_v22 = vor.u32 %v773_v7, %v9447_v6  ;;  %v770_v54 = vsel %vm9333_vm2, %v765_v30, %v9447_v6  ;;  %v830_v6 = vshrl.u32 %v499_v47, 16  ;;  %v833_v7 = vshll.u32 %v499_v47, 16  ;;  %v506_v30 = vld [vmem:[%s9311_s16 + $0xb8] sm:$0xf] }
  0xe5   : > { %v887_v46 = vshll.u32 %v506_v30, 16  ;;  %v891_v47 = vshrl.u32 %v506_v30, 16 }
  0xe6   : > { %1731 = vmatmul.mubr.bf16.gmra.mrb[20].mxu0 %v9426_v40  ;;  %v775_v35 = vrot.slane %v774_v22, 4  ;;  %v832_v21 = vrot.slane %v830_v6, 4  ;;  %v835_v22 = vrot.slane %v833_v7, 5 }
  0xe7   : > { %1738 = vmatprep.mubr.bf16.mxu0 %v9431_v44  ;;  %v9534_v45 = vrot.slane %v887_v46, 5  ;;  %v893_v6 = vrot.slane %v891_v47, 4  ;;  %v9571_v46 = vld [vmem:[%s9311_s16 + $0x90] sm:$0xff]  }
  0xe8   : > { %2197 = vmatmul.mubr.bf16.gmra.mrb[20].mxu1 %v8662_v16  ;;  %v8680_v16 = vld [vmem:[#allocation8 + $0x98] sm:$0xff]   ;;  %v780_v55 = vsel %vm9333_vm2, %v775_v35, %v779_v29  ;;  %v857_v29 = vshll.u32 %v502_v8, 16  ;;  %v863_v35 = vshll.u32 %v503_v17, 16  ;;  %v851_v17 = vrot.slane %v849_v23, 5 }
  0xe9   : > { %2204 = vmatprep.mubr.bf16.mxu1 %v9415_v19  ;;  %7974 = vmatprep.subr.bf16.mxu1 %v8680_v16  ;;  %v9494_v4 = vcombine.low %v770_v54, %v780_v55  ;;  %v836_v55 = vor.u32 %v835_v22, %v832_v21  ;;  %v510_v8 = vld [vmem:[%s9311_s16 + $0xc8] sm:$0x1]  ;;  %v894_v22 = vor.u32 %v893_v6, %v9534_v45  ;;  %v9555_v23 = vld [vmem:[%s9311_s16 + $0x14] sm:$0x1]  ;;  %v9808_v19 = vld [vmem:[%s9311_s16 + $0xa0] sm:$0xf] }
  0xea   : > { %7975 = vmatpush3.bf16.msra.mxu1 %v8680_v16  ;;  %v9501_v16 = vrot.slane %v825_v2, 5  ;;  %v859_v49 = vrot.slane %v857_v29, 5  ;;  %v880_v2 = vrot.slane %v878_v41, 4  ;;  %v921_v29 = vshll.u32 %v510_v8, 16  ;;  %v9622_v8 = vld [vmem:[%s9311_s16 + $0x2c] sm:$0x1] }
  0xeb   : > { %7976 = vmatprep.subr.bf16.mxu1 %v8683_v52  ;;  %11735 = vst [vmem:[#allocation28_spill] sm:$0xff] %v9494_v4 }
  0xec   : > { %v828_v54 = vsel %vm9333_vm2, %v823_v27, %v9501_v16  ;;  %v860_v7 = vor.u32 %v859_v49, %v856_v37  ;;  %v884_v21 = vor.u32 %v883_v3, %v880_v2  ;;  %v875_v27 = vrot.slane %v873_v51, 5  ;;  %v9614_v2 = vld [vmem:[%s9311_s16 + $0x8] sm:$0x1] }
  0xed   : > { %v9561_v37 = vrot.slane %v897_v24, 5  ;;  %v9566_v41 = vrot.slane %v921_v29, 5  ;;  %v11756_v15 = vrot.slane %v9614_v2, 5 }
  0xee   : > { %1739 = vmatmul.mubr.bf16.gmra.mrb[24].mxu0 %v9441_v62  ;;  %7977 = vmatpush3.bf16.msra.mxu1 %v8683_v52  ;;  %v8688_v52 = vld [vmem:[#allocation8 + $0x1c0] sm:$0xff]  }
  0xef   : > { %1746 = vmatprep.mubr.bf16.mxu0 %v9451_v10  ;;  %7978 = vmatprep.subr.bf16.mxu1 %v8684_v60 }
  0xf0   : > { %2205 = vmatmul.mubr.bf16.gmra.mrb[24].mxu1 %v9426_v40  ;;  %v801_v40 = vshll.u32 %v495_v31, 16  ;;  %v8687_v31 = vld [vmem:[#allocation8 + $0xb8] sm:$0xff]   ;;  %7376 = vmatprep.subr.bf16.mxu0 %v8688_v52  ;;  %v9585_v52 = vld [vmem:[%s9311_s16 + $0x1c] sm:$0xf] }
  0xf1   : > { %2212 = vmatprep.mubr.bf16.mxu1 %v9431_v44  ;;  %v11671_v51 = vrot.slane %v9585_v52, 5 }
  0xf2   : > { %v803_v63 = vrot.slane %v801_v40, 5  ;;  %7979 = vmatpush3.bf16.msra.mxu1 %v8684_v60  ;;  %v509_v40 = vld [vmem:[%s9311_s16 + $0xc4] sm:$0xf] }
  0xf3   : > { %7980 = vmatprep.subr.bf16.mxu1 %v8686_v13  ;;  %v911_v56 = vshll.u32 %v509_v40, 16  ;;  %v915_v57 = vshrl.u32 %v509_v40, 16  ;;  %v9653_v24 = vrot.slane %v11671_v51, 4  ;;  %v9693_v51 = vld [vmem:[%s9311_s16 + $0x58] sm:$0xf] }
  0xf4   : > { %v804_v25 = vsel %vm9333_vm2, %v799_v9, %v803_v63  ;;  %v9530_v63 = vrot.slane %v863_v35, 5  ;;  %v904_v9 = vrot.slane %v902_v50, 4  ;;  %v9557_v35 = vrot.slane %v884_v21, 4  ;;  %v9643_v21 = vld [vmem:[%s9311_s16 + $0x40] sm:$0xf]  ;;  %v8679_v50 = vld [vmem:[%s9311_s16 + $0xa8] sm:$0xff]  }
  0xf5   : > { %v9521_v43 = vcombine.low %v794_v14, %v804_v25  ;;  %v9538_v12 = vrot.slane %v911_v56, 5  ;;  %v837_v14 = vrot.slane %v836_v55, 4  ;;  %v861_v25 = vrot.slane %v860_v7, 4  ;;  %v9592_v55 = vld [vmem:[%s9311_s16] sm:$0xe] }
  0xf6   : > { %1747 = vmatmul.mubr.bf16.gmra.mrb[28].mxu0 %v9459_v26  ;;  %7981 = vmatpush3.bf16.msra.mxu1 %v8686_v13  ;;  %v9541_v13 = vcombine.low %v818_v48, %v828_v54  ;;  %v9589_v54 = vld [vmem:[%s9311_s16 + $0x20] sm:$0x1]  ;;  %v9619_v7 = vld [vmem:[%s9311_s16 + $0x24] sm:$0xe]  ;;  %v890_v1 = vsel %vm9333_vm2, %v9557_v35, %v9534_v45  ;;  %v9717_v45 = vld [vmem:[%s9311_s16 + $0x70] sm:$0xf] }
  0xf7   : > { %1754 = vmatprep.mubr.bf16.mxu0 %v9471_v39  ;;  %11736 = vst [vmem:[#allocation29_spill] sm:$0xff] %v9521_v43  ;;  %7982 = vmatprep.subr.bf16.mxu1 %v8687_v31  ;;  %v842_v47 = vsel %vm9333_vm2, %v837_v14, %v9510_v28  ;;  %v9632_v14 = vld [vmem:[%s9311_s16 + $0x30] sm:$0xe]  ;;  %v9720_v35 = vld [vmem:[%s9311_s16 + $0x7c] sm:$0xf] }
  0xf8   : > { %2213 = vmatmul.mubr.bf16.gmra.mrb[28].mxu1 %v9441_v62  ;;  %v843_v62 = vshrl.u32 %v500_v0, 16  ;;  %v869_v0 = vrot.slane %v867_v38, 4  ;;  %11737 = vst [vmem:[#allocation30_spill] sm:$0xff] %v9541_v13 }
  0xf9   : > { %2220 = vmatprep.mubr.bf16.mxu1 %v9451_v10 }
  0xfa   : > { %v845_v33 = vrot.slane %v843_v62, 4  ;;  %7983 = vmatpush3.bf16.msra.mxu1 %v8687_v31  ;;  %v917_v62 = vrot.slane %v915_v57, 4  ;;  %v870_v20 = vor.u32 %v869_v0, %v9530_v63  ;;  %v9549_v31 = vld [vmem:[%s9311_s16 + $0xc] sm:$0xe]  ;;  %v9601_v57 = vld [vmem:[%s9311_s16 + $0x28] sm:$0xf] }
  0xfb   : > { %v9683_v0 = vld [vmem:[%s9311_s16 + $0x48] sm:$0xe] }
  0xfc   : > { %v846_v60 = vor.u32 %v845_v33, %v9510_v28  ;;  %v918_v30 = vor.u32 %v917_v62, %v9538_v12  ;;  %v9552_v33 = vld [vmem:[%s9311_s16 + $0x10] sm:$0xf]  ;;  %v871_v34 = vrot.slane %v870_v20, 4  ;;  %v9596_v28 = vld [vmem:[%s9311_s16 + $0x4] sm:$0xf]  ;;  %v11669_v62 = vrot.slane %v9601_v57, 5 }
  0xfd   : > { %v11674_v40 = vrot.slane %v9552_v33, 5  ;;  %v11672_v6 = vrot.slane %v9596_v28, 5  ;;  %v9640_v20 = vld [vmem:[%s9311_s16 + $0x3c] sm:$0xe] }
  0xfe   : > { %1755 = vmatmul.mubr.bf16.gmra.mrb[32].mxu0 %v9486_v61  ;;  %v847_v16 = vrot.slane %v846_v60, 4  ;;  %v9578_v49 = vrot.slane %v918_v30, 4  ;;  %v9604_v60 = vld [vmem:[%s9311_s16 + $0x34] sm:$0xf]  ;;  %v9708_v30 = vld [vmem:[%s9311_s16 + $0x64] sm:$0xf] }
  0xff   : > { %1762 = vmatprep.mubr.bf16.mxu0 %v9494_v4  ;;  %v9663_v29 = vrot.slane %v11672_v6, 4  ;;  %v9768_v6 = vld [vmem:[%s9311_s16 + $0x88] sm:$0xf]  ;;  %v11743_v10 = vrot.slane %v9708_v30, 5 }
 0x100   : > { %2221 = vmatmul.mubr.bf16.gmra.mrb[32].mxu1 %v9459_v26  ;;  %v905_v26 = vshll.u32 %v508_v36, 16  ;;  %v9559_v36 = vrot.slane %v894_v22, 4  ;;  %v852_v48 = vsel %vm9333_vm2, %v847_v16, %v851_v17  ;;  %v9635_v16 = vld [vmem:[%s9311_s16 + $0x38] sm:$0x1]  ;;  %v11670_v17 = vrot.slane %v9604_v60, 5 }
 0x101   : > { %2228 = vmatprep.mubr.bf16.mxu1 %v9471_v39  ;;  %v9598_v56 = vcombine.low %v842_v47, %v852_v48  ;;  %v9646_v22 = vld [vmem:[%s9311_s16 + $0x44] sm:$0x1]  ;;  %v11673_v47 = vrot.slane %v9643_v21, 5  ;;  %v9687_v48 = vld [vmem:[%s9311_s16 + $0x50] sm:$0x1]  ;;  %v9777_v44 = vrot.slane %v11743_v10, 4 }
 0x102   : > { %v907_v11 = vrot.slane %v905_v26, 5  ;;  %v9582_v26 = vld [vmem:[%s9311_s16 + $0x18] sm:$0xe]  ;;  %v11745_v10 = vmov 0  ;;  %v11752_v39 = vrot.slane %v9549_v31, 9 }
 0x103   : > { %11738 = vst [vmem:[#allocation31_spill] sm:$0xff] %v9598_v56  ;;  %v9713_v3 = vrot.slane %v11673_v47, 4  ;;  %v11746_v10 = vsel %vm9791_vm5, 4294967295, %v11745_v10  ;;  %v9837_v31 = vld [vmem:[%s9311_s16 + $0xa4] sm:$0x1] }
 0x104   : > { %11747 = vst [vmem:[#allocation35_spill] sm:$0xff] %v11746_v10 }
 0x106   : > { %1763 = vmatmul.mubr.bf16.gmra.mrb[36].mxu0 %v9514_v5 }
 0x107   : > { %1770 = vmatprep.mubr.bf16.mxu0 %v9521_v43 }
 0x108   : > { %2229 = vmatmul.mubr.bf16.gmra.mrb[36].mxu1 %v9486_v61  ;;  %v908_v61 = vor.u32 %v907_v11, %v904_v9  ;;  %v866_v9 = vsel %vm9333_vm2, %v861_v25, %v9530_v63  ;;  %v876_v11 = vsel %vm9333_vm2, %v871_v34, %v875_v27  ;;  %v9649_v63 = vld [vmem:[%s9311_s16 + $0x4c] sm:$0xf]  ;;  %v9655_v25 = vld [vmem:[#allocation8 + $0x200] sm:$0xff]  }
 0x109   : > { %2236 = vmatprep.mubr.bf16.mxu1 %v9494_v4  ;;  %v9657_v27 = vcombine.low %v866_v9, %v876_v11  ;;  %8016 = vmatprep.subr.bf16.mxu1 %v9655_v25  ;;  %v9676_v9 = vrot.slane %v11670_v17, 4  ;;  %v9690_v17 = vld [vmem:[%s9311_s16 + $0x54] sm:$0xe]  ;;  %v9697_v34 = vld [vmem:[%s9311_s16 + $0x5c] sm:$0x1]  ;;  %v900_v11 = vsel %vm9333_vm2, %v9559_v36, %v9561_v37  ;;  %v924_v37 = vsel %vm9333_vm2, %v9578_v49, %v9566_v41 }
 0x10a   : > { %v9564_v38 = vrot.slane %v908_v61, 4  ;;  %v8676_v61 = vld [vmem:[%s9311_s16 + $0x9c] sm:$0xff]   ;;  %v9731_v47 = vcombine.low %v890_v1, %v900_v11  ;;  %v11742_v1 = vrot.slane %v9693_v51, 5  ;;  %v11744_v41 = vrot.slane %v9717_v45, 5 }
 0x10b   : > { %11739 = vst [vmem:[#allocation32_spill] sm:$0xff] %v9657_v27  ;;  %v9753_v11 = vld [vmem:[%s9311_s16 + $0x80] sm:$0x1] }
 0x10c   : > { %11740 = vst [vmem:[#allocation33_spill] sm:$0xff] %v9731_v47  ;;  %v9772_v4 = vrot.slane %v11742_v1, 4  ;;  %v9783_v49 = vrot.slane %v11744_v41, 4  ;;  %v11751_v41 = vrot.slane %v9552_v33, 5  ;;  %v9840_v33 = vld [vmem:[%s9311_s16 + $0xac] sm:$0xf] }
 0x10e   : > { %1771 = vmatmul.mubr.bf16.gmra.mrb[40].mxu0 %v8672_v18  ;;  %v1160_v1 = vsel %vm9791_vm5, %v11752_v39, %v11751_v41  ;;  %v8685_v39 = vld [vmem:[%s9311_s16 + $0xc0] sm:$0xff]   ;;  %v9844_v41 = vld [vmem:[%s9311_s16 + $0xb8] sm:$0xf] }
 0x10f   : > { %1778 = vmatprep.mubr.bf16.mxu0 %v9541_v13 }
 0x110   : > { %2237 = vmatmul.mubr.bf16.gmra.mrb[40].mxu1 %v9514_v5  ;;  %v9608_v5 = vrot.slane %v11674_v40, 4  ;;  %v9735_v40 = vld [vmem:[%s9311_s16 + $0x60] sm:$0xe] }
 0x111   : > { %2244 = vmatprep.mubr.bf16.mxu1 %v9521_v43  ;;  %v9745_v43 = vld [vmem:[%s9311_s16 + $0x74] sm:$0x1] }
 0x116   : > { %1779 = vmatmul.mubr.bf16.gmra.mrb[44].mxu0 %v9571_v46 }
 0x117   : > { %1786 = vmatprep.mubr.bf16.mxu0 %v9598_v56 }
 0x118   : > { %2245 = vmatmul.mubr.bf16.gmra.mrb[44].mxu1 %v8672_v18  ;;  %v9671_v18 = vrot.slane %v11669_v62, 4  ;;  %v11677_v62 = vrot.slane %v9649_v63, 5 }
 0x119   : > { %2252 = vmatprep.mubr.bf16.mxu1 %v9541_v13  ;;  %v9738_v13 = vld [vmem:[%s9311_s16 + $0x68] sm:$0x1] }
 0x11a   : > { %v9726_v36 = vrot.slane %v11677_v62, 4  ;;  %v9742_v62 = vld [vmem:[%s9311_s16 + $0x6c] sm:$0xe] }
 0x11e   : > { %1787 = vmatmul.mubr.bf16.gmra.mrb[48].mxu0 %v8676_v61 }
 0x11f   : > { %1794 = vmatprep.mubr.bf16.mxu0 %v9657_v27 }
 0x120   : > { %2253 = vmatmul.mubr.bf16.gmra.mrb[48].mxu1 %v9571_v46  ;;  %v9749_v46 = vld [vmem:[%s9311_s16 + $0x78] sm:$0xe] }
 0x121   : > { %2260 = vmatprep.mubr.bf16.mxu1 %v9598_v56  ;;  %v914_v56 = vsel %vm9333_vm2, %v9564_v38, %v9538_v12 }
 0x122   : > { %v9802_v12 = vcombine.low %v914_v56, %v924_v37  ;;  %v11753_v56 = vrot.slane %v9555_v23, 5 }
 0x124   : > { %11750 = vst [vmem:[#allocation37_spill] sm:$0xff] %v9802_v12  ;;  %v1163_v37 = vsel %vm9791_vm5, %v9608_v5, %v11753_v56  ;;  %v11754_v5 = vrot.slane %v9596_v28, 5  ;;  %v11755_v56 = vrot.slane %v9592_v55, 9 }
 0x125   : > { %v6799_v23 = vcombine.low %v1160_v1, %v1163_v37  ;;  %v11757_v37 = vrot.slane %v9768_v6, 5  ;;  %v11764_v1 = vrot.slane %v9619_v7, 9  ;;  %v8692_v7 = vld [vmem:[#allocation8 + $0x1d0] sm:$0xff]  }
 0x126   : > { %1795 = vmatmul.mubr.bf16.gmra.mrb[52].mxu0 %v8679_v50  ;;  %v1153_v42 = vsel %vm9791_vm5, %v11755_v56, %v11754_v5  ;;  %v11759_v56 = vrot.slane %v9808_v19, 5  ;;  %v11762_v5 = vrot.slane %v9589_v54, 5 }
 0x127   : > { %1802 = vmatprep.mubr.bf16.mxu0 %v9731_v47 }
 0x128   : > { %2261 = vmatmul.mubr.bf16.gmra.mrb[52].mxu1 %v8676_v61  ;;  %v11748_v61 = vrot.slane %v9720_v35, 5 }
 0x129   : > { %2268 = vmatprep.mubr.bf16.mxu1 %v9657_v27  ;;  %v9805_v27 = vld [vmem:[%s9311_s16 + $0x94] sm:$0xf] }
 0x12a   : > { %v9797_v38 = vrot.slane %v11748_v61, 4  ;;  %v9814_v61 = vld [vmem:[%s9311_s16 + $0x90] sm:$0xe]  ;;  %v11758_v28 = vrot.slane %v9805_v27, 5 }
 0x12c   : > { %11749 = vst [vmem:[#allocation36_spill] sm:$0xff] %v9797_v38  ;;  %v9866_v55 = vrot.slane %v11758_v28, 4  ;;  %v9872_v38 = vrot.slane %v11759_v56, 4  ;;  %v11760_v28 = vrot.slane %v9585_v52, 5  ;;  %v1170_v56 = vsel %vm9791_vm5, %v9653_v24, %v11762_v5 }
 0x12d   : > { %v11765_v52 = vrot.slane %v9622_v8, 5  ;;  %v11766_v8 = vrot.slane %v9604_v60, 5  ;;  %v11771_v60 = vrot.slane %v9646_v22, 5  ;;  %v8695_v22 = vld [vmem:[#allocation8 + $0x198] sm:$0xff]  }
 0x12e   : > { %1803 = vmatmul.mubr.bf16.gmra.mrb[56].mxu0 %v8681_v53 }
 0x12f   : > { %1810 = vmatprep.mubr.bf16.mxu0 %v9802_v12  ;;  %v1156_v12 = vsel %vm9791_vm5, %v9663_v29, %v11756_v15  ;;  %v1246_v15 = vrot.slane %v9837_v31, 5  ;;  %v11763_v29 = vrot.slane %v9601_v57, 5  ;;  %v8691_v57 = vld [vmem:[#allocation8 + $0x188] sm:$0xff]  }
 0x130   : > { %2269 = vmatmul.mubr.bf16.gmra.mrb[56].mxu1 %v8679_v50  ;;  %v11761_v50 = vrot.slane %v9582_v26, 9  ;;  %v1177_v26 = vsel %vm9791_vm5, %v9671_v18, %v11765_v52  ;;  %v11767_v18 = vrot.slane %v9632_v14, 9  ;;  %v1191_v14 = vsel %vm9791_vm5, %v9713_v3, %v11771_v60  ;;  %v8696_v3 = vld [vmem:[#allocation8 + $0x1e0] sm:$0xff]  }
 0x131   : > { %2276 = vmatprep.mubr.bf16.mxu1 %v9731_v47  ;;  %v9862_v47 = vrot.slane %v11757_v37, 4  ;;  %v6798_v37 = vcombine.low %v1153_v42, %v1156_v12  ;;  %v1174_v42 = vsel %vm9791_vm5, %v11764_v1, %v11763_v29  ;;  %v8689_v12 = vld [vmem:[#allocation8 + $0x180] sm:$0xff]   ;;  %v11768_v1 = vrot.slane %v9635_v16, 5  ;;  %v8693_v16 = vld [vmem:[#allocation8 + $0x190] sm:$0xff]  }
 0x132   : > { %v1167_v2 = vsel %vm9791_vm5, %v11761_v50, %v11760_v28  ;;  %v9901_v24 = vcombine.low %v1174_v42, %v1177_v26  ;;  %v8699_v50 = vld [vmem:[#allocation8 + $0x208] sm:$0xff]   ;;  %v11770_v29 = vrot.slane %v9640_v20, 9  ;;  %v11773_v42 = vrot.slane %v9683_v0, 9 }
 0x133   : > { %v9899_v54 = vcombine.low %v1167_v2, %v1170_v56  ;;  %v1184_v5 = vsel %vm9791_vm5, %v9676_v9, %v11768_v1  ;;  %v11769_v2 = vrot.slane %v9643_v21, 5  ;;  %v8694_v9 = vld [vmem:[#allocation8 + $0x1d8] sm:$0xff]   ;;  %v8702_v21 = vld [vmem:[#allocation8 + $0x210] sm:$0xff]   ;;  %v11774_v52 = vrot.slane %v9687_v48, 5  ;;  %v8697_v48 = vld [vmem:[#allocation8 + $0x1a0] sm:$0xff]  }
 0x134   : > { %v8703_v56 = vld [vmem:[#allocation8 + $0x218] sm:$0xff]   ;;  %v11780_v1 = vrot.slane %v9738_v13, 5  ;;  %v8705_v13 = vld [vmem:[#allocation8 + $0x1b0] sm:$0xff]  }
 0x135   : > { %v1198_v26 = vsel %vm9791_vm5, %v9726_v36, %v11774_v52  ;;  %v1083_v52 = vld [vmem:[%s9311_s16 + $0xb0] sm:$0x1] }
 0x136   : > { %1811 = vmatmul.mubr.bf16.gmra.mrb[60].mxu0 %v8685_v39  ;;  %v8690_v39 = vld [vmem:[#allocation8 + $0x1c8] sm:$0xff]  }
 0x137   : > { %7936 = vmatprep.mubr.bf16.mxu0 %v6799_v23 }
 0x138   : > { %2277 = vmatmul.mubr.bf16.gmra.mrb[60].mxu1 %v8681_v53  ;;  %v1181_v53 = vsel %vm9791_vm5, %v11767_v18, %v11766_v8  ;;  %v11778_v8 = vrot.slane %v9708_v30, 5  ;;  %v11779_v18 = vrot.slane %v9735_v40, 9  ;;  %v11783_v30 = vrot.slane %v9745_v43, 5  ;;  %v8709_v43 = vld [vmem:[#allocation8 + $0x1b8] sm:$0xff]  }
 0x139   : > { %7984 = vmatprep.mubr.bf16.mxu1 %v6798_v37  ;;  %v1188_v37 = vsel %vm9791_vm5, %v11770_v29, %v11769_v2  ;;  %v9927_v28 = vcombine.low %v1181_v53, %v1184_v5  ;;  %v1212_v5 = vsel %vm9791_vm5, %v9777_v44, %v11780_v1  ;;  %v11781_v2 = vrot.slane %v9717_v45, 5  ;;  %v8710_v45 = vld [vmem:[#allocation8 + $0x230] sm:$0xff]  }
 0x13a   : > { %v9931_v20 = vcombine.low %v1188_v37, %v1191_v14  ;;  %v1209_v53 = vsel %vm9791_vm5, %v11779_v18, %v11778_v8  ;;  %v11782_v29 = vrot.slane %v9742_v62, 9  ;;  %v1219_v40 = vsel %vm9791_vm5, %v9783_v49, %v11783_v30  ;;  %v8708_v62 = vld [vmem:[#allocation8 + $0x1f8] sm:$0xff]  }
 0x13b   : > { %v9988_v44 = vcombine.low %v1209_v53, %v1212_v5  ;;  %v8711_v14 = vld [vmem:[#allocation8 + $0x238] sm:$0xff]   ;;  %v11784_v49 = vrot.slane %v9720_v35, 5 }
 0x13c   : > { %v1216_v37 = vsel %vm9791_vm5, %v11782_v29, %v11781_v2  ;;  %v1089_v30 = vld [vmem:[%s9311_s16 + $0xc8] sm:$0x1] }
 0x13d   : > { %v9991_v60 = vcombine.low %v1216_v37, %v1219_v40  ;;  %v1087_v37 = vld [vmem:[%s9311_s16 + $0xc0] sm:$0xe] }
 0x13e   : > { %7937 = vmatmul.mubr.bf16.vlgmr.msra.gmra.mrb[64].mxu0 %v9899_v54 }
 0x13f   : > { %7377 = vmatpush3.bf16.msra.mxu0 %v8689_v12  ;;  %7940 = vmatprep.mubr.bf16.mxu0 %v9901_v24  ;;  %v11775_v12 = vrot.slane %v9693_v51, 5  ;;  %v8700_v51 = vld [vmem:[#allocation8 + $0x1e8] sm:$0xff]  }
 0x140   : > { %7378 = vmatprep.subr.bf16.mxu0 %v8690_v39  ;;  %7985 = vmatmul.mubr.bf16.vlgmr.msra.gmra.mrb[64].mxu1 %v6799_v23  ;;  %v11772_v23 = vrot.slane %v9649_v63, 5  ;;  %v11776_v39 = vrot.slane %v9690_v17, 9  ;;  %v11777_v63 = vrot.slane %v9697_v34, 5  ;;  %v8706_v17 = vld [vmem:[#allocation8 + $0x220] sm:$0xff]   ;;  %v8701_v34 = vld [vmem:[#allocation8 + $0x1a8] sm:$0xff]  }
 0x141   : > { %7988 = vmatprep.mubr.bf16.mxu1 %v9899_v54  ;;  %8017 = vmatpush3.bf16.msra.mxu1 %v9655_v25 }
 0x142   : > { %8018 = vmatprep.subr.bf16.mxu1 %v8699_v50  ;;  %v1195_v25 = vsel %vm9791_vm5, %v11773_v42, %v11772_v23  ;;  %v1205_v0 = vsel %vm9791_vm5, %v9772_v4, %v11777_v63  ;;  %v8704_v4 = vld [vmem:[#allocation8 + $0x1f0] sm:$0xff]   ;;  %v11789_v23 = vld [vmem:[#allocation34_spill] sm:$0xff] }
 0x143   : > { %7379 = vmatpush3.bf16.msra.mxu0 %v8691_v57  ;;  %v1202_v57 = vsel %vm9791_vm5, %v11776_v39, %v11775_v12  ;;  %v9958_v36 = vcombine.low %v1195_v25, %v1198_v26  ;;  %v11790_v42 = vrot.slane %v11789_v23, 9  ;;  %v11793_v26 = vrot.slane %v9814_v61, 9  ;;  %v1084_v63 = vld [vmem:[%s9311_s16 + $0xb4] sm:$0xe] }
 0x144   : > { %7380 = vmatprep.subr.bf16.mxu0 %v8692_v7  ;;  %v8707_v7 = vld [vmem:[#allocation8 + $0x228] sm:$0xff]   ;;  %v11794_v39 = vrot.slane %v9828_v32, 5  ;;  %v1247_v32 = vsel %vm9791_vm5, %v9872_v38, %v1246_v15  ;;  %v6795_v31 = vrot.slane %v1084_v63, 9 }
 0x145   : > { %8019 = vmatpush3.bf16.msra.mxu1 %v8699_v50  ;;  %v9961_v50 = vcombine.low %v1202_v57, %v1205_v0  ;;  %v1086_v0 = vld [vmem:[%s9311_s16 + $0xbc] sm:$0x1]  ;;  %v1088_v15 = vld [vmem:[%s9311_s16 + $0xc4] sm:$0xf] }
 0x146   : > { %7941 = vmatmul.mubr.bf16.gmra.mrb[68].mxu0 %v9927_v28  ;;  %8020 = vmatprep.subr.bf16.mxu1 %v8702_v21  ;;  %v1240_v57 = vsel %vm9791_vm5, %v9866_v55, %v11794_v39  ;;  %v1260_v38 = vrot.slane %v1086_v0, 5  ;;  %v1264_v1 = vrot.slane %v1088_v15, 5 }
 0x147   : > { %7944 = vmatprep.mubr.bf16.mxu0 %v9931_v20  ;;  %7381 = vmatpush3.bf16.msra.mxu0 %v8693_v16  ;;  %v11785_v16 = vrot.slane %v9749_v46, 9  ;;  %v11791_v46 = vrot.slane %v9811_v58, 5  ;;  %v1081_v58 = vld [vmem:[%s9311_s16 + $0xa8] sm:$0xe] }
 0x148   : > { %7382 = vmatprep.subr.bf16.mxu0 %v8694_v9  ;;  %7989 = vmatmul.mubr.bf16.gmra.mrb[68].mxu1 %v9901_v24 }
 0x149   : > { %7992 = vmatprep.mubr.bf16.mxu1 %v9927_v28  ;;  %8021 = vmatpush3.bf16.msra.mxu1 %v8702_v21  ;;  %v1223_v9 = vsel %vm9791_vm5, %v11785_v16, %v11784_v49  ;;  %v11786_v21 = vrot.slane %v9753_v11, 5  ;;  %v1233_v25 = vsel %vm9791_vm5, %v9862_v47, %v11791_v46  ;;  %v11792_v47 = vrot.slane %v9805_v27, 5  ;;  %v11801_v49 = vld [vmem:[#allocation20_spill] sm:$0xff] }
 0x14a   : > { %8022 = vmatprep.subr.bf16.mxu1 %v8703_v56  ;;  %v8803_v16 = vld [vmem:[%s9311_s16 + $0x18] sm:$0xff]  }
 0x14b   : > { %7383 = vmatpush3.bf16.msra.mxu0 %v8695_v22  ;;  %v11787_v22 = vld [vmem:[#allocation36_spill] sm:$0xff]  ;;  %v1237_v12 = vsel %vm9791_vm5, %v11793_v26, %v11792_v47 }
 0x14c   : > { %7384 = vmatprep.subr.bf16.mxu0 %v8696_v3  ;;  %v11788_v3 = vrot.slane %v9768_v6, 5  ;;  %v10052_v61 = vcombine.low %v1237_v12, %v1240_v57 }
 0x14d   : > { %8023 = vmatpush3.bf16.msra.mxu1 %v8703_v56  ;;  %v1226_v56 = vsel %vm9791_vm5, %v11787_v22, %v11786_v21  ;;  %v8804_v21 = vld [vmem:[%s9311_s16 + $0x24] sm:$0xff]   ;;  %v11803_v22 = vld [vmem:[#allocation22_spill] sm:$0xff] }
 0x14e   : > { %7945 = vmatmul.mubr.bf16.gmra.mrb[72].mxu0 %v9958_v36  ;;  %8024 = vmatprep.subr.bf16.mxu1 %v8706_v17  ;;  %v1230_v35 = vsel %vm9791_vm5, %v11790_v42, %v11788_v3  ;;  %v10018_v11 = vcombine.low %v1223_v9, %v1226_v56  ;;  %v11802_v9 = vld [vmem:[#allocation21_spill] sm:$0xff]  ;;  %v11804_v3 = vld [vmem:[#allocation23_spill] sm:$0xff] }
 0x14f   : > { %7948 = vmatprep.mubr.bf16.mxu0 %v9961_v50  ;;  %7385 = vmatpush3.bf16.msra.mxu0 %v8697_v48  ;;  %v10021_v6 = vcombine.low %v1230_v35, %v1233_v25  ;;  %v11795_v48 = vrot.slane %v9808_v19, 5  ;;  %v11797_v19 = vrot.slane %v9840_v33, 5  ;;  %v8805_v56 = vld [vmem:[%s9311_s16 + $0x30] sm:$0xff]   ;;  %v8806_v25 = vld [vmem:[%s9311_s16 + $0x3c] sm:$0xff]  }
 0x150   : > { %7386 = vmatprep.subr.bf16.mxu0 %v8700_v51  ;;  %7993 = vmatmul.mubr.bf16.gmra.mrb[72].mxu1 %v9931_v20  ;;  %v11796_v51 = vrot.slane %v9832_v59, 9  ;;  %v6794_v59 = vrot.slane %v1081_v58, 9 }
 0x151   : > { %7996 = vmatprep.mubr.bf16.mxu1 %v9958_v36  ;;  %8025 = vmatpush3.bf16.msra.mxu1 %v8706_v17  ;;  %v1252_v17 = vrot.slane %v11797_v19, 4  ;;  %v11799_v8 = vmov %v11797_v19 }
 0x152   : > { %8026 = vmatprep.subr.bf16.mxu1 %v8707_v7  ;;  %v1244_v27 = vsel %vm9791_vm5, %v11796_v51, %v11795_v48  ;;  %v1251_v18 = vsel %vm9791_vm5, %v6794_v59, %v11799_v8  ;;  %v8807_v51 = vld [vmem:[%s9311_s16 + $0x48] sm:$0xff]   ;;  %v8808_v8 = vld [vmem:[%s9311_s16 + $0x54] sm:$0xff]  }
 0x153   : > { %7387 = vmatpush3.bf16.msra.mxu0 %v8701_v34  ;;  %v10055_v55 = vcombine.low %v1244_v27, %v1247_v32  ;;  %v1253_v34 = vrot.slane %v1083_v52, 5  ;;  %v11805_v52 = vld [vmem:[#allocation24_spill] sm:$0xff]  ;;  %v11806_v59 = vld [vmem:[#allocation25_spill] sm:$0xff] }
 0x154   : > { %7388 = vmatprep.subr.bf16.mxu0 %v8704_v4 }
 0x155   : > { %8027 = vmatpush3.bf16.msra.mxu1 %v8707_v7  ;;  %v11798_v7 = vrot.slane %v9844_v41, 5  ;;  %v1254_v53 = vsel %vm9791_vm5, %v1252_v17, %v1253_v34  ;;  %v1267_v41 = vrot.slane %v1089_v30, 5 }
 0x156   : > { %7949 = vmatmul.mubr.bf16.gmra.mrb[76].mxu0 %v9988_v44  ;;  %8028 = vmatprep.subr.bf16.mxu1 %v8710_v45  ;;  %v10079_v33 = vcombine.low %v1251_v18, %v1254_v53 }
 0x157   : > { %7952 = vmatprep.mubr.bf16.mxu0 %v9991_v60  ;;  %7389 = vmatpush3.bf16.msra.mxu0 %v8705_v13  ;;  %v1259_v4 = vrot.slane %v11798_v7, 4  ;;  %v11800_v5 = vmov %v11798_v7  ;;  %v6796_v13 = vrot.slane %v1087_v37, 9 }
 0x158   : > { %7390 = vmatprep.subr.bf16.mxu0 %v8708_v62  ;;  %7997 = vmatmul.mubr.bf16.gmra.mrb[76].mxu1 %v9961_v50  ;;  %v1258_v2 = vsel %vm9791_vm5, %v6795_v31, %v11800_v5  ;;  %v1266_v62 = vrot.slane %v1264_v1, 4 }
 0x159   : > { %8000 = vmatprep.mubr.bf16.mxu1 %v9988_v44  ;;  %8029 = vmatpush3.bf16.msra.mxu1 %v8710_v45  ;;  %v1261_v29 = vsel %vm9791_vm5, %v1259_v4, %v1260_v38  ;;  %v1265_v45 = vsel %vm9791_vm5, %v6796_v13, %v1264_v1  ;;  %v1091_v1 = vld [vmem:[%s9311_s16 + $0xd0] sm:$0xf]  ;;  %v1090_v13 = vld [vmem:[%s9311_s16 + $0xcc] sm:$0xe] }
 0x15a   : > { %8030 = vmatprep.subr.bf16.mxu1 %v8711_v14  ;;  %v10082_v40 = vcombine.low %v1258_v2, %v1261_v29  ;;  %v1271_v37 = vrot.slane %v1091_v1, 5 }
 0x15b   : > { %7391 = vmatpush3.bf16.msra.mxu0 %v8709_v43  ;;  %v1268_v43 = vsel %vm9791_vm5, %v1266_v62, %v1267_v41  ;;  %v1092_v62 = vld [vmem:[%s9311_s16 + $0xd4] sm:$0x1] }
 0x15d   : > { %8031 = vmatpush3.bf16.msra.mxu1 %v8711_v14  ;;  %v10091_v14 = vcombine.low %v1265_v45, %v1268_v43 }
 0x15e   : > { %7953 = vmatmul.mubr.bf16.gmra.mrb[80].mxu0 %v10018_v11 }
 0x15f   : > { %7956 = vmatprep.mubr.bf16.mxu0 %v10021_v6 }
 0x160   : > { %8001 = vmatmul.mubr.bf16.gmra.mrb[80].mxu1 %v9991_v60 }
 0x161   : > { %8004 = vmatprep.mubr.bf16.mxu1 %v10018_v11 }
 0x166   : > { %7957 = vmatmul.mubr.bf16.gmra.mrb[84].mxu0 %v10052_v61 }
 0x167   : > { %7960 = vmatprep.mubr.bf16.mxu0 %v10055_v55 }
 0x168   : > { %8005 = vmatmul.mubr.bf16.gmra.mrb[84].mxu1 %v10021_v6 }
 0x169   : > { %8008 = vmatprep.mubr.bf16.mxu1 %v10052_v61 }
 0x16e   : > { %7961 = vmatmul.mubr.bf16.gmra.mrb[88].mxu0 %v10079_v33 }
 0x16f   : > { %7964 = vmatprep.mubr.bf16.mxu0 %v10082_v40 }
 0x170   : > { %8009 = vmatmul.mubr.bf16.gmra.mrb[88].mxu1 %v10055_v55 }
 0x171   : > { %8012 = vmatprep.mubr.bf16.mxu1 %v10079_v33 }
 0x176   : > { %7965 = vmatmul.mubr.bf16.gmra.mrb[92].mxu0 %v10091_v14 }
 0x177   : > { %2719 = vmatprep.mubr.bf16.mxu0 %v11801_v49 }
 0x178   : > { %8013 = vmatmul.mubr.bf16.gmra.mrb[92].mxu1 %v10082_v40 }
 0x179   : > { %8032 = vmatprep.mubr.bf16.mxu1 %v9899_v54 }
 0x17e   : > { %2720 = vmatmul.mubr.bf16.vlgmr.msra.gmra.mrb[96].mxu0 %v8803_v16 }
 0x17f   : > { %2727 = vmatprep.mubr.bf16.mxu0 %v11802_v9  ;;  %v8809_v9 = vld [vmem:[%s9311_s16 + $0x60] sm:$0xff]  }
 0x180   : > { %8033 = vmatmul.mubr.bf16.vlgmr.msra.gmra.mrb[64].mxu1 %v9901_v24 }
 0x181   : > { %8036 = vmatprep.mubr.bf16.mxu1 %v9927_v28 }
 0x186   : > { %2728 = vmatmul.mubr.bf16.gmra.mrb[100].mxu0 %v8804_v21  ;;  %v6797_v21 = vrot.slane %v1090_v13, 9 }
 0x187   : > { %2735 = vmatprep.mubr.bf16.mxu0 %v11803_v22  ;;  %v1273_v22 = vrot.slane %v1271_v37, 4 }
 0x188   : > { %8037 = vmatmul.mubr.bf16.gmra.mrb[68].mxu1 %v9931_v20 }
 0x189   : > { %8040 = vmatprep.mubr.bf16.mxu1 %v9958_v36 }
 0x18e   : > { %2736 = vmatmul.mubr.bf16.gmra.mrb[104].mxu0 %v8805_v56 }
 0x18f   : > { %2743 = vmatprep.mubr.bf16.mxu0 %v11804_v3 }
 0x190   : > { %8041 = vmatmul.mubr.bf16.gmra.mrb[72].mxu1 %v9961_v50 }
 0x191   : > { %v7120_v54 = vpop.f32.mrb[0].mxu0  ;;  %8044 = vmatprep.mubr.bf16.mxu1 %v9988_v44 }
 0x192   : > { %v7121_v23 = vpop.f32.mrb[1].mxu0 }
 0x193   : > { %v7123_v24 = vpop.f32.mrb[2].mxu0  ;;  %v10109_v42 = vadd.f32 %v7121_v23, %v7120_v54  ;;  %v7256_v46 = vpop.f32.mrb[0].mxu1 }
 0x194   : > { %v7124_v28 = vpop.f32.mrb[3].mxu0  ;;  %v7257_v20 = vpop.f32.mrb[1].mxu1 }
 0x195   : > { %v10112_v35 = vadd.f32 %v7124_v28, %v7123_v24  ;;  %v10115_v36 = vadd.f32 %v7257_v20, %v7256_v46  ;;  %v7259_v58 = vpop.f32.mrb[2].mxu1  ;;  %v1272_v46 = vsel %vm9791_vm5, %v6797_v21, %v1271_v37 }
 0x196   : > { %2744 = vmatmul.mubr.bf16.gmra.mrb[108].mxu0 %v8806_v25  ;;  %v7260_v47 = vpop.f32.mrb[3].mxu1 }
 0x197   : > { %2751 = vmatprep.mubr.bf16.mxu0 %v11805_v52  ;;  %v10118_v50 = vadd.f32 %v7260_v47, %v7259_v58 }
 0x198   : > { %8045 = vmatmul.mubr.bf16.gmra.mrb[76].mxu1 %v9991_v60 }
 0x199   : > { %v7126_v26 = vpop.f32.mrb[4].mxu0  ;;  %8048 = vmatprep.mubr.bf16.mxu1 %v10018_v11 }
 0x19a   : > { %v7127_v12 = vpop.f32.mrb[5].mxu0 }
 0x19b   : > { %v7129_v44 = vpop.f32.mrb[6].mxu0  ;;  %v10122_v39 = vadd.f32 %v7127_v12, %v7126_v26  ;;  %v7262_v63 = vpop.f32.mrb[4].mxu1 }
 0x19c   : > { %v7130_v57 = vpop.f32.mrb[7].mxu0  ;;  %v7263_v0 = vpop.f32.mrb[5].mxu1 }
 0x19d   : > { %v10124_v48 = vadd.f32 %v7130_v57, %v7129_v44  ;;  %v10127_v27 = vadd.f32 %v7263_v0, %v7262_v63  ;;  %v7265_v32 = vpop.f32.mrb[6].mxu1  ;;  %v11809_v63 = vld [vmem:[#allocation28_spill] sm:$0xff] }
 0x19e   : > { %2752 = vmatmul.mubr.bf16.gmra.mrb[112].mxu0 %v8807_v51  ;;  %v7266_v60 = vpop.f32.mrb[7].mxu1 }
 0x19f   : > { %2759 = vmatprep.mubr.bf16.mxu0 %v11806_v59  ;;  %v10130_v19 = vadd.f32 %v7266_v60, %v7265_v32 }
 0x1a0   : > { %8049 = vmatmul.mubr.bf16.gmra.mrb[80].mxu1 %v10021_v6  ;;  %v11807_v6 = vld [vmem:[#allocation26_spill] sm:$0xff] }
 0x1a1   : > { %v7132_v11 = vpop.f32.mrb[8].mxu0  ;;  %8052 = vmatprep.mubr.bf16.mxu1 %v10052_v61 }
 0x1a2   : > { %v7133_v17 = vpop.f32.mrb[9].mxu0 }
 0x1a3   : > { %v7135_v34 = vpop.f32.mrb[10].mxu0  ;;  %v10134_v31 = vadd.f32 %v7133_v17, %v7132_v11  ;;  %v7268_v4 = vpop.f32.mrb[8].mxu1 }
 0x1a4   : > { %v7136_v7 = vpop.f32.mrb[11].mxu0  ;;  %v7269_v38 = vpop.f32.mrb[9].mxu1 }
 0x1a5   : > { %v10136_v15 = vadd.f32 %v7136_v7, %v7135_v34  ;;  %v10139_v18 = vadd.f32 %v7269_v38, %v7268_v4  ;;  %v7271_v53 = vpop.f32.mrb[10].mxu1  ;;  %v8811_v38 = vld [vmem:[%s9311_s16 + $0x78] sm:$0xff]  }
 0x1a6   : > { %2760 = vmatmul.mubr.bf16.gmra.mrb[116].mxu0 %v8808_v8  ;;  %v7272_v61 = vpop.f32.mrb[11].mxu1 }
 0x1a7   : > { %2767 = vmatprep.mubr.bf16.mxu0 %v11807_v6  ;;  %v10143_v5 = vadd.f32 %v7272_v61, %v7271_v53  ;;  %v11810_v6 = vld [vmem:[#allocation29_spill] sm:$0xff] }
 0x1a8   : > { %8053 = vmatmul.mubr.bf16.gmra.mrb[84].mxu1 %v10055_v55  ;;  %v1274_v55 = vrot.slane %v1092_v62, 5 }
 0x1a9   : > { %v7138_v2 = vpop.f32.mrb[12].mxu0  ;;  %8056 = vmatprep.mubr.bf16.mxu1 %v10079_v33  ;;  %v11808_v33 = vld [vmem:[#allocation27_spill] sm:$0xff] }
 0x1aa   : > { %v7139_v29 = vpop.f32.mrb[13].mxu0  ;;  %v1275_v20 = vsel %vm9791_vm5, %v1273_v22, %v1274_v55  ;;  %v11811_v22 = vld [vmem:[#allocation30_spill] sm:$0xff] }
 0x1ab   : > { %v7141_v30 = vpop.f32.mrb[14].mxu0  ;;  %v10149_v41 = vadd.f32 %v7139_v29, %v7138_v2  ;;  %v7274_v43 = vpop.f32.mrb[12].mxu1  ;;  %v6815_v26 = vcombine.low %v1272_v46, %v1275_v20 }
 0x1ac   : > { %v7142_v45 = vpop.f32.mrb[15].mxu0  ;;  %v7275_v49 = vpop.f32.mrb[13].mxu1 }
 0x1ad   : > { %v10151_v16 = vadd.f32 %v7142_v45, %v7141_v30  ;;  %v10154_v56 = vadd.f32 %v7275_v49, %v7274_v43  ;;  %v7277_v54 = vpop.f32.mrb[14].mxu1  ;;  %v8812_v49 = vld [vmem:[%s9311_s16 + $0x84] sm:$0xff]  }
 0x1ae   : > { %2768 = vmatmul.mubr.bf16.gmra.mrb[120].mxu0 %v8809_v9  ;;  %v7278_v3 = vpop.f32.mrb[15].mxu1 }
 0x1af   : > { %2775 = vmatprep.mubr.bf16.mxu0 %v11808_v33  ;;  %v10157_v23 = vadd.f32 %v7278_v3, %v7277_v54 }
 0x1b0   : > { %8057 = vmatmul.mubr.bf16.gmra.mrb[88].mxu1 %v10082_v40  ;;  %v8810_v40 = vld [vmem:[%s9311_s16 + $0x6c] sm:$0xff]  }
 0x1b1   : > { %v7144_v24 = vpop.f32.mrb[16].mxu0  ;;  %8060 = vmatprep.mubr.bf16.mxu1 %v10091_v14 }
 0x1b2   : > { %v7145_v28 = vpop.f32.mrb[17].mxu0 }
 0x1b3   : > { %v7147_v25 = vpop.f32.mrb[18].mxu0  ;;  %v10165_v58 = vadd.f32 %v7145_v28, %v7144_v24  ;;  %v7280_v47 = vpop.f32.mrb[16].mxu1 }
 0x1b4   : > { %v7148_v52 = vpop.f32.mrb[19].mxu0  ;;  %v7281_v12 = vpop.f32.mrb[17].mxu1 }
 0x1b5   : > { %v10167_v44 = vadd.f32 %v7148_v52, %v7147_v25  ;;  %v10170_v57 = vadd.f32 %v7281_v12, %v7280_v47  ;;  %v7283_v14 = vpop.f32.mrb[18].mxu1  ;;  %v8813_v47 = vld [vmem:[%s9311_s16 + $0x90] sm:$0xff]  }
 0x1b6   : > { %2776 = vmatmul.mubr.bf16.gmra.mrb[124].mxu0 %v8810_v40  ;;  %v7284_v0 = vpop.f32.mrb[19].mxu1  ;;  %v11812_v40 = vld [vmem:[#allocation31_spill] sm:$0xff] }
 0x1b7   : > { %2783 = vmatprep.mubr.bf16.mxu0 %v11809_v63  ;;  %v10173_v51 = vadd.f32 %v7284_v0, %v7283_v14 }
 0x1b8   : > { %8061 = vmatmul.mubr.bf16.gmra.mrb[92].mxu1 %v6815_v26 }
 0x1b9   : > { %v7150_v32 = vpop.f32.mrb[20].mxu0 }
 0x1ba   : > { %v7151_v59 = vpop.f32.mrb[21].mxu0 }
 0x1bb   : > { %v7153_v60 = vpop.f32.mrb[22].mxu0  ;;  %v10175_v11 = vadd.f32 %v7151_v59, %v7150_v32  ;;  %v7286_v34 = vpop.f32.mrb[20].mxu1 }
 0x1bc   : > { %v7154_v17 = vpop.f32.mrb[23].mxu0  ;;  %v7287_v7 = vpop.f32.mrb[21].mxu1 }
 0x1bd   : > { %v10177_v4 = vadd.f32 %v7154_v17, %v7153_v60  ;;  %v10180_v8 = vadd.f32 %v7287_v7, %v7286_v34  ;;  %v7289_v53 = vpop.f32.mrb[22].mxu1  ;;  %v511_v17 = vld [vmem:[%s9311_s16 + $0xcc] sm:$0xf] }
 0x1be   : > { %2784 = vmatmul.mubr.bf16.gmra.mrb[128].mxu0 %v8811_v38  ;;  %v7290_v1 = vpop.f32.mrb[23].mxu1 }
 0x1bf   : > { %2791 = vmatprep.mubr.bf16.mxu0 %v11810_v6  ;;  %v10183_v61 = vadd.f32 %v7290_v1, %v7289_v53  ;;  %v512_v53 = vld [vmem:[%s9311_s16 + $0xd0] sm:$0xf]  ;;  %v8814_v1 = vld [vmem:[%s9311_s16 + $0x9c] sm:$0xff]  }
 0x1c1   : > { %v7156_v2 = vpop.f32.mrb[24].mxu0 }
 0x1c2   : > { %v7157_v29 = vpop.f32.mrb[25].mxu0 }
 0x1c3   : > { %v7159_v37 = vpop.f32.mrb[26].mxu0  ;;  %v10185_v30 = vadd.f32 %v7157_v29, %v7156_v2  ;;  %v7292_v62 = vpop.f32.mrb[24].mxu1  ;;  %v926_v2 = vshrl.u32 %v511_v17, 16  ;;  %v929_v29 = vshll.u32 %v511_v17, 16 }
 0x1c4   : > { %v7160_v13 = vpop.f32.mrb[27].mxu0  ;;  %v7293_v45 = vpop.f32.mrb[25].mxu1 }
 0x1c5   : > { %v10187_v43 = vadd.f32 %v7160_v13, %v7159_v37  ;;  %v10190_v9 = vadd.f32 %v7293_v45, %v7292_v62  ;;  %v7295_v21 = vpop.f32.mrb[26].mxu1  ;;  %v11813_v62 = vld [vmem:[#allocation32_spill] sm:$0xff] }
 0x1c6   : > { %2792 = vmatmul.mubr.bf16.gmra.mrb[132].mxu0 %v8812_v49  ;;  %v7296_v55 = vpop.f32.mrb[27].mxu1  ;;  %v935_v49 = vshll.u32 %v512_v53, 16 }
 0x1c7   : > { %2799 = vmatprep.mubr.bf16.mxu0 %v11811_v22  ;;  %v10193_v54 = vadd.f32 %v7296_v55, %v7295_v21  ;;  %v939_v21 = vshrl.u32 %v512_v53, 16  ;;  %v8815_v53 = vld [vmem:[%s9311_s16 + $0xa8] sm:$0xff]  }
 0x1c9   : > { %v7162_v33 = vpop.f32.mrb[28].mxu0 }
 0x1ca   : > { %v7163_v3 = vpop.f32.mrb[29].mxu0 }
 0x1cb   : > { %v7165_v24 = vpop.f32.mrb[30].mxu0  ;;  %v10195_v28 = vadd.f32 %v7163_v3, %v7162_v33  ;;  %v7298_v20 = vpop.f32.mrb[28].mxu1  ;;  %v928_v3 = vrot.slane %v926_v2, 4  ;;  %v11816_v2 = vmov 0 }
 0x1cc   : > { %v7166_v46 = vpop.f32.mrb[31].mxu0  ;;  %v7299_v25 = vpop.f32.mrb[29].mxu1  ;;  %v11817_v2 = vsel %vm10237_vm10, 4294967295, %v11816_v2 }
 0x1cd   : > { %v10197_v52 = vadd.f32 %v7166_v46, %v7165_v24  ;;  %v10200_v26 = vadd.f32 %v7299_v25, %v7298_v20  ;;  %v7301_v12 = vpop.f32.mrb[30].mxu1  ;;  %v931_v24 = vrot.slane %v929_v29, 5  ;;  %v3125_v25 = vld [vmem:[#allocation2 + $0xc] sm:$0x1]  ;;  %11818 = vst [vmem:[#allocation36_spill] sm:$0xff] %v11817_v2 }
 0x1ce   : > { %2800 = vmatmul.mubr.bf16.gmra.mrb[136].mxu0 %v8813_v47  ;;  %v7302_v14 = vpop.f32.mrb[31].mxu1  ;;  %v8714_v29 = vld [vmem:[#allocation11 + $0xc0] sm:$0xff]  }
 0x1cf   : > { %2807 = vmatprep.mubr.bf16.mxu0 %v11812_v40  ;;  %v10203_v63 = vadd.f32 %v7302_v14, %v7301_v12  ;;  %v10219_v12 = vrot.slane %v935_v49, 5  ;;  %v941_v40 = vrot.slane %v939_v21, 4 }
 0x1d1   : > { %v7168_v0 = vpop.f32.mrb[32].mxu0  ;;  %v942_v49 = vor.u32 %v941_v40, %v10219_v12 }
 0x1d2   : > { %v7169_v32 = vpop.f32.mrb[33].mxu0 }
 0x1d3   : > { %v10205_v59 = vadd.f32 %v7169_v32, %v7168_v0  ;;  %v7171_v60 = vpop.f32.mrb[34].mxu0  ;;  %v7304_v7 = vpop.f32.mrb[32].mxu1 }
 0x1d4   : > { %v7172_v34 = vpop.f32.mrb[35].mxu0  ;;  %v7305_v6 = vpop.f32.mrb[33].mxu1 }
 0x1d5   : > { %v10208_v38 = vadd.f32 %v7172_v34, %v7171_v60  ;;  %v10212_v37 = vadd.f32 %v7305_v6, %v7304_v7  ;;  %v7307_v13 = vpop.f32.mrb[34].mxu1  ;;  %v513_v60 = vld [vmem:[%s9311_s16 + $0xd4] sm:$0x1]  ;;  %v3126_v34 = vsel %vm10223_vm8, 0, %v3125_v25 }
 0x1d6   : > { %2808 = vmatmul.mubr.bf16.gmra.mrb[140].mxu0 %v8814_v1  ;;  %v7308_v45 = vpop.f32.mrb[35].mxu1  ;;  %v8713_v7 = vld [vmem:[#allocation11 + $0x100] sm:$0xff]   ;;  %3127 = vst [vmem:[#allocation2 + $0xc] sm:$0x1] %v3126_v34  ;;  %v945_v21 = vshll.u32 %v513_v60, 16  ;;  %v8717_v34 = vld [vmem:[#allocation11 + $0xc8] sm:$0xff]  }
 0x1d7   : > { %2815 = vmatprep.mubr.bf16.mxu0 %v11813_v62  ;;  %v10215_v22 = vadd.f32 %v7308_v45, %v7307_v13  ;;  %v11819_v13 = vld [vmem:[#allocation33_spill] sm:$0xff]  ;;  %7512 = vmatprep.subr.bf16.mxu0 %v8713_v7  ;;  %v932_v45 = vor.u32 %v931_v24, %v928_v3  ;;  %v943_v60 = vrot.slane %v942_v49, 4 }
 0x1d8   : > { %7513 = vmatpush3.bf16.msra.mxu0 %v8714_v29  ;;  %v8718_v29 = vld [vmem:[#allocation11 + $0x148] sm:$0xff]  }
 0x1d9   : > { %v7174_v55 = vpop.f32.mrb[36].mxu0  ;;  %v933_v40 = vrot.slane %v932_v45, 4 }
 0x1da   : > { %v7175_v33 = vpop.f32.mrb[37].mxu0 }
 0x1db   : > { %v10217_v46 = vadd.f32 %v7175_v33, %v7174_v55  ;;  %v7177_v20 = vpop.f32.mrb[38].mxu0  ;;  %v7310_v14 = vpop.f32.mrb[36].mxu1  ;;  %v3181_v33 = vld [vmem:[#allocation2 + $0x14] sm:$0x1] }
 0x1dc   : > { %v7178_v47 = vpop.f32.mrb[39].mxu0  ;;  %v7311_v17 = vpop.f32.mrb[37].mxu1 }
 0x1dd   : > { %v10227_v32 = vadd.f32 %v7178_v47, %v7177_v20  ;;  %v10233_v6 = vadd.f32 %v7311_v17, %v7310_v14  ;;  %v7313_v1 = vpop.f32.mrb[38].mxu1  ;;  %v8715_v20 = vld [vmem:[#allocation11 + $0x140] sm:$0xff]   ;;  %v3182_v47 = vsel %vm10237_vm10, 0, %v3181_v33  ;;  %v8716_v14 = vld [vmem:[#allocation11 + $0x108] sm:$0xff]   ;;  %v8719_v33 = vld [vmem:[#allocation11 + $0x110] sm:$0xff]  }
 0x1de   : > { %2816 = vmatmul.mubr.bf16.gmra.mrb[144].mxu0 %v8815_v53  ;;  %v7314_v62 = vpop.f32.mrb[39].mxu1  ;;  %3183 = vst [vmem:[#allocation2 + $0x14] sm:$0x1] %v3182_v47  ;;  %8064 = vmatprep.subr.bf16.mxu1 %v8715_v20  ;;  %v947_v53 = vrot.slane %v945_v21, 5  ;;  %v8816_v47 = vld [vmem:[%s9311_s16 + $0xb4] sm:$0xff]   ;;  %v8817_v21 = vld [vmem:[%s9311_s16 + $0xc0] sm:$0xff]  }
 0x1df   : > { %2823 = vmatprep.mubr.bf16.mxu0 %v11819_v13  ;;  %v10243_v55 = vadd.f32 %v7314_v62, %v7313_v1  ;;  %7514 = vmatprep.subr.bf16.mxu0 %v8716_v14  ;;  %v8720_v14 = vld [vmem:[#allocation11 + $0xd0] sm:$0xff]  }
 0x1e0   : > { %8065 = vmatpush3.bf16.msra.mxu1 %v8715_v20  ;;  %7515 = vmatpush3.bf16.msra.mxu0 %v8717_v34  ;;  %v11822_v20 = vld [vmem:[#allocation37_spill] sm:$0xff]  ;;  %v938_v34 = vsel %vm9333_vm2, %v933_v40, %v10219_v12 }
 0x1e1   : > { %v7180_v25 = vpop.f32.mrb[40].mxu0  ;;  %8066 = vmatprep.subr.bf16.mxu1 %v8718_v29  ;;  %7516 = vmatprep.subr.bf16.mxu0 %v8719_v33  ;;  %v8723_v12 = vld [vmem:[#allocation11 + $0xd8] sm:$0xff]  }
 0x1e2   : > { %v7181_v17 = vpop.f32.mrb[41].mxu0 }
 0x1e3   : > { %v10247_v7 = vadd.f32 %v7181_v17, %v7180_v25  ;;  %v7183_v3 = vpop.f32.mrb[42].mxu0  ;;  %v7316_v1 = vpop.f32.mrb[40].mxu1  ;;  %v3128_v17 = vld [vmem:[#allocation2 + $0x18] sm:$0x1] }
 0x1e4   : > { %v7184_v24 = vpop.f32.mrb[43].mxu0  ;;  %v7317_v62 = vpop.f32.mrb[41].mxu1  ;;  %v3129_v49 = vsel %vm10223_vm8, 0, %v3128_v17  ;;  %8067 = vmatpush3.bf16.msra.mxu1 %v8718_v29  ;;  %7517 = vmatpush3.bf16.msra.mxu0 %v8720_v14  ;;  %v8722_v17 = vld [vmem:[#allocation11 + $0x118] sm:$0xff]  }
 0x1e5   : > { %v10249_v13 = vadd.f32 %v7184_v24, %v7183_v3  ;;  %v10252_v10 = vadd.f32 %v7317_v62, %v7316_v1  ;;  %v7319_v25 = vpop.f32.mrb[42].mxu1  ;;  %v948_v3 = vsel %vm9333_vm2, %v943_v60, %v947_v53  ;;  %3130 = vst [vmem:[#allocation2 + $0x18] sm:$0x1] %v3129_v49  ;;  %v3184_v1 = vld [vmem:[#allocation2 + $0x20] sm:$0x1]  ;;  %7518 = vmatprep.subr.bf16.mxu0 %v8722_v17  ;;  %v8724_v29 = vld [vmem:[#allocation11 + $0x158] sm:$0xff]  }
 0x1e6   : > { %2824 = vmatmul.mubr.bf16.gmra.mrb[148].mxu0 %v8816_v47  ;;  %v7320_v45 = vpop.f32.mrb[43].mxu1  ;;  %v8721_v62 = vld [vmem:[#allocation11 + $0x150] sm:$0xff]   ;;  %v6779_v53 = vcombine.low %v938_v34, %v948_v3  ;;  %v3187_v17 = vld [vmem:[#allocation2 + $0x2c] sm:$0x1] }
 0x1e7   : > { %11820 = vst [vmem:[#allocation34_spill] sm:$0xff] %v10249_v13  ;;  %11821 = vst [vmem:[#allocation20_spill] sm:$0xff] %v10252_v10  ;;  %2831 = vmatprep.mubr.bf16.mxu0 %v11822_v20  ;;  %v10262_v24 = vadd.f32 %v7320_v45, %v7319_v25  ;;  %v3185_v20 = vsel %vm10237_vm10, 0, %v3184_v1  ;;  %8068 = vmatprep.subr.bf16.mxu1 %v8721_v62  ;;  %v8725_v1 = vld [vmem:[#allocation11 + $0x120] sm:$0xff]   ;;  %v3131_v13 = vld [vmem:[#allocation2 + $0x24] sm:$0x1] }
 0x1e8   : > { %3186 = vst [vmem:[#allocation2 + $0x20] sm:$0x1] %v3185_v20  ;;  %8069 = vmatpush3.bf16.msra.mxu1 %v8721_v62  ;;  %7519 = vmatpush3.bf16.msra.mxu0 %v8723_v12  ;;  %v3132_v3 = vsel %vm10223_vm8, 0, %v3131_v13  ;;  %v3188_v12 = vsel %vm10237_vm10, 0, %v3187_v17  ;;  %v8732_v10 = vld [vmem:[#allocation11 + $0xf0] sm:$0xff]  }
 0x1e9   : > { %11824 = vst [vmem:[#allocation21_spill] sm:$0xff] %v10262_v24  ;;  %v7186_v47 = vpop.f32.mrb[44].mxu0  ;;  %8070 = vmatprep.subr.bf16.mxu1 %v8724_v29  ;;  %7520 = vmatprep.subr.bf16.mxu0 %v8725_v1  ;;  %3133 = vst [vmem:[#allocation2 + $0x24] sm:$0x1] %v3132_v3  ;;  %v8731_v3 = vld [vmem:[#allocation11 + $0x130] sm:$0xff]  }
 0x1ea   : > { %v7187_v33 = vpop.f32.mrb[45].mxu0  ;;  %3189 = vst [vmem:[#allocation2 + $0x2c] sm:$0x1] %v3188_v12  ;;  %v3134_v12 = vld [vmem:[#allocation2 + $0x30] sm:$0x1] }
 0x1eb   : > { %v10266_v40 = vadd.f32 %v7187_v33, %v7186_v47  ;;  %v7189_v60 = vpop.f32.mrb[46].mxu0  ;;  %v7322_v45 = vpop.f32.mrb[44].mxu1  ;;  %v8726_v47 = vld [vmem:[#allocation11 + $0xe0] sm:$0xff]  }
 0x1ec   : > { %v7190_v25 = vpop.f32.mrb[47].mxu0  ;;  %v7323_v49 = vpop.f32.mrb[45].mxu1  ;;  %8071 = vmatpush3.bf16.msra.mxu1 %v8724_v29  ;;  %7521 = vmatpush3.bf16.msra.mxu0 %v8726_v47  ;;  %v8730_v29 = vld [vmem:[#allocation11 + $0x168] sm:$0xff]  }
 0x1ed   : > { %v10268_v14 = vadd.f32 %v7190_v25, %v7189_v60  ;;  %v10271_v24 = vadd.f32 %v7323_v49, %v7322_v45  ;;  %v7325_v20 = vpop.f32.mrb[46].mxu1  ;;  %v8728_v60 = vld [vmem:[#allocation11 + $0x128] sm:$0xff]   ;;  %v8712_v45 = vld [vmem:[%s9311_s16 + $0xcc] sm:$0xff]  }
 0x1ee   : > { %2832 = vmatmul.mubr.bf16.gmra.mrb[152].mxu0 %v8817_v21  ;;  %v7326_v34 = vpop.f32.mrb[47].mxu1  ;;  %v8727_v21 = vld [vmem:[#allocation11 + $0x160] sm:$0xff]   ;;  %7522 = vmatprep.subr.bf16.mxu0 %v8728_v60  ;;  %v3135_v60 = vsel %vm10223_vm8, 0, %v3134_v12  ;;  %v8735_v12 = vld [vmem:[#allocation11 + $0xf8] sm:$0xff]  }
 0x1ef   : > { %2839 = vmatprep.mubr.bf16.mxu0 %v6779_v53  ;;  %v10275_v62 = vadd.f32 %v7326_v34, %v7325_v20  ;;  %8072 = vmatprep.subr.bf16.mxu1 %v8727_v21  ;;  %v8729_v53 = vld [vmem:[#allocation11 + $0xe8] sm:$0xff]   ;;  %3136 = vst [vmem:[#allocation2 + $0x30] sm:$0x1] %v3135_v60 }
 0x1f0   : > { %8073 = vmatpush3.bf16.msra.mxu1 %v8727_v21  ;;  %7523 = vmatpush3.bf16.msra.mxu0 %v8729_v53  ;;  %v3190_v21 = vld [vmem:[#allocation2 + $0x38] sm:$0x1]  ;;  %v8733_v53 = vld [vmem:[#allocation11 + $0x170] sm:$0xff]  }
 0x1f1   : > { %11825 = vst [vmem:[#allocation22_spill] sm:$0xff] %v10275_v62  ;;  %v7192_v33 = vpop.f32.mrb[48].mxu0  ;;  %8074 = vmatprep.subr.bf16.mxu1 %v8730_v29  ;;  %7524 = vmatprep.subr.bf16.mxu0 %v8731_v3 }
 0x1f2   : > { %v7193_v25 = vpop.f32.mrb[49].mxu0 }
 0x1f3   : > { %v10280_v49 = vadd.f32 %v7193_v25, %v7192_v33  ;;  %v7195_v13 = vpop.f32.mrb[50].mxu0  ;;  %v7328_v20 = vpop.f32.mrb[48].mxu1 }
 0x1f4   : > { %v7196_v1 = vpop.f32.mrb[51].mxu0  ;;  %v7329_v34 = vpop.f32.mrb[49].mxu1  ;;  %8075 = vmatpush3.bf16.msra.mxu1 %v8730_v29  ;;  %7525 = vmatpush3.bf16.msra.mxu0 %v8732_v10 }
 0x1f5   : > { %v10282_v47 = vadd.f32 %v7196_v1, %v7195_v13  ;;  %v10284_v17 = vadd.f32 %v7329_v34, %v7328_v20  ;;  %v7331_v62 = vpop.f32.mrb[50].mxu1  ;;  %8076 = vmatprep.subr.bf16.mxu1 %v8733_v53  ;;  %v8734_v20 = vld [vmem:[#allocation11 + $0x138] sm:$0xff]  }
 0x1f6   : > { %2840 = vmatmul.mubr.bf16.gmra.mrb[156].mxu0 %v8712_v45  ;;  %v7332_v33 = vpop.f32.mrb[51].mxu1  ;;  %v3191_v45 = vsel %vm10237_vm10, 0, %v3190_v21  ;;  %7526 = vmatprep.subr.bf16.mxu0 %v8734_v20  ;;  %v3137_v21 = vld [vmem:[#allocation2 + $0x3c] sm:$0x1] }
 0x1f7   : > { %11826 = vst [vmem:[#allocation23_spill] sm:$0xff] %v10282_v47  ;;  %11827 = vst [vmem:[#allocation24_spill] sm:$0xff] %v10284_v17  ;;  %v10288_v25 = vadd.f32 %v7332_v33, %v7331_v62 }
 0x1f8   : > { %3192 = vst [vmem:[#allocation2 + $0x38] sm:$0x1] %v3191_v45  ;;  %8077 = vmatpush3.bf16.msra.mxu1 %v8733_v53  ;;  %7527 = vmatpush3.bf16.msra.mxu0 %v8735_v12  ;;  %v3138_v45 = vsel %vm10223_vm8, 0, %v3137_v21  ;;  %v3140_v21 = vld [vmem:[#allocation2 + $0x48] sm:$0x1] }
 0x1f9   : > { %11828 = vst [vmem:[#allocation25_spill] sm:$0xff] %v10288_v25  ;;  %v7198_v13 = vpop.f32.mrb[52].mxu0  ;;  %3139 = vst [vmem:[#allocation2 + $0x3c] sm:$0x1] %v3138_v45 }
 0x1fa   : > { %v7199_v1 = vpop.f32.mrb[53].mxu0 }
 0x1fb   : > { %v10292_v34 = vadd.f32 %v7199_v1, %v7198_v13  ;;  %v7201_v47 = vpop.f32.mrb[54].mxu0  ;;  %v7334_v62 = vpop.f32.mrb[52].mxu1  ;;  %v3193_v1 = vld [vmem:[#allocation2 + $0x44] sm:$0x1] }
 0x1fc   : > { %v7202_v3 = vpop.f32.mrb[55].mxu0  ;;  %v7335_v10 = vpop.f32.mrb[53].mxu1  ;;  %v3194_v53 = vsel %vm10237_vm10, 0, %v3193_v1  ;;  %v3141_v1 = vsel %vm10223_vm8, 0, %v3140_v21 }
 0x1fd   : > { %v10294_v33 = vadd.f32 %v7202_v3, %v7201_v47  ;;  %v10296_v29 = vadd.f32 %v7335_v10, %v7334_v62  ;;  %v7337_v60 = vpop.f32.mrb[54].mxu1  ;;  %3195 = vst [vmem:[#allocation2 + $0x44] sm:$0x1] %v3194_v53  ;;  %3142 = vst [vmem:[#allocation2 + $0x48] sm:$0x1] %v3141_v1 }
 0x1fe   : > { %v7338_v25 = vpop.f32.mrb[55].mxu1 }
 0x1ff   : > { %11829 = vst [vmem:[#allocation26_spill] sm:$0xff] %v10294_v33  ;;  %11830 = vst [vmem:[#allocation27_spill] sm:$0xff] %v10296_v29  ;;  %v10300_v13 = vadd.f32 %v7338_v25, %v7337_v60 }
 0x201   : > { %11831 = vst [vmem:[#allocation28_spill] sm:$0xff] %v10300_v13  ;;  %v7204_v17 = vpop.f32.mrb[56].mxu0 }
 0x202   : > { %v7205_v47 = vpop.f32.mrb[57].mxu0 }
 0x203   : > { %v10304_v20 = vadd.f32 %v7205_v47, %v7204_v17  ;;  %v7207_v12 = vpop.f32.mrb[58].mxu0  ;;  %v7340_v62 = vpop.f32.mrb[56].mxu1 }
 0x204   : > { %v7208_v3 = vpop.f32.mrb[59].mxu0  ;;  %v7341_v33 = vpop.f32.mrb[57].mxu1 }
 0x205   : > { %11832 = vst [vmem:[#allocation29_spill] sm:$0xff] %v10304_v20  ;;  %v10306_v10 = vadd.f32 %v7208_v3, %v7207_v12  ;;  %v10308_v29 = vadd.f32 %v7341_v33, %v7340_v62  ;;  %v7343_v25 = vpop.f32.mrb[58].mxu1  ;;  %v8736_v20 = vld [vmem:[#allocation11 + $0x178] sm:$0xff]  }
 0x206   : > { %v7344_v60 = vpop.f32.mrb[59].mxu1  ;;  %8078 = vmatprep.subr.bf16.mxu1 %v8736_v20 }
 0x207   : > { %11833 = vst [vmem:[#allocation30_spill] sm:$0xff] %v10306_v10  ;;  %11834 = vst [vmem:[#allocation31_spill] sm:$0xff] %v10308_v29  ;;  %v10310_v45 = vadd.f32 %v7344_v60, %v7343_v25  ;;  %v3196_v60 = vld [vmem:[#allocation2 + $0x50] sm:$0x1]  ;;  %8079 = vmatpush3.bf16.msra.mxu1 %v8736_v20 }
 0x208   : > { %v3197_v21 = vsel %vm10237_vm10, 0, %v3196_v60 }
 0x209   : > { %11835 = vst [vmem:[#allocation32_spill] sm:$0xff] %v10310_v45  ;;  %v7210_v13 = vpop.f32.mrb[60].mxu0  ;;  %3198 = vst [vmem:[#allocation2 + $0x50] sm:$0x1] %v3197_v21  ;;  %v3199_v21 = vld [vmem:[#allocation2 + $0x5c] sm:$0x1] }
 0x20a   : > { %v7211_v17 = vpop.f32.mrb[61].mxu0 }
 0x20b   : > { %v10314_v53 = vadd.f32 %v7211_v17, %v7210_v13  ;;  %v7213_v47 = vpop.f32.mrb[62].mxu0  ;;  %v7346_v3 = vpop.f32.mrb[60].mxu1 }
 0x20c   : > { %v7214_v12 = vpop.f32.mrb[63].mxu0  ;;  %v7347_v33 = vpop.f32.mrb[61].mxu1 }
 0x20d   : > { %v10316_v10 = vadd.f32 %v7214_v12, %v7213_v47  ;;  %v10318_v62 = vadd.f32 %v7347_v33, %v7346_v3  ;;  %v7349_v25 = vpop.f32.mrb[62].mxu1 }
 0x20e   : > { %v7350_v45 = vpop.f32.mrb[63].mxu1 }
 0x20f   : > { %11836 = vst [vmem:[#allocation33_spill] sm:$0xff] %v10316_v10  ;;  %v10322_v1 = vadd.f32 %v7350_v45, %v7349_v25  ;;  %v3143_v25 = vld [vmem:[#allocation2 + $0x54] sm:$0x1] }
 0x211   : > { %v7938_v13 = vpop.f32.mrb[64].mxu0 }
 0x212   : > { %v1862_v17 = vadd.f32 %v7938_v13, %v10122_v39  ;;  %v1853_v29 = vpop.f32.mrb[65].mxu0  ;;  %v3144_v39 = vsel %vm10223_vm8, 0, %v3143_v25 }
 0x213   : > { %v1854_v47 = vadd.f32 %v10109_v42, %v1853_v29  ;;  %v7939_v12 = vpop.f32.mrb[66].mxu0  ;;  %3145 = vst [vmem:[#allocation2 + $0x54] sm:$0x1] %v3144_v39 }
 0x214   : > { %v10327_v3 = vadd.f32 %v10127_v27, %v1862_v17  ;;  %v1865_v33 = vadd.f32 %v7939_v12, %v10124_v48  ;;  %v1856_v20 = vpop.f32.mrb[67].mxu0 }
 0x215   : > { %v10331_v10 = vadd.f32 %v10115_v36, %v1854_v47  ;;  %v1857_v45 = vadd.f32 %v10112_v35, %v1856_v20  ;;  %v3200_v35 = vsel %vm10237_vm10, 0, %v3199_v21 }
 0x216   : > { %v10335_v60 = vadd.f32 %v10130_v19, %v1865_v33  ;;  %3201 = vst [vmem:[#allocation2 + $0x5c] sm:$0x1] %v3200_v35 }
 0x217   : > { %v10340_v42 = vadd.f32 %v10118_v50, %v1857_v45  ;;  %v3146_v45 = vld [vmem:[#allocation2 + $0x60] sm:$0x1] }
 0x219   : > { %v7942_v27 = vpop.f32.mrb[68].mxu0 }
 0x21a   : > { %v1878_v48 = vadd.f32 %v7942_v27, %v10149_v41  ;;  %v1869_v29 = vpop.f32.mrb[69].mxu0 }
 0x21b   : > { %v1870_v36 = vadd.f32 %v10134_v31, %v1869_v29  ;;  %v7943_v13 = vpop.f32.mrb[70].mxu0 }
 0x21c   : > { %v10347_v19 = vadd.f32 %v10154_v56, %v1878_v48  ;;  %v1881_v17 = vadd.f32 %v7943_v13, %v10151_v16  ;;  %v1872_v47 = vpop.f32.mrb[71].mxu0  ;;  %v3202_v48 = vld [vmem:[#allocation2 + $0x68] sm:$0x1] }
 0x21d   : > { %v10351_v50 = vadd.f32 %v10139_v18, %v1870_v36  ;;  %v1873_v41 = vadd.f32 %v10136_v15, %v1872_v47  ;;  %v3147_v18 = vsel %vm10223_vm8, 0, %v3146_v45 }
 0x21e   : > { %v10355_v12 = vadd.f32 %v10157_v23, %v1881_v17  ;;  %3148 = vst [vmem:[#allocation2 + $0x60] sm:$0x1] %v3147_v18  ;;  %v3149_v17 = vld [vmem:[#allocation2 + $0x6c] sm:$0x1] }
 0x21f   : > { %v10358_v31 = vadd.f32 %v10143_v5, %v1873_v41 }
 0x221   : > { %v7946_v33 = vpop.f32.mrb[72].mxu0 }
 0x222   : > { %v1894_v20 = vadd.f32 %v7946_v33, %v10175_v11  ;;  %v1885_v56 = vpop.f32.mrb[73].mxu0  ;;  %v3205_v33 = vld [vmem:[#allocation2 + $0x74] sm:$0x1] }
 0x223   : > { %v1886_v16 = vadd.f32 %v10165_v58, %v1885_v56  ;;  %v7947_v25 = vpop.f32.mrb[74].mxu0 }
 0x224   : > { %v10365_v39 = vadd.f32 %v10180_v8, %v1894_v20  ;;  %v1897_v15 = vadd.f32 %v7947_v25, %v10177_v4  ;;  %v1888_v23 = vpop.f32.mrb[75].mxu0  ;;  %v3203_v8 = vsel %vm10237_vm10, 0, %v3202_v48  ;;  %v11837_v48 = vld [vmem:[#allocation20_spill] sm:$0xff] }
 0x225   : > { %v10369_v5 = vadd.f32 %v10170_v57, %v1886_v16  ;;  %v1889_v11 = vadd.f32 %v10167_v44, %v1888_v23  ;;  %3204 = vst [vmem:[#allocation2 + $0x68] sm:$0x1] %v3203_v8  ;;  %v3152_v23 = vld [vmem:[#allocation2 + $0x78] sm:$0x1]  ;;  %v11838_v8 = vld [vmem:[#allocation34_spill] sm:$0xff] }
 0x226   : > { %v10373_v27 = vadd.f32 %v10183_v61, %v1897_v15 }
 0x227   : > { %v10376_v58 = vadd.f32 %v10173_v51, %v1889_v11 }
 0x229   : > { %v7950_v29 = vpop.f32.mrb[76].mxu0 }
 0x22a   : > { %v1910_v4 = vadd.f32 %v7950_v29, %v10195_v28  ;;  %v1901_v21 = vpop.f32.mrb[77].mxu0  ;;  %v3150_v28 = vsel %vm10223_vm8, 0, %v3149_v17  ;;  %v11841_v17 = vld [vmem:[#allocation27_spill] sm:$0xff] }
 0x22b   : > { %v1902_v57 = vadd.f32 %v10185_v30, %v1901_v21  ;;  %v7951_v36 = vpop.f32.mrb[78].mxu0  ;;  %3151 = vst [vmem:[#allocation2 + $0x6c] sm:$0x1] %v3150_v28 }
 0x22c   : > { %v10383_v44 = vadd.f32 %v10200_v26, %v1910_v4  ;;  %v1913_v61 = vadd.f32 %v7951_v36, %v10197_v52  ;;  %v1904_v13 = vpop.f32.mrb[79].mxu0 }
 0x22d   : > { %v10387_v51 = vadd.f32 %v10190_v9, %v1902_v57  ;;  %v1905_v35 = vadd.f32 %v10187_v43, %v1904_v13  ;;  %v3206_v43 = vsel %vm10237_vm10, 0, %v3205_v33  ;;  %v11844_v33 = vld [vmem:[#allocation24_spill] sm:$0xff] }
 0x22e   : > { %v10391_v47 = vadd.f32 %v10203_v63, %v1913_v61  ;;  %3207 = vst [vmem:[#allocation2 + $0x74] sm:$0x1] %v3206_v43 }
 0x22f   : > { %v10396_v30 = vadd.f32 %v10193_v54, %v1905_v35 }
 0x231   : > { %v7954_v26 = vpop.f32.mrb[80].mxu0 }
 0x232   : > { %v1926_v52 = vadd.f32 %v7954_v26, %v10217_v46  ;;  %v1917_v41 = vpop.f32.mrb[81].mxu0  ;;  %v11843_v26 = vld [vmem:[#allocation26_spill] sm:$0xff] }
 0x233   : > { %v1918_v9 = vadd.f32 %v10205_v59, %v1917_v41  ;;  %v7955_v20 = vpop.f32.mrb[82].mxu0 }
 0x234   : > { %v10403_v63 = vadd.f32 %v10233_v6, %v1926_v52  ;;  %v1929_v56 = vadd.f32 %v7955_v20, %v10227_v32  ;;  %v1920_v45 = vpop.f32.mrb[83].mxu0  ;;  %v11845_v20 = vld [vmem:[#allocation23_spill] sm:$0xff] }
 0x235   : > { %v10407_v54 = vadd.f32 %v10212_v37, %v1918_v9  ;;  %v1921_v46 = vadd.f32 %v10208_v38, %v1920_v45 }
 0x236   : > { %v10411_v16 = vadd.f32 %v10243_v55, %v1929_v56  ;;  %v3153_v55 = vsel %vm10223_vm8, 0, %v3152_v23  ;;  %v11846_v56 = vld [vmem:[#allocation28_spill] sm:$0xff]  ;;  %v11850_v23 = vld [vmem:[#allocation29_spill] sm:$0xff] }
 0x237   : > { %v10414_v59 = vadd.f32 %v10215_v22, %v1921_v46  ;;  %3154 = vst [vmem:[#allocation2 + $0x78] sm:$0x1] %v3153_v55  ;;  %v11848_v46 = vld [vmem:[#allocation25_spill] sm:$0xff] }
 0x239   : > { %v7958_v25 = vpop.f32.mrb[84].mxu0 }
 0x23a   : > { %v1942_v18 = vadd.f32 %v7958_v25, %v10266_v40  ;;  %v1933_v6 = vpop.f32.mrb[85].mxu0  ;;  %v11839_v40 = vld [vmem:[#allocation22_spill] sm:$0xff] }
 0x23b   : > { %v1934_v15 = vadd.f32 %v10247_v7, %v1933_v6  ;;  %v7959_v32 = vpop.f32.mrb[86].mxu0  ;;  %v11840_v7 = vld [vmem:[#allocation21_spill] sm:$0xff] }
 0x23c   : > { %v10419_v11 = vadd.f32 %v10271_v24, %v1942_v18  ;;  %v1945_v37 = vadd.f32 %v7959_v32, %v10268_v14  ;;  %v1936_v38 = vpop.f32.mrb[87].mxu0  ;;  %v3208_v24 = vld [vmem:[#allocation2 + $0x80] sm:$0x1]  ;;  %v3211_v32 = vld [vmem:[#allocation2 + $0x8c] sm:$0x1] }
 0x23d   : > { %v10425_v22 = vadd.f32 %v11837_v48, %v1934_v15  ;;  %v1937_v29 = vadd.f32 %v11838_v8, %v1936_v38  ;;  %v3209_v14 = vsel %vm10237_vm10, 0, %v3208_v24  ;;  %v3212_v55 = vsel %vm10237_vm10, 0, %v3211_v32  ;;  %v11852_v8 = vld [vmem:[#allocation33_spill] sm:$0xff] }
 0x23e   : > { %v10429_v4 = vadd.f32 %v11839_v40, %v1945_v37  ;;  %3210 = vst [vmem:[#allocation2 + $0x80] sm:$0x1] %v3209_v14  ;;  %3213 = vst [vmem:[#allocation2 + $0x8c] sm:$0x1] %v3212_v55 }
 0x23f   : > { %v10432_v21 = vadd.f32 %v11840_v7, %v1937_v29  ;;  %v11853_v7 = vld [vmem:[#allocation31_spill] sm:$0xff] }
 0x241   : > { %v7962_v57 = vpop.f32.mrb[88].mxu0 }
 0x242   : > { %v1958_v36 = vadd.f32 %v7962_v57, %v10292_v34  ;;  %v1949_v61 = vpop.f32.mrb[89].mxu0  ;;  %v3155_v34 = vld [vmem:[#allocation2 + $0x84] sm:$0x1] }
 0x243   : > { %v1950_v13 = vadd.f32 %v10280_v49, %v1949_v61  ;;  %v7963_v35 = vpop.f32.mrb[90].mxu0  ;;  %v3156_v49 = vsel %vm10223_vm8, 0, %v3155_v34  ;;  %v11855_v57 = vld [vmem:[#allocation30_spill] sm:$0xff] }
 0x244   : > { %v10439_v28 = vadd.f32 %v11841_v17, %v1958_v36  ;;  %v1961_v52 = vadd.f32 %v7963_v35, %v11843_v26  ;;  %v1952_v41 = vpop.f32.mrb[91].mxu0  ;;  %3157 = vst [vmem:[#allocation2 + $0x84] sm:$0x1] %v3156_v49  ;;  %v11857_v36 = vld [vmem:[#allocation32_spill] sm:$0xff]  ;;  %v3158_v26 = vld [vmem:[#allocation2 + $0x90] sm:$0x1] }
 0x245   : > { %v10443_v9 = vadd.f32 %v11844_v33, %v1950_v13  ;;  %v1953_v43 = vadd.f32 %v11845_v20, %v1952_v41  ;;  %v3159_v33 = vsel %vm10223_vm8, 0, %v3158_v26 }
 0x246   : > { %11842 = vst [vmem:[#allocation37_spill] sm:$0xff] %v10439_v28  ;;  %v10447_v45 = vadd.f32 %v11846_v56, %v1961_v52  ;;  %3160 = vst [vmem:[#allocation2 + $0x90] sm:$0x1] %v3159_v33 }
 0x247   : > { %v10450_v25 = vadd.f32 %v11848_v46, %v1953_v43 }
 0x248   : > { %11847 = vst [vmem:[#allocation20_spill] sm:$0xff] %v10447_v45 }
 0x249   : > { %11849 = vst [vmem:[#allocation34_spill] sm:$0xff] %v10450_v25  ;;  %v7966_v18 = vpop.f32.mrb[92].mxu0 }
 0x24a   : > { %v1974_v6 = vadd.f32 %v7966_v18, %v10314_v53  ;;  %v1965_v15 = vpop.f32.mrb[93].mxu0 }
 0x24b   : > { %v1966_v37 = vadd.f32 %v11850_v23, %v1965_v15  ;;  %v7967_v38 = vpop.f32.mrb[94].mxu0  ;;  %v3214_v23 = vld [vmem:[#allocation2 + $0x98] sm:$0x1] }
 0x24c   : > { %v10459_v48 = vadd.f32 %v10318_v62, %v1974_v6  ;;  %v1977_v29 = vadd.f32 %v7967_v38, %v11852_v8  ;;  %v1968_v40 = vpop.f32.mrb[95].mxu0  ;;  %v3215_v38 = vsel %vm10237_vm10, 0, %v3214_v23 }
 0x24d   : > { %v10463_v24 = vadd.f32 %v11853_v7, %v1966_v37  ;;  %v1969_v53 = vadd.f32 %v11855_v57, %v1968_v40  ;;  %3216 = vst [vmem:[#allocation2 + $0x98] sm:$0x1] %v3215_v38  ;;  %v3657_v38 = vld [vmem:[#allocation2 + $0x14] sm:$0x1] }
 0x24e   : > { %11851 = vst [vmem:[#allocation22_spill] sm:$0xff] %v10459_v48  ;;  %v10467_v14 = vadd.f32 %v10322_v1, %v1977_v29  ;;  %v10475_v1 = vld [vmem:[#allocation10] ss:$0 sm:$0xff] }
 0x24f   : > { %11854 = vst [vmem:[#allocation21_spill] sm:$0xff] %v10463_v24  ;;  %v10470_v61 = vadd.f32 %v11857_v36, %v1969_v53 }
 0x250   : > { %11856 = vst [vmem:[#allocation27_spill] sm:$0xff] %v10467_v14 }
 0x251   : > { %11858 = vst [vmem:[#allocation26_spill] sm:$0xff] %v10470_v61  ;;  %v7392_v13 = vpop.f32.mrb[96].mxu0 }
 0x252   : > { %v7393_v35 = vpop.f32.mrb[97].mxu0 }
 0x253   : > { %v7394_v17 = vadd.f32 %v7393_v35, %v7392_v13  ;;  %v7395_v62 = vpop.f32.mrb[98].mxu0  ;;  %v8034_v52 = vpop.f32.mrb[64].mxu1 }
 0x254   : > { %v7396_v41 = vpop.f32.mrb[99].mxu0  ;;  %v2882_v20 = vpop.f32.mrb[65].mxu1 }
 0x255   : > { %v8214_v43 = vadd.f32 %v7394_v17, %v10331_v10  ;;  %v7397_v56 = vadd.f32 %v7396_v41, %v7395_v62  ;;  %v8035_v34 = vpop.f32.mrb[66].mxu1  ;;  %v3161_v17 = vld [vmem:[#allocation2 + $0x9c] sm:$0x1] }
 0x256   : > { %v2885_v49 = vpop.f32.mrb[67].mxu1 }
 0x257   : > { %v8215_v46 = vadd.f32 %v8214_v43, %v2882_v20  ;;  %v8222_v18 = vadd.f32 %v7397_v56, %v10340_v42  ;;  %v3162_v43 = vsel %vm10223_vm8, 0, %v3161_v17 }
 0x258   : > { %3163 = vst [vmem:[#allocation2 + $0x9c] sm:$0x1] %v3162_v43 }
 0x259   : > { %v3048_v6 = vadd.f32 %v8215_v46, %v10475_v1  ;;  %v8223_v15 = vadd.f32 %v8222_v18, %v2885_v49  ;;  %v7398_v32 = vpop.f32.mrb[100].mxu0 }
 0x25a   : > { %v7399_v37 = vpop.f32.mrb[101].mxu0 }
 0x25b   : > { %v3080_v55 = vmax.f32 %v3048_v6, 0.0  ;;  %v3049_v10 = vadd.f32 %v8223_v15, %v10475_v1  ;;  %v7400_v8 = vadd.f32 %v7399_v37, %v7398_v32  ;;  %v7401_v29 = vpop.f32.mrb[102].mxu0  ;;  %v10482_v40 = vpop.f32.mrb[68].mxu1 }
 0x25c   : > { %v7402_v7 = vpop.f32.mrb[103].mxu0  ;;  %v2898_v36 = vpop.f32.mrb[69].mxu1 }
 0x25d   : > { %v7071_v57 = vpack.c.bf16 %v3080_v55, %v3080_v55  ;;  %v3081_v42 = vmax.f32 %v3049_v10, 0.0  ;;  %v8210_v53 = vadd.f32 %v7400_v8, %v10327_v3  ;;  %v7403_v13 = vadd.f32 %v7402_v7, %v7401_v29  ;;  %v10485_v35 = vpop.f32.mrb[70].mxu1 }
 0x25e   : > { %v2901_v33 = vpop.f32.mrb[71].mxu1 }
 0x25f   : > { %v3331_v62 = vshrl.u32 %v7071_v57, 16  ;;  %v7072_v26 = vpack.c.bf16 %v3081_v42, %v3081_v42  ;;  %v8211_v41 = vadd.f32 %v8210_v53, %v8034_v52  ;;  %v8218_v20 = vadd.f32 %v7403_v13, %v10335_v60  ;;  %v3653_v52 = vld [vmem:[#allocation2 + $0xc] sm:$0xf]  ;;  %v3217_v53 = vld [vmem:[#allocation2 + $0xa4] sm:$0x1] }
 0x260   : > { %v3334_v46 = vshll.u32 %v7071_v57, 16 }
 0x261   : > { %v3333_v56 = vrot.slane %v3331_v62, 7  ;;  %v3339_v49 = vshrl.u32 %v7072_v26, 16  ;;  %v3050_v3 = vadd.f32 %v8211_v41, %v10475_v1  ;;  %v7404_v18 = vpop.f32.mrb[104].mxu0  ;;  %v8219_v15 = vadd.f32 %v8218_v20, %v8035_v34 }
 0x262   : > { %v7405_v32 = vpop.f32.mrb[105].mxu0  ;;  %v3342_v37 = vshll.u32 %v7072_v26, 16 }
 0x263   : > { %v3336_v23 = vor.u32 %v3334_v46, %v3333_v56  ;;  %v3341_v60 = vrot.slane %v3339_v49, 7  ;;  %v3082_v55 = vmax.f32 %v3050_v3, 0.0  ;;  %v7407_v10 = vpop.f32.mrb[106].mxu0  ;;  %v3337_v8 = vrot.slane %v3333_v56, 4  ;;  %v10503_v42 = vpop.f32.mrb[72].mxu1 }
 0x264   : > { %v3051_v7 = vadd.f32 %v8219_v15, %v10475_v1  ;;  %v7406_v57 = vadd.f32 %v7405_v32, %v7404_v18  ;;  %v7408_v34 = vpop.f32.mrb[107].mxu0  ;;  %v10507_v41 = vpop.f32.mrb[73].mxu1  ;;  %v3218_v49 = vsel %vm10237_vm10, 0, %v3217_v53 }
 0x265   : > { %v3654_v13 = vsel %vm10492_vm13, %v3336_v23, %v3653_v52  ;;  %v3344_v17 = vor.u32 %v3342_v37, %v3341_v60  ;;  %v3346_v62 = vrot.slane %v3341_v60, 4  ;;  %v7073_v26 = vpack.c.bf16 %v3082_v55, %v3082_v55  ;;  %v10510_v46 = vpop.f32.mrb[74].mxu1  ;;  %3219 = vst [vmem:[#allocation2 + $0xa4] sm:$0x1] %v3218_v49 }
 0x266   : > { %3655 = vst [vmem:[#allocation2 + $0xc] sm:$0xf] %v3654_v13  ;;  %v3083_v20 = vmax.f32 %v3051_v7, 0.0  ;;  %v8230_v43 = vadd.f32 %v7406_v57, %v10351_v50  ;;  %v7409_v56 = vadd.f32 %v7408_v34, %v7407_v10  ;;  %v10518_v15 = vpop.f32.mrb[75].mxu1  ;;  %v3660_v10 = vld [vmem:[#allocation2 + $0x18] sm:$0xf] }
 0x267   : > { %v3345_v3 = vsel %vm10498_vm14, %v3337_v8, %v3344_v17  ;;  %v3658_v18 = vsel %vm10223_vm8, %v3346_v62, %v3657_v38  ;;  %v3348_v52 = vshrl.u32 %v7073_v26, 16  ;;  %v3351_v37 = vshll.u32 %v7073_v26, 16  ;;  %v3664_v13 = vld [vmem:[#allocation2 + $0x20] sm:$0x1] }
 0x268   : > { %3656 = vst [vmem:[#allocation2 + $0x10] sm:$0xf] %v3345_v3  ;;  %3659 = vst [vmem:[#allocation2 + $0x14] sm:$0x1] %v3658_v18  ;;  %v7074_v32 = vpack.c.bf16 %v3083_v20, %v3083_v20  ;;  %v8231_v50 = vadd.f32 %v8230_v43, %v2898_v36  ;;  %v8238_v23 = vadd.f32 %v7409_v56, %v10358_v31 }
 0x269   : > { %v3350_v60 = vrot.slane %v3348_v52, 7  ;;  %v7410_v55 = vpop.f32.mrb[108].mxu0 }
 0x26a   : > { %v3356_v7 = vshrl.u32 %v7074_v32, 16  ;;  %v3052_v8 = vadd.f32 %v8231_v50, %v10475_v1  ;;  %v8239_v57 = vadd.f32 %v8238_v23, %v2901_v33  ;;  %v7411_v34 = vpop.f32.mrb[109].mxu0  ;;  %v3359_v53 = vshll.u32 %v7074_v32, 16  ;;  %v10532_v50 = vld [vmem:[#allocation11 + $0x80] sm:$0xff]  }
 0x26b   : > { %v3353_v38 = vor.u32 %v3351_v37, %v3350_v60  ;;  %v7412_v17 = vadd.f32 %v7411_v34, %v7410_v55  ;;  %v7413_v62 = vpop.f32.mrb[110].mxu0  ;;  %v3354_v49 = vrot.slane %v3350_v60, 4  ;;  %v10523_v31 = vpop.f32.mrb[76].mxu1  ;;  %8112 = vmatprep.subr.bf16.mxu1 %v10532_v50 }
 0x26c   : > { %v3358_v3 = vrot.slane %v3356_v7, 7  ;;  %v3084_v20 = vmax.f32 %v3052_v8, 0.0  ;;  %v3053_v36 = vadd.f32 %v8239_v57, %v10475_v1  ;;  %v7414_v26 = vpop.f32.mrb[111].mxu0  ;;  %v10528_v33 = vpop.f32.mrb[77].mxu1 }
 0x26d   : > { %v3661_v43 = vsel %vm10492_vm13, %v3353_v38, %v3660_v10  ;;  %v8226_v56 = vadd.f32 %v7412_v17, %v10347_v19  ;;  %v7415_v18 = vadd.f32 %v7414_v26, %v7413_v62  ;;  %v4506_v52 = vld [vmem:[#allocation2 + $0xc] sm:$0xe]  ;;  %v10534_v7 = vpop.f32.mrb[78].mxu1 }
 0x26e   : > { %v10530_v32 = vld [vmem:[#allocation2 + $0xc] sm:$0xf]  ;;  %3662 = vst [vmem:[#allocation2 + $0x18] sm:$0xf] %v3661_v43  ;;  %v3361_v23 = vor.u32 %v3359_v53, %v3358_v3  ;;  %v3363_v60 = vrot.slane %v3358_v3, 4  ;;  %v7075_v37 = vpack.c.bf16 %v3084_v20, %v3084_v20  ;;  %v3085_v55 = vmax.f32 %v3053_v36, 0.0 }
 0x26f   : > { %v8227_v8 = vadd.f32 %v8226_v56, %v10482_v40  ;;  %v8234_v10 = vadd.f32 %v7415_v18, %v10355_v12  ;;  %v10538_v19 = vpop.f32.mrb[79].mxu1  ;;  %v4507_v57 = vld [vmem:[#allocation2 + $0x10] sm:$0xf]  ;;  %v4508_v34 = vld [vmem:[#allocation2 + $0x14] sm:$0x1]  ;;  %v6958_v38 = vrot.slane %v4506_v52, 9 }
 0x270   : > { %v3362_v17 = vsel %vm10498_vm14, %v3354_v49, %v3361_v23  ;;  %v3665_v53 = vsel %vm10223_vm8, %v3363_v60, %v3664_v13  ;;  %v3365_v62 = vshrl.u32 %v7075_v37, 16  ;;  %v3368_v3 = vshll.u32 %v7075_v37, 16  ;;  %v3667_v23 = vld [vmem:[#allocation2 + $0x24] sm:$0xf] }
 0x271   : > { %3663 = vst [vmem:[#allocation2 + $0x1c] sm:$0xf] %v3362_v17  ;;  %3666 = vst [vmem:[#allocation2 + $0x20] sm:$0x1] %v3665_v53  ;;  %v7076_v40 = vpack.c.bf16 %v3085_v55, %v3085_v55  ;;  %v3054_v12 = vadd.f32 %v8227_v8, %v10475_v1  ;;  %v8235_v20 = vadd.f32 %v8234_v10, %v10485_v35  ;;  %v7416_v36 = vpop.f32.mrb[112].mxu0  ;;  %v4620_v26 = vrot.slane %v4507_v57, 5 }
 0x272   : > { %v3367_v43 = vrot.slane %v3365_v62, 7  ;;  %v7417_v56 = vpop.f32.mrb[113].mxu0  ;;  %v4623_v18 = vrot.slane %v4508_v34, 5  ;;  %v4006_v52 = vshrl.u32 %v10530_v32, 16  ;;  %v4009_v49 = vshll.u32 %v10530_v32, 16 }
 0x273   : > { %v3373_v13 = vshrl.u32 %v7076_v40, 16  ;;  %v3376_v60 = vshll.u32 %v7076_v40, 16  ;;  %v3086_v37 = vmax.f32 %v3054_v12, 0.0  ;;  %v3055_v17 = vadd.f32 %v8235_v20, %v10475_v1  ;;  %v7419_v55 = vpop.f32.mrb[114].mxu0  ;;  %v10550_v35 = vpop.f32.mrb[80].mxu1 }
 0x274   : > { %v3370_v53 = vor.u32 %v3368_v3, %v3367_v43  ;;  %v3371_v8 = vrot.slane %v3367_v43, 4  ;;  %v7418_v14 = vadd.f32 %v7417_v56, %v7416_v36  ;;  %v7420_v10 = vpop.f32.mrb[115].mxu0  ;;  %v4621_v34 = vsel %vm9791_vm5, %v6958_v38, %v4620_v26  ;;  %v10554_v32 = vpop.f32.mrb[81].mxu1  ;;  %v3671_v12 = vld [vmem:[#allocation2 + $0x2c] sm:$0x1] }
 0x275   : > { %v3375_v62 = vrot.slane %v3373_v13, 7  ;;  %v7077_v48 = vpack.c.bf16 %v3086_v37, %v3086_v37  ;;  %v3087_v61 = vmax.f32 %v3055_v17, 0.0  ;;  %v7421_v24 = vadd.f32 %v7420_v10, %v7419_v55  ;;  %v10559_v20 = vpop.f32.mrb[82].mxu1 }
 0x276   : > { %v3668_v40 = vsel %vm10492_vm13, %v3370_v53, %v3667_v23  ;;  %v8246_v3 = vadd.f32 %v7418_v14, %v10369_v5  ;;  %v4622_v36 = vrot.slane %v4620_v26, 4  ;;  %v4008_v43 = vrot.slane %v4006_v52, 4  ;;  %v10561_v37 = vpop.f32.mrb[83].mxu1 }
 0x277   : > { %3669 = vst [vmem:[#allocation2 + $0x24] sm:$0xf] %v3668_v40  ;;  %v3378_v56 = vor.u32 %v3376_v60, %v3375_v62  ;;  %v3380_v45 = vrot.slane %v3375_v62, 4  ;;  %v3382_v38 = vshrl.u32 %v7077_v48, 16  ;;  %v3385_v13 = vshll.u32 %v7077_v48, 16 }
 0x278   : > { %v7078_v17 = vpack.c.bf16 %v3087_v61, %v3087_v61  ;;  %v8247_v55 = vadd.f32 %v8246_v3, %v10507_v41  ;;  %v8254_v10 = vadd.f32 %v7421_v24, %v10376_v58  ;;  %v4624_v23 = vsel %vm9791_vm5, %v4622_v36, %v4623_v18  ;;  %v3931_v60 = vld [vmem:[#allocation2 + $0x10] sm:$0xf] }
 0x279   : > { %v3379_v5 = vsel %vm10498_vm14, %v3371_v8, %v3378_v56  ;;  %v3672_v14 = vsel %vm10223_vm8, %v3380_v45, %v3671_v12  ;;  %v3384_v26 = vrot.slane %v3382_v38, 7  ;;  %v10571_v52 = vcombine.low %v4621_v34, %v4624_v23  ;;  %v7422_v48 = vpop.f32.mrb[116].mxu0  ;;  %v3674_v61 = vld [vmem:[#allocation2 + $0x30] sm:$0xf] }
 0x27a   : > { %3670 = vst [vmem:[#allocation2 + $0x28] sm:$0xf] %v3379_v5  ;;  %3673 = vst [vmem:[#allocation2 + $0x2c] sm:$0x1] %v3672_v14  ;;  %v3390_v41 = vshrl.u32 %v7078_v17, 16  ;;  %v3393_v53 = vshll.u32 %v7078_v17, 16  ;;  %v3056_v58 = vadd.f32 %v8247_v55, %v10475_v1  ;;  %v8255_v24 = vadd.f32 %v8254_v10, %v10518_v15 }
 0x27b   : > { %11864 = vst [vmem:[#allocation24_spill] sm:$0xff] %v10571_v52  ;;  %v7423_v18 = vpop.f32.mrb[117].mxu0  ;;  %v3387_v62 = vor.u32 %v3385_v13, %v3384_v26  ;;  %v3388_v8 = vrot.slane %v3384_v26, 4  ;;  %8080 = vmatprep.mubr.bf16.mxu1 %v10571_v52  ;;  %v4011_v34 = vrot.slane %v4009_v49, 5  ;;  %v10577_v56 = vpop.f32.mrb[84].mxu1  ;;  %v4015_v38 = vshll.u32 %v3931_v60, 16 }
 0x27c   : > { %v7424_v45 = vadd.f32 %v7423_v18, %v7422_v48  ;;  %v7425_v40 = vpop.f32.mrb[118].mxu0  ;;  %v3392_v12 = vrot.slane %v3390_v41, 7  ;;  %v3088_v3 = vmax.f32 %v3056_v58, 0.0  ;;  %v3057_v36 = vadd.f32 %v8255_v24, %v10475_v1  ;;  %v3678_v15 = vld [vmem:[#allocation2 + $0x38] sm:$0x1]  ;;  %v10582_v10 = vpop.f32.mrb[85].mxu1 }
 0x27d   : > { %v7426_v17 = vpop.f32.mrb[119].mxu0  ;;  %v3675_v55 = vsel %vm10492_vm13, %v3387_v62, %v3674_v61  ;;  %v4012_v23 = vor.u32 %v4011_v34, %v4008_v43  ;;  %v4019_v5 = vshrl.u32 %v3931_v60, 16  ;;  %v3932_v41 = vld [vmem:[#allocation2 + $0x14] sm:$0x1]  ;;  %v10584_v58 = vpop.f32.mrb[86].mxu1  ;;  %v4017_v52 = vrot.slane %v4015_v38, 5 }
 0x27e   : > { %v8242_v13 = vadd.f32 %v7424_v45, %v10365_v39  ;;  %3676 = vst [vmem:[#allocation2 + $0x30] sm:$0xf] %v3675_v55  ;;  %v3395_v49 = vor.u32 %v3393_v53, %v3392_v12  ;;  %v3397_v14 = vrot.slane %v3392_v12, 4  ;;  %v7079_v26 = vpack.c.bf16 %v3088_v3, %v3088_v3  ;;  %v10587_v62 = vpop.f32.mrb[87].mxu1  ;;  %v4509_v39 = vld [vmem:[#allocation2 + $0x18] sm:$0xe] }
 0x27f   : > { %v3089_v48 = vmax.f32 %v3057_v36, 0.0  ;;  %v4013_v18 = vrot.slane %v4012_v23, 4  ;;  %v4021_v61 = vrot.slane %v4019_v5, 4  ;;  %v3681_v34 = vld [vmem:[#allocation2 + $0x3c] sm:$0xf]  ;;  %v4025_v5 = vshll.u32 %v3932_v41, 16 }
 0x280   : > { %v8243_v24 = vadd.f32 %v8242_v13, %v10503_v42  ;;  %v3396_v43 = vsel %vm10498_vm14, %v3388_v8, %v3395_v49  ;;  %v3679_v60 = vsel %vm10223_vm8, %v3397_v14, %v3678_v15  ;;  %v3399_v53 = vshrl.u32 %v7079_v26, 16  ;;  %v4510_v55 = vld [vmem:[#allocation2 + $0x1c] sm:$0xf]  ;;  %v4511_v49 = vld [vmem:[#allocation2 + $0x20] sm:$0x1] }
 0x281   : > { %v3402_v45 = vshll.u32 %v7079_v26, 16  ;;  %3677 = vst [vmem:[#allocation2 + $0x34] sm:$0xf] %v3396_v43  ;;  %3680 = vst [vmem:[#allocation2 + $0x38] sm:$0x1] %v3679_v60  ;;  %v7080_v12 = vpack.c.bf16 %v3089_v48, %v3089_v48  ;;  %v4018_v36 = vsel %vm9333_vm2, %v4013_v18, %v4017_v52  ;;  %v4022_v38 = vor.u32 %v4021_v61, %v4017_v52  ;;  %v7428_v13 = vpop.f32.mrb[120].mxu0 }
 0x282   : > { %v3058_v42 = vadd.f32 %v8243_v24, %v10475_v1  ;;  %v3401_v23 = vrot.slane %v3399_v53, 7  ;;  %v7427_v8 = vadd.f32 %v7426_v17, %v7425_v40  ;;  %v6959_v2 = vrot.slane %v4509_v39, 9  ;;  %v7429_v15 = vpop.f32.mrb[121].mxu0 }
 0x283   : > { %v3407_v14 = vshrl.u32 %v7080_v12, 16  ;;  %v3410_v26 = vshll.u32 %v7080_v12, 16  ;;  %v4023_v60 = vrot.slane %v4022_v38, 4  ;;  %v10596_v28 = vpop.f32.mrb[122].mxu0  ;;  %v4027_v25 = vrot.slane %v4025_v5, 5  ;;  %v10599_v52 = vpop.f32.mrb[88].mxu1 }
 0x284   : > { %v3090_v43 = vmax.f32 %v3058_v42, 0.0  ;;  %v3404_v48 = vor.u32 %v3402_v45, %v3401_v23  ;;  %v3405_v24 = vrot.slane %v3401_v23, 4  ;;  %v8250_v18 = vadd.f32 %v7427_v8, %v10373_v27  ;;  %11866 = vst [vmem:[#allocation23_spill] sm:$0xff] %v10599_v52  ;;  %v10601_v61 = vpop.f32.mrb[123].mxu0  ;;  %v10603_v53 = vpop.f32.mrb[89].mxu1 }
 0x285   : > { %v3409_v41 = vrot.slane %v3407_v14, 7  ;;  %v4627_v17 = vrot.slane %v4510_v55, 5  ;;  %v4630_v39 = vrot.slane %v4511_v49, 5  ;;  %11867 = vst [vmem:[#allocation28_spill] sm:$0xff] %v10603_v53  ;;  %v3685_v42 = vld [vmem:[#allocation2 + $0x44] sm:$0x1]  ;;  %v4028_v45 = vsel %vm9333_vm2, %v4023_v60, %v4027_v25 }
 0x286   : > { %v7081_v40 = vpack.c.bf16 %v3090_v43, %v3090_v43  ;;  %v3682_v12 = vsel %vm10492_vm13, %v3404_v48, %v3681_v34  ;;  %v8251_v38 = vadd.f32 %v8250_v18, %v10510_v46  ;;  %v7430_v27 = vadd.f32 %v7429_v15, %v7428_v13  ;;  %v3933_v23 = vld [vmem:[#allocation2 + $0x18] sm:$0xf]  ;;  %v10610_v5 = vpop.f32.mrb[90].mxu1  ;;  %v3688_v52 = vld [vmem:[#allocation2 + $0x48] sm:$0xf]  ;;  %v8737_v48 = vld [vmem:[#allocation2 + $0xc] sm:$0xff]  }
 0x287   : > { %3683 = vst [vmem:[#allocation2 + $0x3c] sm:$0xf] %v3682_v12  ;;  %v3412_v8 = vor.u32 %v3410_v26, %v3409_v41  ;;  %v3414_v14 = vrot.slane %v3409_v41, 4  ;;  %v10612_v43 = vpop.f32.mrb[91].mxu1  ;;  %v10614_v53 = vcombine.low %v4018_v36, %v4028_v45  ;;  %v4628_v25 = vsel %vm9791_vm5, %v6959_v2, %v4627_v17  ;;  %v3934_v18 = vld [vmem:[#allocation2 + $0x1c] sm:$0xf] }
 0x288   : > { %v3416_v55 = vshrl.u32 %v7081_v40, 16  ;;  %v3419_v49 = vshll.u32 %v7081_v40, 16  ;;  %v3059_v34 = vadd.f32 %v8251_v38, %v10475_v1  ;;  %v4629_v46 = vrot.slane %v4627_v17, 4  ;;  %v3935_v36 = vld [vmem:[#allocation2 + $0x20] sm:$0x1] }
 0x289   : > { %11868 = vst [vmem:[#allocation25_spill] sm:$0xff] %v10614_v53  ;;  %v3413_v13 = vsel %vm10498_vm14, %v3405_v24, %v3412_v8  ;;  %v3686_v15 = vsel %vm10223_vm8, %v3414_v14, %v3685_v42  ;;  %v8262_v60 = vadd.f32 %v7430_v27, %v10387_v51  ;;  %v10626_v41 = vpop.f32.mrb[124].mxu0  ;;  %5151 = vmatprep.mubr.bf16.mxu0 %v10614_v53  ;;  %v4030_v24 = vshrl.u32 %v3933_v23, 16  ;;  %v4512_v27 = vld [vmem:[#allocation2 + $0x24] sm:$0xe]  ;;  %v8747_v14 = vld [vmem:[#allocation11 + $0x88] sm:$0xff]  }
 0x28a   : > { %v10623_v26 = vrot.slane %v3416_v55, 7  ;;  %3684 = vst [vmem:[#allocation2 + $0x40] sm:$0xf] %v3413_v13  ;;  %3687 = vst [vmem:[#allocation2 + $0x44] sm:$0x1] %v3686_v15  ;;  %v3091_v2 = vmax.f32 %v3059_v34, 0.0  ;;  %v4631_v40 = vsel %vm9791_vm5, %v4629_v46, %v4630_v39  ;;  %5152 = vmatmul.mubr.bf16.vlgmr.msra.gmra.mrb[160].mxu0 %v8737_v48 }
 0x28b   : > { %v4033_v17 = vshll.u32 %v3933_v23, 16  ;;  %v10631_v12 = vpop.f32.mrb[125].mxu0  ;;  %v10635_v45 = vcombine.low %v4628_v25, %v4631_v40  ;;  %v8263_v38 = vadd.f32 %v8262_v60, %v10528_v33  ;;  %v4032_v34 = vrot.slane %v4030_v24, 4  ;;  %v10640_v23 = vpop.f32.mrb[92].mxu1  ;;  %v4513_v15 = vld [vmem:[#allocation2 + $0x28] sm:$0xf] }
 0x28c   : > { %v3421_v42 = vor.u32 %v3419_v49, %v10623_v26  ;;  %v3422_v51 = vrot.slane %v10623_v26, 4  ;;  %v10638_v8 = vpop.f32.mrb[126].mxu0  ;;  %v7082_v55 = vpack.c.bf16 %v3091_v2, %v3091_v2  ;;  %v4039_v46 = vshll.u32 %v3934_v18, 16  ;;  %11870 = vst [vmem:[#allocation33_spill] sm:$0xff] %v10640_v23  ;;  %v10648_v26 = vpop.f32.mrb[93].mxu1 }
 0x28d   : > { %11869 = vst [vmem:[#allocation29_spill] sm:$0xff] %v10635_v45  ;;  %v4035_v39 = vrot.slane %v4033_v17, 5  ;;  %v10642_v13 = vpop.f32.mrb[127].mxu0  ;;  %8081 = vmatmul.mubr.bf16.vlgmr.msra.gmra.mrb[96].mxu1 %v10635_v45  ;;  %v3060_v48 = vadd.f32 %v8263_v38, %v10475_v1  ;;  %v4043_v33 = vshrl.u32 %v3934_v18, 16  ;;  %v4049_v25 = vshll.u32 %v3935_v36, 16  ;;  %11871 = vst [vmem:[#allocation31_spill] sm:$0xff] %v10648_v26 }
 0x28e   : > { %v3689_v49 = vsel %vm10492_vm13, %v3421_v42, %v3688_v52  ;;  %v3424_v60 = vshrl.u32 %v7082_v55, 16  ;;  %v3427_v2 = vshll.u32 %v7082_v55, 16  ;;  %v4041_v24 = vrot.slane %v4039_v46, 5  ;;  %v4514_v17 = vld [vmem:[#allocation2 + $0x2c] sm:$0x1]  ;;  %v10650_v53 = vpop.f32.mrb[94].mxu1  ;;  %8113 = vmatpush3.bf16.msra.mxu1 %v10532_v50 }
 0x28f   : > { %3690 = vst [vmem:[#allocation2 + $0x48] sm:$0xf] %v3689_v49  ;;  %v4036_v40 = vor.u32 %v4035_v39, %v4032_v34  ;;  %11872 = vst [vmem:[#allocation30_spill] sm:$0xff] %v10650_v53  ;;  %v3092_v52 = vmax.f32 %v3060_v48, 0.0  ;;  %v4045_v42 = vrot.slane %v4043_v33, 4  ;;  %v4051_v45 = vrot.slane %v4049_v25, 5  ;;  %8114 = vmatprep.subr.bf16.mxu1 %v8747_v14 }
 0x290   : > { %v7433_v18 = vadd.f32 %v10601_v61, %v10596_v28  ;;  %v10655_v36 = vpop.f32.mrb[95].mxu1  ;;  %v8749_v38 = vld [vmem:[#allocation11 + $0x90] sm:$0xff]   ;;  %v3426_v49 = vrot.slane %v3424_v60, 7  ;;  %v6960_v55 = vrot.slane %v4512_v27, 9  ;;  %v4634_v34 = vrot.slane %v4513_v15, 5 }
 0x291   : > { %v4037_v23 = vrot.slane %v4036_v40, 4  ;;  %v3692_v39 = vld [vmem:[#allocation2 + $0x50] sm:$0x1]  ;;  %v7083_v46 = vpack.c.bf16 %v3092_v52, %v3092_v52  ;;  %v4046_v26 = vor.u32 %v4045_v42, %v4041_v24  ;;  %v4637_v50 = vrot.slane %v4514_v17, 5  ;;  %v10658_v48 = vpop.f32.mrb[128].mxu0 }
 0x292   : > { %v8270_v53 = vadd.f32 %v7433_v18, %v10396_v30  ;;  %v3429_v33 = vor.u32 %v3427_v2, %v3426_v49  ;;  %v3431_v25 = vrot.slane %v3426_v49, 4  ;;  %v4635_v61 = vsel %vm9791_vm5, %v6960_v55, %v4634_v34  ;;  %v3936_v60 = vld [vmem:[#allocation2 + $0x24] sm:$0xf]  ;;  %v10664_v40 = vpop.f32.mrb[129].mxu0  ;;  %8115 = vmatpush3.bf16.msra.mxu1 %v8747_v14  ;;  %v3937_v49 = vld [vmem:[#allocation2 + $0x28] sm:$0xf] }
 0x293   : > { %v4042_v28 = vsel %vm9333_vm2, %v4037_v23, %v4041_v24  ;;  %v3433_v27 = vshrl.u32 %v7083_v46, 16  ;;  %v3436_v15 = vshll.u32 %v7083_v46, 16  ;;  %v4047_v52 = vrot.slane %v4046_v26, 4  ;;  %v10667_v17 = vpop.f32.mrb[130].mxu0  ;;  %8116 = vmatprep.subr.bf16.mxu1 %v8749_v38  ;;  %v8751_v14 = vld [vmem:[#allocation11 + $0x98] sm:$0xff]  }
 0x294   : > { %v8271_v30 = vadd.f32 %v8270_v53, %v10538_v19  ;;  %v3430_v2 = vsel %vm10498_vm14, %v3422_v51, %v3429_v33  ;;  %v3693_v23 = vsel %vm10223_vm8, %v3431_v25, %v3692_v39  ;;  %v4636_v24 = vrot.slane %v4634_v34, 4  ;;  %v10675_v18 = vpop.f32.mrb[131].mxu0  ;;  %v3695_v19 = vld [vmem:[#allocation2 + $0x54] sm:$0xf]  ;;  %v3938_v34 = vld [vmem:[#allocation2 + $0x2c] sm:$0x1] }
 0x295   : > { %v7436_v42 = vadd.f32 %v10631_v12, %v10626_v41  ;;  %3691 = vst [vmem:[#allocation2 + $0x4c] sm:$0xf] %v3430_v2  ;;  %3694 = vst [vmem:[#allocation2 + $0x50] sm:$0x1] %v3693_v23  ;;  %v10677_v26 = vrot.slane %v3433_v27, 7  ;;  %v4052_v53 = vsel %vm9333_vm2, %v4047_v52, %v4051_v45  ;;  %v4054_v55 = vshrl.u32 %v3936_v60, 16 }
 0x296   : > { %v3061_v51 = vadd.f32 %v8271_v30, %v10475_v1  ;;  %v10682_v39 = vcombine.low %v4042_v28, %v4052_v53  ;;  %v4638_v41 = vsel %vm9791_vm5, %v4636_v24, %v4637_v50  ;;  %v4057_v46 = vshll.u32 %v3936_v60, 16  ;;  %8117 = vmatpush3.bf16.msra.mxu1 %v8749_v38  ;;  %v8738_v45 = vld [vmem:[#allocation2 + $0x18] sm:$0xff]   ;;  %v8753_v30 = vld [vmem:[#allocation11 + $0xa0] sm:$0xff]  }
 0x297   : > { %v8258_v12 = vadd.f32 %v7436_v42, %v10383_v44  ;;  %v3438_v33 = vor.u32 %v3436_v15, %v10677_v26  ;;  %v10689_v52 = vcombine.low %v4635_v61, %v4638_v41  ;;  %8118 = vmatprep.subr.bf16.mxu1 %v8751_v14  ;;  %v4056_v50 = vrot.slane %v4054_v55, 4  ;;  %v4515_v61 = vld [vmem:[#allocation2 + $0x30] sm:$0xe]  ;;  %v4516_v55 = vld [vmem:[#allocation2 + $0x34] sm:$0xf] }
 0x298   : > { %11873 = vst [vmem:[#allocation32_spill] sm:$0xff] %v10682_v39  ;;  %v3093_v27 = vmax.f32 %v3061_v51, 0.0  ;;  %5159 = vmatprep.mubr.bf16.mxu0 %v10682_v39  ;;  %v4059_v2 = vrot.slane %v4057_v46, 5  ;;  %v4063_v44 = vshll.u32 %v3937_v49, 16  ;;  %v4067_v15 = vshrl.u32 %v3937_v49, 16 }
 0x299   : > { %v8259_v28 = vadd.f32 %v8258_v12, %v10523_v31  ;;  %v3696_v38 = vsel %vm10492_vm13, %v3438_v33, %v3695_v19  ;;  %5160 = vmatmul.mubr.bf16.gmra.mrb[164].mxu0 %v8738_v45  ;;  %8084 = vmatprep.mubr.bf16.mxu1 %v10689_v52  ;;  %v4073_v23 = vshll.u32 %v3938_v34, 16  ;;  %v10696_v24 = vpop.f32.mrb[132].mxu0  ;;  %v7439_v51 = vadd.f32 %v10642_v13, %v10638_v8  ;;  %v4517_v41 = vld [vmem:[#allocation2 + $0x38] sm:$0x1] }
 0x29a   : > { %v7084_v60 = vpack.c.bf16 %v3093_v27, %v3093_v27  ;;  %3697 = vst [vmem:[#allocation2 + $0x54] sm:$0xf] %v3696_v38  ;;  %v4060_v53 = vor.u32 %v4059_v2, %v4056_v50  ;;  %v4065_v31 = vrot.slane %v4063_v44, 5  ;;  %v10701_v19 = vpop.f32.mrb[133].mxu0  ;;  %8119 = vmatpush3.bf16.msra.mxu1 %v8751_v14  ;;  %v4069_v49 = vrot.slane %v4067_v15, 4  ;;  %v8755_v27 = vld [vmem:[#allocation11 + $0x40] sm:$0xff]  }
 0x29b   : > { %v3062_v42 = vadd.f32 %v8259_v28, %v10475_v1  ;;  %v4075_v34 = vrot.slane %v4073_v23, 5  ;;  %v10703_v33 = vpop.f32.mrb[134].mxu0  ;;  %8120 = vmatprep.subr.bf16.mxu1 %v8753_v30  ;;  %v8266_v50 = vadd.f32 %v7439_v51, %v10391_v47  ;;  %v6961_v2 = vrot.slane %v4515_v61, 9  ;;  %7648 = vmatprep.subr.bf16.mxu0 %v8755_v27  ;;  %v3699_v14 = vld [vmem:[#allocation2 + $0x5c] sm:$0x1] }
 0x29c   : > { %v3441_v12 = vshrl.u32 %v7084_v60, 16  ;;  %v3444_v46 = vshll.u32 %v7084_v60, 16  ;;  %v4061_v28 = vrot.slane %v4060_v53, 4  ;;  %v10706_v44 = vpop.f32.mrb[135].mxu0  ;;  %v4070_v13 = vor.u32 %v4069_v49, %v4065_v31 }
 0x29d   : > { %v3094_v45 = vmax.f32 %v3062_v42, 0.0  ;;  %v4641_v38 = vrot.slane %v4516_v55, 5  ;;  %v4644_v25 = vrot.slane %v4517_v41, 5  ;;  %v8267_v23 = vadd.f32 %v8266_v50, %v10534_v7  ;;  %v8756_v55 = vld [vmem:[#allocation11] sm:$0xff]   ;;  %v8757_v41 = vld [vmem:[#allocation11 + $0xa8] sm:$0xff]  }
 0x29e   : > { %v3443_v8 = vrot.slane %v3441_v12, 7  ;;  %v4066_v15 = vsel %vm9333_vm2, %v4061_v28, %v4065_v31  ;;  %v7442_v42 = vadd.f32 %v10664_v40, %v10658_v48  ;;  %8121 = vmatpush3.bf16.msra.mxu1 %v8753_v30  ;;  %v4071_v53 = vrot.slane %v4070_v13, 4  ;;  %v8758_v12 = vld [vmem:[#allocation11 + $0x48] sm:$0xff]   ;;  %v3702_v30 = vld [vmem:[#allocation2 + $0x60] sm:$0xf]  ;;  %v8739_v50 = vld [vmem:[#allocation2 + $0x24] sm:$0xff]   ;;  %7649 = vmatpush3.bf16.msra.mxu0 %v8756_v55 }
 0x29f   : > { %v7085_v60 = vpack.c.bf16 %v3094_v45, %v3094_v45  ;;  %v4642_v51 = vsel %vm9791_vm5, %v6961_v2, %v4641_v38  ;;  %v3063_v45 = vadd.f32 %v8267_v23, %v10475_v1  ;;  %v4643_v31 = vrot.slane %v4641_v38, 4  ;;  %v3939_v28 = vld [vmem:[#allocation2 + $0x30] sm:$0xf]  ;;  %8122 = vmatprep.subr.bf16.mxu1 %v8757_v41  ;;  %7650 = vmatprep.subr.bf16.mxu0 %v8758_v12 }
 0x2a0   : > { %v3446_v47 = vor.u32 %v3444_v46, %v3443_v8  ;;  %v3448_v61 = vrot.slane %v3443_v8, 4  ;;  %v11874_v7 = vrot.slane %v10677_v26, 4  ;;  %v4076_v46 = vsel %vm9333_vm2, %v4071_v53, %v4075_v34  ;;  %v3940_v8 = vld [vmem:[#allocation2 + $0x34] sm:$0xf] }
 0x2a1   : > { %v3450_v49 = vshrl.u32 %v7085_v60, 16  ;;  %v3453_v27 = vshll.u32 %v7085_v60, 16  ;;  %v8278_v2 = vadd.f32 %v7442_v42, %v10407_v54  ;;  %v10725_v13 = vpop.f32.mrb[136].mxu0  ;;  %v10729_v38 = vcombine.low %v4066_v15, %v4076_v46  ;;  %v8759_v34 = vld [vmem:[#allocation11 + $0x8] sm:$0xff]   ;;  %v8761_v15 = vld [vmem:[#allocation11 + $0x50] sm:$0xff]  }
 0x2a2   : > { %v3447_v48 = vsel %vm10498_vm14, %v11874_v7, %v3446_v47  ;;  %v3700_v40 = vsel %vm10223_vm8, %v3448_v61, %v3699_v14  ;;  %v3095_v60 = vmax.f32 %v3063_v45, 0.0  ;;  %v4645_v14 = vsel %vm9791_vm5, %v4643_v31, %v4644_v25  ;;  %v10733_v23 = vpop.f32.mrb[137].mxu0  ;;  %v3941_v47 = vld [vmem:[#allocation2 + $0x38] sm:$0x1]  ;;  %8123 = vmatpush3.bf16.msra.mxu1 %v8757_v41  ;;  %v4518_v31 = vld [vmem:[#allocation2 + $0x3c] sm:$0xe]  ;;  %7651 = vmatpush3.bf16.msra.mxu0 %v8759_v34 }
 0x2a3   : > { %3698 = vst [vmem:[#allocation2 + $0x58] sm:$0xf] %v3447_v48  ;;  %3701 = vst [vmem:[#allocation2 + $0x5c] sm:$0x1] %v3700_v40  ;;  %v10727_v26 = vrot.slane %v3450_v49, 7  ;;  %v10735_v54 = vcombine.low %v4642_v51, %v4645_v14  ;;  %v8279_v42 = vadd.f32 %v8278_v2, %v10554_v32  ;;  %v4078_v61 = vshrl.u32 %v3939_v28, 16  ;;  %5167 = vmatprep.mubr.bf16.mxu0 %v10729_v38 }
 0x2a4   : > { %11875 = vst [vmem:[#allocation35_spill] sm:$0xff] %v10729_v38  ;;  %v4081_v53 = vshll.u32 %v3939_v28, 16  ;;  %v10738_v55 = vpop.f32.mrb[138].mxu0  ;;  %v7086_v45 = vpack.c.bf16 %v3095_v60, %v3095_v60  ;;  %v4087_v12 = vshll.u32 %v3940_v8, 16  ;;  %v8763_v7 = vld [vmem:[#allocation11 + $0xb0] sm:$0xff]   ;;  %5168 = vmatmul.mubr.bf16.gmra.mrb[168].mxu0 %v8739_v50  ;;  %v4091_v48 = vshrl.u32 %v3940_v8, 16  ;;  %7652 = vmatprep.subr.bf16.mxu0 %v8761_v15 }
 0x2a5   : > { %11876 = vst [vmem:[#allocation19_spill] sm:$0xff] %v10735_v54  ;;  %v3455_v49 = vor.u32 %v3453_v27, %v10727_v26  ;;  %v3456_v25 = vrot.slane %v10727_v26, 4  ;;  %v10743_v51 = vpop.f32.mrb[139].mxu0  ;;  %8085 = vmatmul.mubr.bf16.gmra.mrb[100].mxu1 %v10735_v54  ;;  %v3064_v32 = vadd.f32 %v8279_v42, %v10475_v1  ;;  %v4080_v28 = vrot.slane %v4078_v61, 4  ;;  %v4519_v40 = vld [vmem:[#allocation2 + $0x40] sm:$0xf]  ;;  %8124 = vmatprep.subr.bf16.mxu1 %v8763_v7 }
 0x2a6   : > { %v4083_v41 = vrot.slane %v4081_v53, 5  ;;  %v3458_v46 = vshrl.u32 %v7086_v45, 16  ;;  %v3461_v2 = vshll.u32 %v7086_v45, 16  ;;  %v4089_v26 = vrot.slane %v4087_v12, 5  ;;  %v8762_v60 = vld [vmem:[#allocation11 + $0x10] sm:$0xff]   ;;  %v8764_v1 = vld [vmem:[#allocation11 + $0x58] sm:$0xff]   ;;  %8125 = vmatpush3.bf16.msra.mxu1 %v8763_v7 }
 0x2a7   : > { %v3703_v27 = vsel %vm10492_vm13, %v3455_v49, %v3702_v30  ;;  %v3096_v14 = vmax.f32 %v3064_v32, 0.0  ;;  %v4093_v38 = vrot.slane %v4091_v48, 4  ;;  %v4097_v39 = vshll.u32 %v3941_v47, 16  ;;  %v3706_v53 = vld [vmem:[#allocation2 + $0x68] sm:$0x1]  ;;  %7653 = vmatpush3.bf16.msra.mxu0 %v8762_v60  ;;  %v8767_v60 = vld [vmem:[#allocation11 + $0x60] sm:$0xff]  }
 0x2a8   : > { %3704 = vst [vmem:[#allocation2 + $0x60] sm:$0xf] %v3703_v27  ;;  %v4084_v50 = vor.u32 %v4083_v41, %v4080_v28  ;;  %v3460_v42 = vrot.slane %v3458_v46, 7  ;;  %v7445_v8 = vadd.f32 %v10675_v18, %v10667_v17  ;;  %v6962_v61 = vrot.slane %v4518_v31, 9  ;;  %v3942_v54 = vld [vmem:[#allocation2 + $0x3c] sm:$0xf]  ;;  %7654 = vmatprep.subr.bf16.mxu0 %v8764_v1 }
 0x2a9   : > { %v4648_v30 = vrot.slane %v4519_v40, 5  ;;  %v7087_v49 = vpack.c.bf16 %v3096_v14, %v3096_v14  ;;  %v4094_v34 = vor.u32 %v4093_v38, %v4089_v26  ;;  %v4099_v12 = vrot.slane %v4097_v39, 5  ;;  %v4520_v47 = vld [vmem:[#allocation2 + $0x44] sm:$0x1]  ;;  %v10754_v7 = vpop.f32.mrb[140].mxu0 }
 0x2aa   : > { %v4085_v45 = vrot.slane %v4084_v50, 4  ;;  %v3463_v27 = vor.u32 %v3461_v2, %v3460_v42  ;;  %v3465_v32 = vrot.slane %v3460_v42, 4  ;;  %v8286_v28 = vadd.f32 %v7445_v8, %v10414_v59  ;;  %v8765_v17 = vld [vmem:[#allocation11 + $0x18] sm:$0xff]   ;;  %v10758_v39 = vpop.f32.mrb[141].mxu0 }
 0x2ab   : > { %v4649_v15 = vsel %vm9791_vm5, %v6962_v61, %v4648_v30  ;;  %v3467_v18 = vshrl.u32 %v7087_v49, 16  ;;  %v3470_v31 = vshll.u32 %v7087_v49, 16  ;;  %v4095_v38 = vrot.slane %v4094_v34, 4  ;;  %v10765_v2 = vpop.f32.mrb[142].mxu0  ;;  %v8769_v8 = vld [vmem:[#allocation11 + $0xb8] sm:$0xff]   ;;  %7655 = vmatpush3.bf16.msra.mxu0 %v8765_v17 }
 0x2ac   : > { %v4090_v41 = vsel %vm9333_vm2, %v4085_v45, %v4089_v26  ;;  %v3464_v59 = vsel %vm10498_vm14, %v3456_v25, %v3463_v27  ;;  %v3707_v48 = vsel %vm10223_vm8, %v3465_v32, %v3706_v53  ;;  %v8287_v40 = vadd.f32 %v8286_v28, %v10561_v37  ;;  %v3709_v26 = vld [vmem:[#allocation2 + $0x6c] sm:$0xf]  ;;  %v10773_v42 = vpop.f32.mrb[143].mxu0  ;;  %v10777_v61 = vld [vmem:[#allocation10] ss:$0 sm:$0xff]  ;;  %v8740_v53 = vld [vmem:[#allocation2 + $0x30] sm:$0xff]   ;;  %7656 = vmatprep.subr.bf16.mxu0 %v8767_v60 }
 0x2ad   : > { %v4650_v46 = vrot.slane %v4648_v30, 4  ;;  %3705 = vst [vmem:[#allocation2 + $0x64] sm:$0xf] %v3464_v59  ;;  %3708 = vst [vmem:[#allocation2 + $0x68] sm:$0x1] %v3707_v48  ;;  %v10767_v14 = vrot.slane %v3467_v18, 7  ;;  %v4100_v50 = vsel %vm9333_vm2, %v4095_v38, %v4099_v12  ;;  %v7448_v25 = vadd.f32 %v10701_v19, %v10696_v24  ;;  %8126 = vmatprep.subr.bf16.mxu1 %v8769_v8 }
 0x2ae   : > { %v4651_v1 = vrot.slane %v4520_v47, 5  ;;  %v10775_v37 = vcombine.low %v4090_v41, %v4100_v50  ;;  %v3065_v30 = vadd.f32 %v10777_v61, %v8287_v40  ;;  %v3943_v49 = vld [vmem:[#allocation2 + $0x40] sm:$0xf]  ;;  %v4102_v45 = vshrl.u32 %v3942_v54, 16  ;;  %v8768_v27 = vld [vmem:[#allocation11 + $0x20] sm:$0xff]   ;;  %v8770_v47 = vld [vmem:[#allocation11 + $0x68] sm:$0xff]   ;;  %8127 = vmatpush3.bf16.msra.mxu1 %v8769_v8 }
 0x2af   : > { %v4105_v34 = vshll.u32 %v3942_v54, 16  ;;  %v3472_v12 = vor.u32 %v3470_v31, %v10767_v14  ;;  %v3473_v32 = vrot.slane %v10767_v14, 4  ;;  %v8274_v19 = vadd.f32 %v7448_v25, %v10403_v63  ;;  %v3944_v28 = vld [vmem:[#allocation2 + $0x44] sm:$0x1]  ;;  %v4521_v38 = vld [vmem:[#allocation2 + $0x48] sm:$0xe]  ;;  %7657 = vmatpush3.bf16.msra.mxu0 %v8768_v27 }
 0x2b0   : > { %v4652_v24 = vsel %vm9791_vm5, %v4650_v46, %v4651_v1  ;;  %5175 = vmatprep.mubr.bf16.mxu0 %v10775_v37  ;;  %v3097_v18 = vmax.f32 %v3065_v30, 0.0  ;;  %v4104_v54 = vrot.slane %v4102_v45, 4  ;;  %v4111_v63 = vshll.u32 %v3943_v49, 16  ;;  %v4522_v40 = vld [vmem:[#allocation2 + $0x4c] sm:$0xf]  ;;  %7658 = vmatprep.subr.bf16.mxu0 %v8770_v47 }
 0x2b1   : > { %v10786_v41 = vcombine.low %v4649_v15, %v4652_v24  ;;  %v4107_v17 = vrot.slane %v4105_v34, 5  ;;  %v3710_v31 = vsel %vm10492_vm13, %v3472_v12, %v3709_v26  ;;  %5176 = vmatmul.mubr.bf16.gmra.mrb[172].mxu0 %v8740_v53  ;;  %v8275_v59 = vadd.f32 %v8274_v19, %v10550_v35  ;;  %v10791_v46 = vpop.f32.mrb[144].mxu0  ;;  %v4523_v25 = vld [vmem:[#allocation2 + $0x50] sm:$0x1]  ;;  %v8771_v26 = vld [vmem:[#allocation11 + $0x28] sm:$0xff]   ;;  %v8773_v34 = vld [vmem:[#allocation11 + $0x70] sm:$0xff]  }
 0x2b2   : > { %v4115_v48 = vshrl.u32 %v3943_v49, 16  ;;  %3711 = vst [vmem:[#allocation2 + $0x6c] sm:$0xf] %v3710_v31  ;;  %v7088_v60 = vpack.c.bf16 %v3097_v18, %v3097_v18  ;;  %v4121_v50 = vshll.u32 %v3944_v28, 16  ;;  %v7451_v1 = vadd.f32 %v10706_v44, %v10703_v33  ;;  %v10796_v8 = vpop.f32.mrb[145].mxu0 }
 0x2b3   : > { %8088 = vmatprep.mubr.bf16.mxu1 %v10786_v41  ;;  %v4108_v15 = vor.u32 %v4107_v17, %v4104_v54  ;;  %v3066_v35 = vadd.f32 %v10777_v61, %v8275_v59  ;;  %v4113_v30 = vrot.slane %v4111_v63, 5  ;;  %v6963_v49 = vrot.slane %v4521_v38, 9  ;;  %v10799_v45 = vpop.f32.mrb[146].mxu0  ;;  %7659 = vmatpush3.bf16.msra.mxu0 %v8771_v26  ;;  %v3713_v47 = vld [vmem:[#allocation2 + $0x74] sm:$0x1] }
 0x2b4   : > { %v4117_v53 = vrot.slane %v4115_v48, 4  ;;  %v3475_v12 = vshrl.u32 %v7088_v60, 16  ;;  %v3478_v24 = vshll.u32 %v7088_v60, 16  ;;  %v4123_v28 = vrot.slane %v4121_v50, 5  ;;  %v10806_v59 = vpop.f32.mrb[147].mxu0  ;;  %7660 = vmatprep.subr.bf16.mxu0 %v8773_v34 }
 0x2b5   : > { %v4109_v19 = vrot.slane %v4108_v15, 4  ;;  %v3098_v18 = vmax.f32 %v3066_v35, 0.0  ;;  %v8282_v44 = vadd.f32 %v7451_v1, %v10411_v16  ;;  %v4655_v54 = vrot.slane %v4522_v40, 5  ;;  %v8774_v40 = vld [vmem:[#allocation11 + $0x30] sm:$0xff]   ;;  %v3945_v35 = vld [vmem:[#allocation2 + $0x48] sm:$0xf] }
 0x2b6   : > { %v4118_v33 = vor.u32 %v4117_v53, %v4113_v30  ;;  %v3477_v27 = vrot.slane %v3475_v12, 7  ;;  %v4658_v31 = vrot.slane %v4523_v25, 5  ;;  %v7454_v38 = vadd.f32 %v10733_v23, %v10725_v13  ;;  %v3946_v53 = vld [vmem:[#allocation2 + $0x4c] sm:$0xf] }
 0x2b7   : > { %v4114_v17 = vsel %vm9333_vm2, %v4109_v19, %v4113_v30  ;;  %v7089_v63 = vpack.c.bf16 %v3098_v18, %v3098_v18  ;;  %v8283_v60 = vadd.f32 %v8282_v44, %v10559_v20  ;;  %v4656_v16 = vsel %vm9791_vm5, %v6963_v49, %v4655_v54  ;;  %7661 = vmatpush3.bf16.msra.mxu0 %v8774_v40 }
 0x2b8   : > { %v4119_v48 = vrot.slane %v4118_v33, 4  ;;  %v3480_v15 = vor.u32 %v3478_v24, %v3477_v27  ;;  %v3482_v50 = vrot.slane %v3477_v27, 4  ;;  %v4657_v1 = vrot.slane %v4655_v54, 4  ;;  %v8741_v33 = vld [vmem:[#allocation2 + $0x3c] sm:$0xff]  }
 0x2b9   : > { %v8294_v25 = vadd.f32 %v7454_v38, %v10425_v22  ;;  %v3484_v13 = vshrl.u32 %v7089_v63, 16  ;;  %v3487_v23 = vshll.u32 %v7089_v63, 16  ;;  %v3067_v30 = vadd.f32 %v10777_v61, %v8283_v60  ;;  %v10815_v20 = vpop.f32.mrb[148].mxu0  ;;  %v3716_v22 = vld [vmem:[#allocation2 + $0x78] sm:$0xf]  ;;  %v8776_v27 = vld [vmem:[#allocation11 + $0x78] sm:$0xff]  }
 0x2ba   : > { %v4124_v26 = vsel %vm9333_vm2, %v4119_v48, %v4123_v28  ;;  %v3481_v49 = vsel %vm10498_vm14, %v3473_v32, %v3480_v15  ;;  %v3714_v34 = vsel %vm10223_vm8, %v3482_v50, %v3713_v47  ;;  %v4659_v24 = vsel %vm9791_vm5, %v4657_v1, %v4658_v31  ;;  %v10827_v19 = vpop.f32.mrb[149].mxu0  ;;  %v8775_v28 = vld [vmem:[#allocation11 + $0x1c0] sm:$0xff]   ;;  %v4524_v50 = vld [vmem:[#allocation2 + $0x54] sm:$0xe]  ;;  %7662 = vmatprep.subr.bf16.mxu0 %v8776_v27  ;;  %v3720_v27 = vld [vmem:[#allocation2 + $0x80] sm:$0x1] }
 0x2bb   : > { %v10823_v12 = vcombine.low %v4114_v17, %v4124_v26  ;;  %3712 = vst [vmem:[#allocation2 + $0x70] sm:$0xf] %v3481_v49  ;;  %3715 = vst [vmem:[#allocation2 + $0x74] sm:$0x1] %v3714_v34  ;;  %v3486_v18 = vrot.slane %v3484_v13, 7  ;;  %v3099_v14 = vmax.f32 %v3067_v30, 0.0  ;;  %v10829_v44 = vcombine.low %v4656_v16, %v4659_v24  ;;  %7784 = vmatprep.subr.bf16.mxu1 %v8775_v28 }
 0x2bc   : > { %v8295_v32 = vadd.f32 %v8294_v25, %v10582_v10  ;;  %v10832_v54 = vpop.f32.mrb[150].mxu0  ;;  %v8778_v17 = vld [vmem:[#allocation11 + $0x38] sm:$0xff]   ;;  %v4126_v31 = vshrl.u32 %v3945_v35, 16  ;;  %v4129_v38 = vshll.u32 %v3945_v35, 16  ;;  %v4135_v47 = vshll.u32 %v3946_v53, 16 }
 0x2bd   : > { %5183 = vmatprep.mubr.bf16.mxu0 %v10823_v12  ;;  %v4139_v63 = vshrl.u32 %v3946_v53, 16  ;;  %v10835_v48 = vpop.f32.mrb[151].mxu0  ;;  %v3489_v60 = vor.u32 %v3487_v23, %v3486_v18  ;;  %v3490_v40 = vrot.slane %v3486_v18, 4  ;;  %v7090_v15 = vpack.c.bf16 %v3099_v14, %v3099_v14  ;;  %8089 = vmatmul.mubr.bf16.gmra.mrb[104].mxu1 %v10829_v44  ;;  %v3947_v16 = vld [vmem:[#allocation2 + $0x50] sm:$0x1] }
 0x2be   : > { %5184 = vmatmul.mubr.bf16.gmra.mrb[176].mxu0 %v8741_v33  ;;  %v3068_v10 = vadd.f32 %v10777_v61, %v8295_v32  ;;  %v4128_v1 = vrot.slane %v4126_v31, 4  ;;  %v4131_v25 = vrot.slane %v4129_v38, 5  ;;  %v4137_v13 = vrot.slane %v4135_v47, 5  ;;  %v4525_v35 = vld [vmem:[#allocation2 + $0x58] sm:$0xf] }
 0x2bf   : > { %v4141_v26 = vrot.slane %v4139_v63, 4  ;;  %v3717_v30 = vsel %vm10492_vm13, %v3489_v60, %v3716_v22  ;;  %v3492_v53 = vshrl.u32 %v7090_v15, 16  ;;  %v3495_v23 = vshll.u32 %v7090_v15, 16  ;;  %7663 = vmatpush3.bf16.msra.mxu0 %v8778_v17 }
 0x2c0   : > { %v3100_v49 = vmax.f32 %v3068_v10, 0.0  ;;  %3718 = vst [vmem:[#allocation2 + $0x78] sm:$0xf] %v3717_v30  ;;  %v4132_v34 = vor.u32 %v4131_v25, %v4128_v1  ;;  %v4145_v28 = vshll.u32 %v3947_v16, 16  ;;  %v7457_v18 = vadd.f32 %v10743_v51, %v10738_v55  ;;  %v4526_v16 = vld [vmem:[#allocation2 + $0x5c] sm:$0x1] }
 0x2c1   : > { %v4142_v24 = vor.u32 %v4141_v26, %v4137_v13  ;;  %v3494_v14 = vrot.slane %v3492_v53, 7  ;;  %v6964_v32 = vrot.slane %v4524_v50, 9  ;;  %v4662_v31 = vrot.slane %v4525_v35, 5  ;;  %v10843_v38 = vpop.f32.mrb[152].mxu0  ;;  %v3948_v35 = vld [vmem:[#allocation2 + $0x54] sm:$0xf] }
 0x2c2   : > { %v7091_v33 = vpack.c.bf16 %v3100_v49, %v3100_v49  ;;  %v4133_v47 = vrot.slane %v4132_v34, 4  ;;  %v4147_v63 = vrot.slane %v4145_v28, 5  ;;  %v8302_v60 = vadd.f32 %v7457_v18, %v10432_v21  ;;  %v10846_v25 = vpop.f32.mrb[153].mxu0 }
 0x2c3   : > { %v4143_v22 = vrot.slane %v4142_v24, 4  ;;  %v3497_v17 = vor.u32 %v3495_v23, %v3494_v14  ;;  %v3499_v15 = vrot.slane %v3494_v14, 4  ;;  %v4663_v26 = vsel %vm9791_vm5, %v6964_v32, %v4662_v31  ;;  %v10863_v49 = vpop.f32.mrb[154].mxu0  ;;  %v8742_v24 = vld [vmem:[#allocation2 + $0x48] sm:$0xff]  }
 0x2c4   : > { %v3501_v10 = vshrl.u32 %v7091_v33, 16  ;;  %v3504_v1 = vshll.u32 %v7091_v33, 16  ;;  %v4138_v55 = vsel %vm9333_vm2, %v4133_v47, %v4137_v13  ;;  %v8303_v50 = vadd.f32 %v8302_v60, %v10587_v62  ;;  %v3949_v13 = vld [vmem:[#allocation2 + $0x58] sm:$0xf]  ;;  %v3723_v62 = vld [vmem:[#allocation2 + $0x84] sm:$0xf] }
 0x2c5   : > { %v4148_v51 = vsel %vm9333_vm2, %v4143_v22, %v4147_v63  ;;  %v3498_v21 = vsel %vm10498_vm14, %v3490_v40, %v3497_v17  ;;  %v3721_v30 = vsel %vm10223_vm8, %v3499_v15, %v3720_v27  ;;  %v4664_v28 = vrot.slane %v4662_v31, 4  ;;  %v10868_v14 = vpop.f32.mrb[155].mxu0  ;;  %v3950_v27 = vld [vmem:[#allocation2 + $0x5c] sm:$0x1] }
 0x2c6   : > { %v10859_v53 = vrot.slane %v3501_v10, 7  ;;  %v10861_v23 = vcombine.low %v4138_v55, %v4148_v51  ;;  %3719 = vst [vmem:[#allocation2 + $0x7c] sm:$0xf] %v3498_v21  ;;  %3722 = vst [vmem:[#allocation2 + $0x80] sm:$0x1] %v3721_v30  ;;  %v3069_v34 = vadd.f32 %v10777_v61, %v8303_v50  ;;  %v4665_v18 = vrot.slane %v4526_v16, 5 }
 0x2c7   : > { %v7460_v40 = vadd.f32 %v10758_v39, %v10754_v7  ;;  %v4150_v47 = vshrl.u32 %v3948_v35, 16  ;;  %v4153_v22 = vshll.u32 %v3948_v35, 16  ;;  %v4159_v17 = vshll.u32 %v3949_v13, 16  ;;  %v4527_v7 = vld [vmem:[#allocation2 + $0x60] sm:$0xe] }
 0x2c8   : > { %v3506_v33 = vor.u32 %v3504_v1, %v10859_v53  ;;  %v3507_v32 = vrot.slane %v10859_v53, 4  ;;  %5191 = vmatprep.mubr.bf16.mxu0 %v10861_v23  ;;  %v3101_v63 = vmax.f32 %v3069_v34, 0.0  ;;  %v4666_v31 = vsel %vm9791_vm5, %v4664_v28, %v4665_v18  ;;  %v4528_v21 = vld [vmem:[#allocation2 + $0x64] sm:$0xf] }
 0x2c9   : > { %5192 = vmatmul.mubr.bf16.gmra.mrb[180].mxu0 %v8742_v24  ;;  %v8290_v60 = vadd.f32 %v7460_v40, %v10419_v11  ;;  %v10878_v15 = vcombine.low %v4663_v26, %v4666_v31  ;;  %v4152_v10 = vrot.slane %v4150_v47, 4  ;;  %v4155_v1 = vrot.slane %v4153_v22, 5  ;;  %v10880_v16 = vpop.f32.mrb[156].mxu0 }
 0x2ca   : > { %v3724_v39 = vsel %vm10492_vm13, %v3506_v33, %v3723_v62  ;;  %v7092_v55 = vpack.c.bf16 %v3101_v63, %v3101_v63  ;;  %v4161_v50 = vrot.slane %v4159_v17, 5  ;;  %v4163_v35 = vshrl.u32 %v3949_v13, 16  ;;  %v10883_v30 = vpop.f32.mrb[157].mxu0  ;;  %v4529_v62 = vld [vmem:[#allocation2 + $0x68] sm:$0x1] }
 0x2cb   : > { %3725 = vst [vmem:[#allocation2 + $0x84] sm:$0xf] %v3724_v39  ;;  %v8291_v51 = vadd.f32 %v8290_v60, %v10577_v56  ;;  %8092 = vmatprep.mubr.bf16.mxu1 %v10878_v15  ;;  %v4156_v11 = vor.u32 %v4155_v1, %v4152_v10  ;;  %v4169_v53 = vshll.u32 %v3950_v27, 16  ;;  %v7463_v26 = vadd.f32 %v10773_v42, %v10765_v2  ;;  %v10888_v24 = vpop.f32.mrb[158].mxu0  ;;  %v3951_v42 = vld [vmem:[#allocation2 + $0x60] sm:$0xf] }
 0x2cc   : > { %v6965_v34 = vrot.slane %v4527_v7, 9  ;;  %v3509_v28 = vshrl.u32 %v7092_v55, 16  ;;  %v3512_v18 = vshll.u32 %v7092_v55, 16  ;;  %v4165_v40 = vrot.slane %v4163_v35, 4  ;;  %v10891_v13 = vpop.f32.mrb[159].mxu0 }
 0x2cd   : > { %v3070_v56 = vadd.f32 %v10777_v61, %v8291_v51  ;;  %v4157_v33 = vrot.slane %v4156_v11, 4  ;;  %v4171_v47 = vrot.slane %v4169_v53, 5  ;;  %v8298_v22 = vadd.f32 %v7463_v26, %v10429_v4  ;;  %v3727_v17 = vld [vmem:[#allocation2 + $0x8c] sm:$0x1] }
 0x2ce   : > { %v4669_v63 = vrot.slane %v4528_v21, 5  ;;  %v3511_v27 = vrot.slane %v3509_v28, 7  ;;  %v4166_v60 = vor.u32 %v4165_v40, %v4161_v50  ;;  %v4672_v2 = vrot.slane %v4529_v62, 5  ;;  %v3952_v28 = vld [vmem:[#allocation2 + $0x64] sm:$0xf] }
 0x2cf   : > { %v3102_v31 = vmax.f32 %v3070_v56, 0.0  ;;  %v4162_v7 = vsel %vm9333_vm2, %v4157_v33, %v4161_v50  ;;  %v8299_v39 = vadd.f32 %v8298_v22, %v10584_v58  ;;  %v7466_v53 = vadd.f32 %v10796_v8, %v10791_v46  ;;  %v3953_v8 = vld [vmem:[#allocation2 + $0x68] sm:$0x1]  ;;  %v3730_v22 = vld [vmem:[#allocation2 + $0x90] sm:$0xf] }
 0x2d0   : > { %v4670_v10 = vsel %vm9791_vm5, %v6965_v34, %v4669_v63  ;;  %v4671_v1 = vrot.slane %v4669_v63, 4  ;;  %v3514_v55 = vor.u32 %v3512_v18, %v3511_v27  ;;  %v3516_v51 = vrot.slane %v3511_v27, 4 }
 0x2d1   : > { %v7093_v35 = vpack.c.bf16 %v3102_v31, %v3102_v31  ;;  %v4167_v4 = vrot.slane %v4166_v60, 4  ;;  %v3071_v21 = vadd.f32 %v10777_v61, %v8299_v39  ;;  %v4174_v26 = vshrl.u32 %v3951_v42, 16  ;;  %v8743_v60 = vld [vmem:[#allocation2 + $0x54] sm:$0xff]  }
 0x2d2   : > { %v4673_v11 = vsel %vm9791_vm5, %v4671_v1, %v4672_v2  ;;  %v3515_v58 = vsel %vm10498_vm14, %v3507_v32, %v3514_v55  ;;  %v3728_v50 = vsel %vm10223_vm8, %v3516_v51, %v3727_v17  ;;  %v8310_v46 = vadd.f32 %v7466_v53, %v10443_v9  ;;  %v11877_v2 = vld [vmem:[#allocation28_spill] sm:$0xff]  ;;  %v4530_v1 = vld [vmem:[#allocation2 + $0x6c] sm:$0xe] }
 0x2d3   : > { %v3518_v62 = vshrl.u32 %v7093_v35, 16  ;;  %v3521_v34 = vshll.u32 %v7093_v35, 16  ;;  %3726 = vst [vmem:[#allocation2 + $0x88] sm:$0xf] %v3515_v58  ;;  %3729 = vst [vmem:[#allocation2 + $0x8c] sm:$0x1] %v3728_v50  ;;  %v4172_v18 = vsel %vm9333_vm2, %v4167_v4, %v4171_v47  ;;  %v10910_v40 = vcombine.low %v4670_v10, %v4673_v11 }
 0x2d4   : > { %v3103_v56 = vmax.f32 %v3071_v21, 0.0  ;;  %v10913_v32 = vcombine.low %v4162_v7, %v4172_v18  ;;  %v4176_v63 = vrot.slane %v4174_v26, 4  ;;  %v4177_v27 = vshll.u32 %v3951_v42, 16  ;;  %v4531_v35 = vld [vmem:[#allocation2 + $0x70] sm:$0xf] }
 0x2d5   : > { %v3520_v33 = vrot.slane %v3518_v62, 7  ;;  %8093 = vmatmul.mubr.bf16.gmra.mrb[108].mxu1 %v10910_v40  ;;  %v8311_v17 = vadd.f32 %v8310_v46, %v11877_v2  ;;  %v4183_v39 = vshll.u32 %v3952_v28, 16  ;;  %v4187_v47 = vshrl.u32 %v3952_v28, 16  ;;  %v4532_v11 = vld [vmem:[#allocation2 + $0x74] sm:$0x1] }
 0x2d6   : > { %v7094_v31 = vpack.c.bf16 %v3103_v56, %v3103_v56  ;;  %5199 = vmatprep.mubr.bf16.mxu0 %v10913_v32  ;;  %v4179_v9 = vrot.slane %v4177_v27, 5  ;;  %v4193_v51 = vshll.u32 %v3953_v8, 16  ;;  %v7469_v28 = vadd.f32 %v10806_v59, %v10799_v45  ;;  %v3734_v56 = vld [vmem:[#allocation2 + $0x98] sm:$0x1]  ;;  %v3164_v45 = vld [vmem:[#allocation2 + $0xa8] sm:$0x1] }
 0x2d7   : > { %v3523_v10 = vor.u32 %v3521_v34, %v3520_v33  ;;  %v3524_v55 = vrot.slane %v3520_v33, 4  ;;  %5200 = vmatmul.mubr.bf16.gmra.mrb[184].mxu0 %v8743_v60  ;;  %v3072_v42 = vadd.f32 %v10777_v61, %v8311_v17  ;;  %v4185_v21 = vrot.slane %v4183_v39, 5  ;;  %v11878_v17 = vld [vmem:[#allocation34_spill] sm:$0xff] }
 0x2d8   : > { %v3526_v7 = vshrl.u32 %v7094_v31, 16  ;;  %v3529_v4 = vshll.u32 %v7094_v31, 16  ;;  %v4180_v26 = vor.u32 %v4179_v9, %v4176_v63  ;;  %v4189_v58 = vrot.slane %v4187_v47, 4 }
 0x2d9   : > { %v3731_v53 = vsel %vm10492_vm13, %v3523_v10, %v3730_v22  ;;  %v4195_v50 = vrot.slane %v4193_v51, 5  ;;  %v3104_v34 = vmax.f32 %v3072_v42, 0.0  ;;  %v6966_v18 = vrot.slane %v4530_v1, 9 }
 0x2da   : > { %3732 = vst [vmem:[#allocation2 + $0x90] sm:$0xf] %v3731_v53  ;;  %v3528_v62 = vrot.slane %v3526_v7, 7  ;;  %v4181_v46 = vrot.slane %v4180_v26, 4  ;;  %v4190_v8 = vor.u32 %v4189_v58, %v4185_v21  ;;  %v4676_v33 = vrot.slane %v4531_v35, 5 }
 0x2db   : > { %v4679_v27 = vrot.slane %v4532_v11, 5  ;;  %v7095_v2 = vpack.c.bf16 %v3104_v34, %v3104_v34  ;;  %v8318_v22 = vadd.f32 %v7469_v28, %v11878_v17  ;;  %v3954_v35 = vld [vmem:[#allocation2 + $0x6c] sm:$0xf]  ;;  %v3737_v53 = vld [vmem:[#allocation2 + $0x9c] sm:$0xf] }
 0x2dc   : > { %v3531_v31 = vor.u32 %v3529_v4, %v3528_v62  ;;  %v3533_v60 = vrot.slane %v3528_v62, 4  ;;  %v4186_v63 = vsel %vm9333_vm2, %v4181_v46, %v4185_v21  ;;  %v4191_v39 = vrot.slane %v4190_v8, 4  ;;  %v11879_v34 = vld [vmem:[#allocation37_spill] sm:$0xff] }
 0x2dd   : > { %v4677_v47 = vsel %vm9791_vm5, %v6966_v18, %v4676_v33  ;;  %v4678_v10 = vrot.slane %v4676_v33, 4  ;;  %v3535_v9 = vshrl.u32 %v7095_v2, 16  ;;  %v3538_v51 = vshll.u32 %v7095_v2, 16  ;;  %v3956_v18 = vld [vmem:[#allocation2 + $0x74] sm:$0x1] }
 0x2de   : > { %v3532_v59 = vsel %vm10498_vm14, %v3524_v55, %v3531_v31  ;;  %v3735_v1 = vsel %vm10223_vm8, %v3533_v60, %v3734_v56  ;;  %v4196_v7 = vsel %vm9333_vm2, %v4191_v39, %v4195_v50  ;;  %v8319_v4 = vadd.f32 %v8318_v22, %v10612_v43  ;;  %v3955_v55 = vld [vmem:[#allocation2 + $0x70] sm:$0xf]  ;;  %v8744_v43 = vld [vmem:[#allocation2 + $0x60] sm:$0xff]  }
 0x2df   : > { %3733 = vst [vmem:[#allocation2 + $0x94] sm:$0xf] %v3532_v59  ;;  %3736 = vst [vmem:[#allocation2 + $0x98] sm:$0x1] %v3735_v1  ;;  %v4680_v42 = vsel %vm9791_vm5, %v4678_v10, %v4679_v27  ;;  %v7472_v21 = vadd.f32 %v10827_v19, %v10815_v20  ;;  %v10939_v11 = vrot.slane %v3535_v9, 7  ;;  %v10941_v26 = vcombine.low %v4186_v63, %v4196_v7  ;;  %v11880_v60 = vld [vmem:[#allocation23_spill] sm:$0xff] }
 0x2e0   : > { %v10943_v58 = vcombine.low %v4677_v47, %v4680_v42  ;;  %v3165_v62 = vsel %vm10223_vm8, 0, %v3164_v45  ;;  %v3073_v50 = vadd.f32 %v10777_v61, %v8319_v4  ;;  %v4198_v56 = vshrl.u32 %v3954_v35, 16  ;;  %v3220_v19 = vld [vmem:[#allocation2 + $0xb0] sm:$0x1]  ;;  %v4533_v63 = vld [vmem:[#allocation2 + $0x78] sm:$0xe] }
 0x2e1   : > { %v8306_v28 = vadd.f32 %v7472_v21, %v11879_v34  ;;  %3166 = vst [vmem:[#allocation2 + $0xa8] sm:$0x1] %v3165_v62  ;;  %v4201_v20 = vshll.u32 %v3954_v35, 16  ;;  %v3540_v46 = vor.u32 %v3538_v51, %v10939_v11  ;;  %v3541_v8 = vrot.slane %v10939_v11, 4  ;;  %5207 = vmatprep.mubr.bf16.mxu0 %v10941_v26  ;;  %v4534_v35 = vld [vmem:[#allocation2 + $0x7c] sm:$0xf] }
 0x2e2   : > { %8096 = vmatprep.mubr.bf16.mxu1 %v10943_v58  ;;  %v4207_v33 = vshll.u32 %v3955_v55, 16  ;;  %v4211_v27 = vshrl.u32 %v3955_v55, 16  ;;  %v3105_v31 = vmax.f32 %v3073_v50, 0.0  ;;  %5208 = vmatmul.mubr.bf16.gmra.mrb[188].mxu0 %v8744_v43  ;;  %v4200_v17 = vrot.slane %v4198_v56, 4  ;;  %v4535_v7 = vld [vmem:[#allocation2 + $0x80] sm:$0x1] }
 0x2e3   : > { %v8307_v2 = vadd.f32 %v8306_v28, %v11880_v60  ;;  %v4203_v22 = vrot.slane %v4201_v20, 5  ;;  %v3738_v39 = vsel %vm10492_vm13, %v3540_v46, %v3737_v53  ;;  %v4217_v45 = vshll.u32 %v3956_v18, 16  ;;  %v11882_v28 = vld [vmem:[#allocation20_spill] sm:$0xff]  ;;  %v11194_v21 = vld [vmem:[#allocation2 + $0x48] sm:$0xff]  }
 0x2e4   : > { %v4209_v47 = vrot.slane %v4207_v33, 5  ;;  %v4213_v10 = vrot.slane %v4211_v27, 4  ;;  %3739 = vst [vmem:[#allocation2 + $0x9c] sm:$0xf] %v3738_v39  ;;  %v7096_v59 = vpack.c.bf16 %v3105_v31, %v3105_v31  ;;  %v7475_v51 = vadd.f32 %v10835_v48, %v10832_v54  ;;  %v3741_v54 = vld [vmem:[#allocation2 + $0xa4] sm:$0x1] }
 0x2e5   : > { %v3074_v1 = vadd.f32 %v10777_v61, %v8307_v2  ;;  %v4204_v9 = vor.u32 %v4203_v22, %v4200_v17  ;;  %v4219_v42 = vrot.slane %v4217_v45, 5  ;;  %v3221_v55 = vsel %vm10237_vm10, 0, %v3220_v19  ;;  %v3167_v17 = vld [vmem:[#allocation2 + $0xb4] sm:$0x1]  ;;  %v3957_v45 = vld [vmem:[#allocation2 + $0x78] sm:$0xf] }
 0x2e6   : > { %v4214_v4 = vor.u32 %v4213_v10, %v4209_v47  ;;  %v6967_v11 = vrot.slane %v4533_v63, 9  ;;  %v3543_v53 = vshrl.u32 %v7096_v59, 16  ;;  %v3546_v62 = vshll.u32 %v7096_v59, 16  ;;  %3222 = vst [vmem:[#allocation2 + $0xb0] sm:$0x1] %v3221_v55  ;;  %v11081_v29 = vld [vmem:[#allocation2 + $0x90] sm:$0xff]  }
 0x2e7   : > { %v3106_v50 = vmax.f32 %v3074_v1, 0.0  ;;  %v4205_v43 = vrot.slane %v4204_v9, 4  ;;  %v8314_v18 = vadd.f32 %v7475_v51, %v11882_v28  ;;  %v4683_v56 = vrot.slane %v4534_v35, 5 }
 0x2e8   : > { %v4215_v34 = vrot.slane %v4214_v4, 4  ;;  %v4686_v20 = vrot.slane %v4535_v7, 5  ;;  %v3545_v46 = vrot.slane %v3543_v53, 7  ;;  %v7478_v19 = vadd.f32 %v10846_v25, %v10843_v38  ;;  %v11883_v25 = vld [vmem:[#allocation21_spill] sm:$0xff]  ;;  %v10981_v7 = vld [vmem:[#allocation2 + $0x6c] sm:$0xff]  }
 0x2e9   : > { %v7097_v48 = vpack.c.bf16 %v3106_v50, %v3106_v50  ;;  %v4210_v33 = vsel %vm9333_vm2, %v4205_v43, %v4209_v47  ;;  %v8315_v31 = vadd.f32 %v8314_v18, %v10610_v5  ;;  %v4684_v60 = vsel %vm9791_vm5, %v6967_v11, %v4683_v56  ;;  %v3958_v5 = vld [vmem:[#allocation2 + $0x7c] sm:$0xf]  ;;  %v3744_v55 = vld [vmem:[#allocation2 + $0xa8] sm:$0xf]  ;;  %v11884_v53 = vld [vmem:[#allocation31_spill] sm:$0xff] }
 0x2ea   : > { %v4220_v27 = vsel %vm9333_vm2, %v4215_v34, %v4219_v42  ;;  %v4685_v2 = vrot.slane %v4683_v56, 4  ;;  %v3548_v22 = vor.u32 %v3546_v62, %v3545_v46  ;;  %v3550_v63 = vrot.slane %v3545_v46, 4  ;;  %v3959_v42 = vld [vmem:[#allocation2 + $0x80] sm:$0x1] }
 0x2eb   : > { %v3552_v39 = vshrl.u32 %v7097_v48, 16  ;;  %v3555_v10 = vshll.u32 %v7097_v48, 16  ;;  %v10971_v59 = vcombine.low %v4210_v33, %v4220_v27  ;;  %v3075_v47 = vadd.f32 %v10777_v61, %v8315_v31  ;;  %v3223_v48 = vld [vmem:[#allocation2 + $0xbc] sm:$0x1]  ;;  %v4536_v33 = vld [vmem:[#allocation2 + $0x84] sm:$0xe] }
 0x2ec   : > { %v4687_v38 = vsel %vm9791_vm5, %v4685_v2, %v4686_v20  ;;  %v8326_v1 = vadd.f32 %v7478_v19, %v11883_v25  ;;  %v3549_v9 = vsel %vm10498_vm14, %v3541_v8, %v3548_v22  ;;  %v3742_v51 = vsel %vm10223_vm8, %v3550_v63, %v3741_v54  ;;  %v4537_v2 = vld [vmem:[#allocation2 + $0x88] sm:$0xf] }
 0x2ed   : > { %v3554_v35 = vrot.slane %v3552_v39, 7  ;;  %v10983_v4 = vcombine.low %v4684_v60, %v4687_v38  ;;  %3740 = vst [vmem:[#allocation2 + $0xa0] sm:$0xf] %v3549_v9  ;;  %3743 = vst [vmem:[#allocation2 + $0xa4] sm:$0x1] %v3742_v51  ;;  %5215 = vmatprep.mubr.bf16.mxu0 %v10971_v59  ;;  %v3107_v11 = vmax.f32 %v3075_v47, 0.0  ;;  %v7481_v38 = vadd.f32 %v10868_v14, %v10863_v49 }
 0x2ee   : > { %v8327_v62 = vadd.f32 %v8326_v1, %v11884_v53  ;;  %v3168_v8 = vsel %vm10223_vm8, 0, %v3167_v17  ;;  %v4222_v50 = vshrl.u32 %v3957_v45, 16  ;;  %5216 = vmatmul.mubr.bf16.gmra.mrb[192].mxu0 %v10981_v7  ;;  %v4225_v28 = vshll.u32 %v3957_v45, 16 }
 0x2ef   : > { %v3557_v43 = vor.u32 %v3555_v10, %v3554_v35  ;;  %v3558_v34 = vrot.slane %v3554_v35, 4  ;;  %8097 = vmatmul.mubr.bf16.gmra.mrb[112].mxu1 %v10983_v4  ;;  %3169 = vst [vmem:[#allocation2 + $0xb4] sm:$0x1] %v3168_v8  ;;  %v4231_v18 = vshll.u32 %v3958_v5, 16  ;;  %v7098_v56 = vpack.c.bf16 %v3107_v11, %v3107_v11  ;;  %v4538_v10 = vld [vmem:[#allocation2 + $0x8c] sm:$0x1] }
 0x2f0   : > { %v3076_v20 = vadd.f32 %v10777_v61, %v8327_v62  ;;  %v4224_v46 = vrot.slane %v4222_v50, 4  ;;  %v4235_v54 = vshrl.u32 %v3958_v5, 16  ;;  %v4227_v27 = vrot.slane %v4225_v28, 5  ;;  %v3748_v35 = vld [vmem:[#allocation2 + $0xb0] sm:$0x1] }
 0x2f1   : > { %v3745_v19 = vsel %vm10492_vm13, %v3557_v43, %v3744_v55  ;;  %v4233_v31 = vrot.slane %v4231_v18, 5  ;;  %v4241_v60 = vshll.u32 %v3959_v42, 16  ;;  %v3560_v17 = vshrl.u32 %v7098_v56, 16  ;;  %v11885_v55 = vld [vmem:[#allocation26_spill] sm:$0xff]  ;;  %v3170_v18 = vld [vmem:[#allocation2 + $0xc0] sm:$0x1] }
 0x2f2   : > { %3746 = vst [vmem:[#allocation2 + $0xa8] sm:$0xf] %v3745_v19  ;;  %v3563_v22 = vshll.u32 %v7098_v56, 16  ;;  %v3108_v63 = vmax.f32 %v3076_v20, 0.0  ;;  %v4237_v39 = vrot.slane %v4235_v54, 4  ;;  %v4228_v45 = vor.u32 %v4227_v27, %v4224_v46 }
 0x2f3   : > { %v4243_v47 = vrot.slane %v4241_v60, 5  ;;  %v3224_v25 = vsel %vm10237_vm10, 0, %v3223_v48  ;;  %v3562_v1 = vrot.slane %v3560_v17, 7  ;;  %v6968_v51 = vrot.slane %v4536_v33, 9  ;;  %v3960_v19 = vld [vmem:[#allocation2 + $0x84] sm:$0xf] }
 0x2f4   : > { %v7099_v5 = vpack.c.bf16 %v3108_v63, %v3108_v63  ;;  %v4238_v9 = vor.u32 %v4237_v39, %v4233_v31  ;;  %3225 = vst [vmem:[#allocation2 + $0xbc] sm:$0x1] %v3224_v25  ;;  %v4229_v42 = vrot.slane %v4228_v45, 4  ;;  %v8334_v11 = vadd.f32 %v7481_v38, %v11885_v55 }
 0x2f5   : > { %v4690_v53 = vrot.slane %v4537_v2, 5  ;;  %v4693_v62 = vrot.slane %v4538_v10, 5  ;;  %v3565_v8 = vor.u32 %v3563_v22, %v3562_v1  ;;  %v3567_v50 = vrot.slane %v3562_v1, 4  ;;  %v3961_v2 = vld [vmem:[#allocation2 + $0x88] sm:$0xf] }
 0x2f6   : > { %v3569_v43 = vshrl.u32 %v7099_v5, 16  ;;  %v3572_v28 = vshll.u32 %v7099_v5, 16  ;;  %v4234_v49 = vsel %vm9333_vm2, %v4229_v42, %v4233_v31  ;;  %v4239_v14 = vrot.slane %v4238_v9, 4  ;;  %v3751_v27 = vld [vmem:[#allocation2 + $0xb4] sm:$0xf]  ;;  %v11887_v42 = vld [vmem:[#allocation33_spill] sm:$0xff] }
 0x2f7   : > { %v8335_v56 = vadd.f32 %v8334_v11, %v10655_v36  ;;  %v4691_v20 = vsel %vm9791_vm5, %v6968_v51, %v4690_v53  ;;  %v3566_v46 = vsel %vm10498_vm14, %v3558_v34, %v3565_v8  ;;  %v3749_v54 = vsel %vm10223_vm8, %v3567_v50, %v3748_v35  ;;  %v3962_v10 = vld [vmem:[#allocation2 + $0x8c] sm:$0x1]  ;;  %v4539_v8 = vld [vmem:[#allocation2 + $0x90] sm:$0xe] }
 0x2f8   : > { %v11008_v48 = vrot.slane %v3569_v43, 7  ;;  %v4692_v33 = vrot.slane %v4690_v53, 4  ;;  %3747 = vst [vmem:[#allocation2 + $0xac] sm:$0xf] %v3566_v46  ;;  %3750 = vst [vmem:[#allocation2 + $0xb0] sm:$0x1] %v3749_v54  ;;  %v4244_v31 = vsel %vm9333_vm2, %v4239_v14, %v4243_v47  ;;  %v7484_v60 = vadd.f32 %v10883_v30, %v10880_v16 }
 0x2f9   : > { %v3077_v36 = vadd.f32 %v10777_v61, %v8335_v56  ;;  %v3171_v34 = vsel %vm10223_vm8, 0, %v3170_v18  ;;  %v11019_v63 = vcombine.low %v4234_v49, %v4244_v31  ;;  %v11023_v47 = vld [vmem:[#allocation2 + $0x78] sm:$0xff]   ;;  %v11886_v16 = vld [vmem:[#allocation22_spill] sm:$0xff]  ;;  %v4246_v25 = vshrl.u32 %v3960_v19, 16  ;;  %v4540_v49 = vld [vmem:[#allocation2 + $0x94] sm:$0xf] }
 0x2fa   : > { %v3574_v17 = vor.u32 %v3572_v28, %v11008_v48  ;;  %v3575_v22 = vrot.slane %v11008_v48, 4  ;;  %v4694_v39 = vsel %vm9791_vm5, %v4692_v33, %v4693_v62  ;;  %3172 = vst [vmem:[#allocation2 + $0xc0] sm:$0x1] %v3171_v34  ;;  %v8322_v30 = vadd.f32 %v7484_v60, %v11886_v16  ;;  %v3226_v62 = vld [vmem:[#allocation2 + $0xc8] sm:$0x1] }
 0x2fb   : > { %v3109_v45 = vmax.f32 %v3077_v36, 0.0  ;;  %v11025_v38 = vcombine.low %v4691_v20, %v4694_v39  ;;  %5223 = vmatprep.mubr.bf16.mxu0 %v11019_v63  ;;  %v4249_v5 = vshll.u32 %v3960_v19, 16  ;;  %v4255_v9 = vshll.u32 %v3961_v2, 16  ;;  %v4541_v54 = vld [vmem:[#allocation2 + $0x98] sm:$0x1]  ;;  %v11888_v19 = vld [vmem:[#allocation27_spill] sm:$0xff] }
 0x2fc   : > { %v3752_v1 = vsel %vm10492_vm13, %v3574_v17, %v3751_v27  ;;  %v4259_v51 = vshrl.u32 %v3961_v2, 16  ;;  %5224 = vmatmul.mubr.bf16.gmra.mrb[196].mxu0 %v11023_v47  ;;  %v8323_v55 = vadd.f32 %v8322_v30, %v11887_v42  ;;  %v4248_v11 = vrot.slane %v4246_v25, 4  ;;  %v11889_v39 = vld [vmem:[#allocation30_spill] sm:$0xff] }
 0x2fd   : > { %3753 = vst [vmem:[#allocation2 + $0xb4] sm:$0xf] %v3752_v1  ;;  %v7100_v35 = vpack.c.bf16 %v3109_v45, %v3109_v45  ;;  %8100 = vmatprep.mubr.bf16.mxu1 %v11025_v38  ;;  %v4265_v53 = vshll.u32 %v3962_v10, 16  ;;  %v4251_v50 = vrot.slane %v4249_v5, 5  ;;  %v4257_v43 = vrot.slane %v4255_v9, 5 }
 0x2fe   : > { %v4261_v28 = vrot.slane %v4259_v51, 4  ;;  %v7487_v18 = vadd.f32 %v10891_v13, %v10888_v24  ;;  %v3078_v20 = vadd.f32 %v10777_v61, %v8323_v55  ;;  %v3227_v31 = vsel %vm10237_vm10, 0, %v3226_v62  ;;  %v3755_v24 = vld [vmem:[#allocation2 + $0xbc] sm:$0x1]  ;;  %v3963_v5 = vld [vmem:[#allocation2 + $0x90] sm:$0xf] }
 0x2ff   : > { %v3577_v14 = vshrl.u32 %v7100_v35, 16  ;;  %v3580_v56 = vshll.u32 %v7100_v35, 16  ;;  %v4267_v46 = vrot.slane %v4265_v53, 5  ;;  %v4252_v48 = vor.u32 %v4251_v50, %v4248_v11  ;;  %3228 = vst [vmem:[#allocation2 + $0xc8] sm:$0x1] %v3227_v31 }
 0x300   : > { %v4262_v33 = vor.u32 %v4261_v28, %v4257_v43  ;;  %v8330_v27 = vadd.f32 %v7487_v18, %v11888_v19  ;;  %v3110_v60 = vmax.f32 %v3078_v20, 0.0  ;;  %v6969_v34 = vrot.slane %v4539_v8, 9  ;;  %v3964_v55 = vld [vmem:[#allocation2 + $0x94] sm:$0xf]  ;;  %v3965_v50 = vld [vmem:[#allocation2 + $0x98] sm:$0x1] }
 0x301   : > { %v3579_v36 = vrot.slane %v3577_v14, 7  ;;  %v4697_v2 = vrot.slane %v4540_v49, 5  ;;  %v4253_v13 = vrot.slane %v4252_v48, 4  ;;  %v4700_v45 = vrot.slane %v4541_v54, 5  ;;  %v4542_v49 = vld [vmem:[#allocation2 + $0x9c] sm:$0xe] }
 0x302   : > { %v4263_v17 = vrot.slane %v4262_v33, 4  ;;  %v8331_v10 = vadd.f32 %v8330_v27, %v11889_v39  ;;  %v7101_v25 = vpack.c.bf16 %v3110_v60, %v3110_v60  ;;  %v4273_v20 = vshll.u32 %v3963_v5, 16  ;;  %v4543_v54 = vld [vmem:[#allocation2 + $0xa0] sm:$0xf]  ;;  %v3966_v48 = vld [vmem:[#allocation2 + $0x9c] sm:$0xf] }
 0x303   : > { %v3582_v16 = vor.u32 %v3580_v56, %v3579_v36  ;;  %v3584_v30 = vrot.slane %v3579_v36, 4  ;;  %v4698_v1 = vsel %vm9791_vm5, %v6969_v34, %v4697_v2  ;;  %v4258_v9 = vsel %vm9333_vm2, %v4253_v13, %v4257_v43  ;;  %v11056_v56 = vld [vmem:[#allocation2 + $0x84] sm:$0xff]   ;;  %v3758_v33 = vld [vmem:[#allocation2 + $0xc0] sm:$0xf] }
 0x304   : > { %v4268_v51 = vsel %vm9333_vm2, %v4263_v17, %v4267_v46  ;;  %v3079_v35 = vadd.f32 %v10777_v61, %v8331_v10  ;;  %v4699_v42 = vrot.slane %v4697_v2, 4  ;;  %v3586_v62 = vshrl.u32 %v7101_v25, 16  ;;  %v4544_v13 = vld [vmem:[#allocation2 + $0xa4] sm:$0x1] }
 0x305   : > { %v3583_v11 = vsel %vm10498_vm14, %v3575_v22, %v3582_v16  ;;  %v3756_v53 = vsel %vm10223_vm8, %v3584_v30, %v3755_v24  ;;  %v3589_v8 = vshll.u32 %v7101_v25, 16  ;;  %v11052_v28 = vcombine.low %v4258_v9, %v4268_v51 }
 0x306   : > { %3754 = vst [vmem:[#allocation2 + $0xb8] sm:$0xf] %v3583_v11  ;;  %3757 = vst [vmem:[#allocation2 + $0xbc] sm:$0x1] %v3756_v53  ;;  %v3111_v43 = vmax.f32 %v3079_v35, 0.0  ;;  %v4701_v18 = vsel %vm9791_vm5, %v4699_v42, %v4700_v45  ;;  %v4270_v61 = vshrl.u32 %v3963_v5, 16 }
 0x307   : > { %v3588_v14 = vrot.slane %v3586_v62, 7  ;;  %v11058_v22 = vcombine.low %v4698_v1, %v4701_v18  ;;  %v4279_v46 = vshll.u32 %v3964_v55, 16  ;;  %5231 = vmatprep.mubr.bf16.mxu0 %v11052_v28  ;;  %v4283_v31 = vshrl.u32 %v3964_v55, 16  ;;  %v3967_v35 = vld [vmem:[#allocation2 + $0xa0] sm:$0xf] }
 0x308   : > { %v7102_v19 = vpack.c.bf16 %v3111_v43, %v3111_v43  ;;  %v4272_v27 = vrot.slane %v4270_v61, 4  ;;  %v4289_v36 = vshll.u32 %v3965_v50, 16  ;;  %5232 = vmatmul.mubr.bf16.gmra.mrb[200].mxu0 %v11056_v56  ;;  %v4275_v2 = vrot.slane %v4273_v20, 5  ;;  %v3762_v55 = vld [vmem:[#allocation2 + $0xc8] sm:$0x1] }
 0x309   : > { %v3591_v60 = vor.u32 %v3589_v8, %v3588_v14  ;;  %v3592_v34 = vrot.slane %v3588_v14, 4  ;;  %8101 = vmatmul.mubr.bf16.gmra.mrb[116].mxu1 %v11058_v22  ;;  %v4281_v24 = vrot.slane %v4279_v46, 5  ;;  %v4285_v10 = vrot.slane %v4283_v31, 4  ;;  %v3968_v18 = vld [vmem:[#allocation2 + $0xa4] sm:$0x1] }
 0x30a   : > { %v3594_v17 = vshrl.u32 %v7102_v19, 16  ;;  %v3597_v39 = vshll.u32 %v7102_v19, 16  ;;  %v4291_v45 = vrot.slane %v4289_v36, 5  ;;  %v4276_v30 = vor.u32 %v4275_v2, %v4272_v27  ;;  %v3969_v36 = vld [vmem:[#allocation2 + $0xa8] sm:$0xf] }
 0x30b   : > { %v3759_v16 = vsel %vm10492_vm13, %v3591_v60, %v3758_v33  ;;  %v6970_v25 = vrot.slane %v4542_v49, 9  ;;  %v4704_v1 = vrot.slane %v4543_v54, 5  ;;  %v4286_v9 = vor.u32 %v4285_v10, %v4281_v24  ;;  %v4545_v54 = vld [vmem:[#allocation2 + $0xa8] sm:$0xe]  ;;  %v4546_v33 = vld [vmem:[#allocation2 + $0xac] sm:$0xf] }
 0x30c   : > { %3760 = vst [vmem:[#allocation2 + $0xc0] sm:$0xf] %v3759_v16  ;;  %v3596_v5 = vrot.slane %v3594_v17, 7  ;;  %v4707_v51 = vrot.slane %v4544_v13, 5  ;;  %v4294_v42 = vshrl.u32 %v3966_v48, 16  ;;  %v4277_v11 = vrot.slane %v4276_v30, 4 }
 0x30d   : > { %v4705_v53 = vsel %vm9791_vm5, %v6970_v25, %v4704_v1  ;;  %v4706_v62 = vrot.slane %v4704_v1, 4  ;;  %v4297_v8 = vshll.u32 %v3966_v48, 16  ;;  %v4287_v6 = vrot.slane %v4286_v9, 4  ;;  %v4547_v17 = vld [vmem:[#allocation2 + $0xb0] sm:$0x1] }
 0x30e   : > { %v3599_v50 = vor.u32 %v3597_v39, %v3596_v5  ;;  %v3601_v43 = vrot.slane %v3596_v5, 4  ;;  %v4296_v61 = vrot.slane %v4294_v42, 4  ;;  %v4282_v49 = vsel %vm9333_vm2, %v4277_v11, %v4281_v24  ;;  %v3970_v39 = vld [vmem:[#allocation2 + $0xac] sm:$0xf]  ;;  %v3971_v25 = vld [vmem:[#allocation2 + $0xb0] sm:$0x1] }
 0x30f   : > { %v4708_v14 = vsel %vm9791_vm5, %v4706_v62, %v4707_v51  ;;  %v4299_v20 = vrot.slane %v4297_v8, 5  ;;  %v4303_v46 = vshll.u32 %v3967_v35, 16  ;;  %v4292_v27 = vsel %vm9333_vm2, %v4287_v6, %v4291_v45 }
 0x310   : > { %v3600_v19 = vsel %vm10498_vm14, %v3592_v34, %v3599_v50  ;;  %v3763_v48 = vsel %vm10223_vm8, %v3601_v43, %v3762_v55  ;;  %v11077_v31 = vcombine.low %v4705_v53, %v4708_v14  ;;  %v11079_v60 = vcombine.low %v4282_v49, %v4292_v27  ;;  %v4548_v55 = vld [vmem:[#allocation2 + $0xb4] sm:$0xe]  ;;  %v4549_v50 = vld [vmem:[#allocation2 + $0xb8] sm:$0xf] }
 0x311   : > { %3761 = vst [vmem:[#allocation2 + $0xc4] sm:$0xf] %v3600_v19  ;;  %3764 = vst [vmem:[#allocation2 + $0xc8] sm:$0x1] %v3763_v48  ;;  %v4300_v2 = vor.u32 %v4299_v20, %v4296_v61  ;;  %v4305_v24 = vrot.slane %v4303_v46, 5  ;;  %v4307_v13 = vshrl.u32 %v3967_v35, 16 }
 0x312   : > { %8104 = vmatprep.mubr.bf16.mxu1 %v11077_v31  ;;  %v4313_v34 = vshll.u32 %v3968_v18, 16  ;;  %v6971_v10 = vrot.slane %v4545_v54, 9  ;;  %v4711_v16 = vrot.slane %v4546_v33, 5  ;;  %5239 = vmatprep.mubr.bf16.mxu0 %v11079_v60  ;;  %v4318_v1 = vshrl.u32 %v3969_v36, 16  ;;  %v3972_v49 = vld [vmem:[#allocation2 + $0xb4] sm:$0xf] }
 0x313   : > { %v4301_v45 = vrot.slane %v4300_v2, 4  ;;  %v4309_v30 = vrot.slane %v4307_v13, 4  ;;  %v4321_v5 = vshll.u32 %v3969_v36, 16  ;;  %5240 = vmatmul.mubr.bf16.gmra.mrb[204].mxu0 %v11081_v29  ;;  %v4714_v35 = vrot.slane %v4547_v17, 5  ;;  %v4550_v33 = vld [vmem:[#allocation2 + $0xbc] sm:$0x1] }
 0x314   : > { %v4315_v9 = vrot.slane %v4313_v34, 5  ;;  %v4713_v51 = vrot.slane %v4711_v16, 4  ;;  %v4327_v42 = vshll.u32 %v3970_v39, 16  ;;  %v4712_v53 = vsel %vm9791_vm5, %v6971_v10, %v4711_v16  ;;  %v3973_v2 = vld [vmem:[#allocation2 + $0xb8] sm:$0xf] }
 0x315   : > { %v4310_v11 = vor.u32 %v4309_v30, %v4305_v24  ;;  %v4320_v62 = vrot.slane %v4318_v1, 4  ;;  %v4323_v8 = vrot.slane %v4321_v5, 5  ;;  %v4331_v18 = vshrl.u32 %v3970_v39, 16  ;;  %v3974_v39 = vld [vmem:[#allocation2 + $0xbc] sm:$0x1] }
 0x316   : > { %v4715_v43 = vsel %vm9791_vm5, %v4713_v51, %v4714_v35  ;;  %v4329_v6 = vrot.slane %v4327_v42, 5  ;;  %v4337_v61 = vshll.u32 %v3971_v25, 16  ;;  %v4306_v14 = vsel %vm9333_vm2, %v4301_v45, %v4305_v24  ;;  %v4551_v25 = vld [vmem:[#allocation2 + $0xc0] sm:$0xe] }
 0x317   : > { %v4311_v20 = vrot.slane %v4310_v11, 4  ;;  %v11092_v46 = vcombine.low %v4712_v53, %v4715_v43  ;;  %v4324_v54 = vor.u32 %v4323_v8, %v4320_v62  ;;  %v4333_v19 = vrot.slane %v4331_v18, 4  ;;  %v11099_v5 = vld [vmem:[#allocation2 + $0x9c] sm:$0xff]  }
 0x318   : > { %v4339_v48 = vrot.slane %v4337_v61, 5  ;;  %v6972_v27 = vrot.slane %v4548_v55, 9  ;;  %v4718_v36 = vrot.slane %v4549_v50, 5  ;;  %v4342_v34 = vshrl.u32 %v3972_v49, 16  ;;  %v4552_v1 = vld [vmem:[#allocation2 + $0xc4] sm:$0xf] }
 0x319   : > { %v4316_v13 = vsel %vm9333_vm2, %v4311_v20, %v4315_v9  ;;  %8105 = vmatmul.mubr.bf16.gmra.mrb[120].mxu1 %v11092_v46  ;;  %v4325_v17 = vrot.slane %v4324_v54, 4  ;;  %v4345_v10 = vshll.u32 %v3972_v49, 16  ;;  %v4334_v16 = vor.u32 %v4333_v19, %v4329_v6  ;;  %v3975_v8 = vld [vmem:[#allocation2 + $0xc0] sm:$0xf]  ;;  %v4553_v49 = vld [vmem:[#allocation2 + $0xc8] sm:$0x1] }
 0x31a   : > { %v11097_v24 = vcombine.low %v4306_v14, %v4316_v13  ;;  %v4720_v45 = vrot.slane %v4718_v36, 4  ;;  %v4721_v30 = vrot.slane %v4550_v33, 5  ;;  %v4719_v51 = vsel %vm9791_vm5, %v6972_v27, %v4718_v36  ;;  %v3976_v19 = vld [vmem:[#allocation2 + $0xc4] sm:$0xf]  ;;  %v3977_v13 = vld [vmem:[#allocation2 + $0xc8] sm:$0x1] }
 0x31b   : > { %v4344_v35 = vrot.slane %v4342_v34, 4  ;;  %v4347_v9 = vrot.slane %v4345_v10, 5  ;;  %v4351_v42 = vshll.u32 %v3973_v2, 16  ;;  %v4335_v55 = vrot.slane %v4334_v16, 4 }
 0x31c   : > { %5247 = vmatprep.mubr.bf16.mxu0 %v11097_v24  ;;  %v4722_v11 = vsel %vm9791_vm5, %v4720_v45, %v4721_v30  ;;  %v4355_v53 = vshrl.u32 %v3973_v2, 16  ;;  %v4361_v62 = vshll.u32 %v3974_v39, 16  ;;  %v4330_v50 = vsel %vm9333_vm2, %v4325_v17, %v4329_v6 }
 0x31d   : > { %5248 = vmatmul.mubr.bf16.gmra.mrb[208].mxu0 %v11099_v5  ;;  %v11109_v43 = vcombine.low %v4719_v51, %v4722_v11  ;;  %v4348_v18 = vor.u32 %v4347_v9, %v4344_v35  ;;  %v4353_v61 = vrot.slane %v4351_v42, 5  ;;  %v4340_v14 = vsel %vm9333_vm2, %v4335_v55, %v4339_v48  ;;  %v11121_v9 = vld [vmem:[#allocation2 + $0xa8] sm:$0xff]  }
 0x31e   : > { %v4357_v20 = vrot.slane %v4355_v53, 4  ;;  %v6973_v54 = vrot.slane %v4551_v25, 9  ;;  %v4725_v33 = vrot.slane %v4552_v1, 5  ;;  %v11113_v27 = vcombine.low %v4330_v50, %v4340_v14 }
 0x31f   : > { %8108 = vmatprep.mubr.bf16.mxu1 %v11109_v43  ;;  %v4349_v36 = vrot.slane %v4348_v18, 4  ;;  %v4363_v2 = vrot.slane %v4361_v62, 5  ;;  %v4366_v6 = vshrl.u32 %v3975_v8, 16  ;;  %v4728_v34 = vrot.slane %v4553_v49, 5 }
 0x320   : > { %v4358_v17 = vor.u32 %v4357_v20, %v4353_v61  ;;  %v4727_v39 = vrot.slane %v4725_v33, 4  ;;  %v4369_v10 = vshll.u32 %v3975_v8, 16  ;;  %5255 = vmatprep.mubr.bf16.mxu0 %v11113_v27  ;;  %v4726_v48 = vsel %vm9791_vm5, %v6973_v54, %v4725_v33 }
 0x321   : > { %v4368_v16 = vrot.slane %v4366_v6, 4  ;;  %v4375_v45 = vshll.u32 %v3976_v19, 16  ;;  %v4379_v30 = vshrl.u32 %v3976_v19, 16  ;;  %v4385_v35 = vshll.u32 %v3977_v13, 16 }
 0x322   : > { %v4359_v25 = vrot.slane %v4358_v17, 4  ;;  %v4729_v1 = vsel %vm9791_vm5, %v4727_v39, %v4728_v34  ;;  %v4371_v51 = vrot.slane %v4369_v10, 5  ;;  %v4354_v53 = vsel %vm9333_vm2, %v4349_v36, %v4353_v61  ;;  %v11140_v36 = vld [vmem:[#allocation2 + $0xb4] sm:$0xff]  }
 0x323   : > { %v11123_v42 = vcombine.low %v4726_v48, %v4729_v1  ;;  %v4377_v55 = vrot.slane %v4375_v45, 5  ;;  %v4381_v11 = vrot.slane %v4379_v30, 4  ;;  %v9053_v50 = vmov 0  }
 0x324   : > { %v4364_v62 = vsel %vm9333_vm2, %v4359_v25, %v4363_v2  ;;  %v4372_v8 = vor.u32 %v4371_v51, %v4368_v16  ;;  %3112 = vst [vmem:[#allocation2] sm:$0xf] %v9053_v50  ;;  %3113 = vst [vmem:[#allocation2 + $0x4] sm:$0xf] %v9053_v50  ;;  %v4387_v20 = vrot.slane %v4385_v35, 5  ;;  %v11148_v51 = vld [vmem:[#allocation2 + $0xc0] sm:$0xff]  }
 0x325   : > { %3114 = vst [vmem:[#allocation2 + $0x8] sm:$0x1] %v9053_v50  ;;  %3116 = vst [vmem:[#allocation2 + $0xcc] sm:$0xf] %v9053_v50  ;;  %5256 = vmatmul.mubr.bf16.gmra.mrb[212].mxu0 %v11121_v9  ;;  %v11130_v18 = vcombine.low %v4354_v53, %v4364_v62  ;;  %8109 = vmatmul.mubr.bf16.gmra.mrb[124].mxu1 %v11123_v42  ;;  %v4382_v49 = vor.u32 %v4381_v11, %v4377_v55 }
 0x326   : > { %3117 = vst [vmem:[#allocation2 + $0xd0] sm:$0xf] %v9053_v50  ;;  %3118 = vst [vmem:[#allocation2 + $0xd4] sm:$0x1] %v9053_v50  ;;  %v4373_v14 = vrot.slane %v4372_v8, 4 }
 0x327   : > { %5263 = vmatprep.mubr.bf16.mxu0 %v11130_v18  ;;  %v4383_v61 = vrot.slane %v4382_v49, 4 }
 0x328   : > { %v4378_v54 = vsel %vm9333_vm2, %v4373_v14, %v4377_v55 }
 0x329   : > { %v4388_v33 = vsel %vm9333_vm2, %v4383_v61, %v4387_v20 }
 0x32a   : > { %v11138_v19 = vcombine.low %v4378_v54, %v4388_v33 }
 0x32b   : > { %v4504_v6 = vld [vmem:[#allocation2 + $0x4] sm:$0xf]  ;;  %v3122_v17 = vld [vmem:[#allocation2] sm:$0x1]  ;;  %v4503_v10 = vld [vmem:[#allocation2] sm:$0xe] }
 0x32c   : > { %v3178_v2 = vld [vmem:[#allocation2 + $0x8] sm:$0x1]  ;;  %v3123_v39 = vsel %vm10223_vm8, 0, %v3122_v17  ;;  %v3928_v34 = vld [vmem:[#allocation2 + $0x4] sm:$0xf]  ;;  %v4613_v45 = vrot.slane %v4504_v6, 5 }
 0x32d   : > { %v3179_v13 = vsel %vm10237_vm10, 0, %v3178_v2  ;;  %5264 = vmatmul.mubr.bf16.gmra.mrb[216].mxu0 %v11140_v36  ;;  %3124 = vst [vmem:[#allocation2] sm:$0x1] %v3123_v39  ;;  %v3991_v48 = vshll.u32 %v3928_v34, 16  ;;  %v3995_v16 = vshrl.u32 %v3928_v34, 16  ;;  %v6957_v1 = vrot.slane %v4503_v10, 9 }
 0x32e   : > { %3180 = vst [vmem:[#allocation2 + $0x8] sm:$0x1] %v3179_v13  ;;  %5271 = vmatprep.mubr.bf16.mxu0 %v11138_v19  ;;  %v4615_v35 = vrot.slane %v4613_v45, 4  ;;  %v8777_v2 = vld [vmem:[#allocation11 + $0x180] sm:$0xff]   ;;  %v8780_v39 = vld [vmem:[#allocation11 + $0x1c8] sm:$0xff]  }
 0x32f   : > { %v3993_v30 = vrot.slane %v3991_v48, 5  ;;  %v3997_v25 = vrot.slane %v3995_v16, 4  ;;  %v4614_v62 = vsel %vm9791_vm5, %v6957_v1, %v4613_v45  ;;  %v11890_v10 = vld [vmem:[#allocation24_spill] sm:$0xff]  ;;  %v11891_v48 = vld [vmem:[#allocation29_spill] sm:$0xff] }
 0x330   : > { %v8782_v1 = vld [vmem:[#allocation11 + $0x1d0] sm:$0xff]  }
 0x331   : > { %v3998_v55 = vor.u32 %v3997_v25, %v3993_v30  ;;  %v8781_v25 = vld [vmem:[#allocation11 + $0x188] sm:$0xff]  }
 0x333   : > { %v3999_v54 = vrot.slane %v3998_v55, 4 }
 0x334   : > { %v3927_v50 = vld [vmem:[#allocation2] sm:$0xf] }
 0x335   : > { %v4505_v11 = vld [vmem:[#allocation2 + $0x8] sm:$0x1]  ;;  %5272 = vmatmul.mubr.bf16.gmra.mrb[220].mxu0 %v11148_v51  ;;  %v3982_v14 = vshrl.u32 %v3927_v50, 16  ;;  %v3985_v61 = vshll.u32 %v3927_v50, 16  ;;  %v8779_v55 = vld [vmem:[#allocation2] sm:$0xff]   ;;  %v11893_v50 = vld [vmem:[#allocation19_spill] sm:$0xff] }
 0x336   : > { %v3929_v53 = vld [vmem:[#allocation2 + $0x8] sm:$0x1]  ;;  %v4616_v8 = vrot.slane %v4505_v11, 5 }
 0x337   : > { %v4001_v49 = vshll.u32 %v3929_v53, 16  ;;  %v3984_v13 = vrot.slane %v3982_v14, 4  ;;  %v3987_v6 = vrot.slane %v3985_v61, 5  ;;  %v8783_v53 = vld [vmem:[#allocation11 + $0x190] sm:$0xff]   ;;  %v8786_v14 = vld [vmem:[#allocation11 + $0x1e0] sm:$0xff]   ;;  %v8788_v61 = vld [vmem:[#allocation11 + $0x1e8] sm:$0xff]  }
 0x338   : > { %v4617_v20 = vsel %vm9791_vm5, %v4615_v35, %v4616_v8  ;;  %v11892_v8 = vld [vmem:[#allocation25_spill] sm:$0xff] }
 0x339   : > { %v6975_v33 = vcombine.low %v4614_v62, %v4617_v20  ;;  %v4003_v17 = vrot.slane %v4001_v49, 5  ;;  %v3988_v34 = vor.u32 %v3987_v6, %v3984_v13  ;;  %v8784_v62 = vld [vmem:[#allocation11 + $0x1d8] sm:$0xff]   ;;  %v8819_v20 = vld [vmem:[#allocation2 + $0xc] sm:$0xff]   ;;  %v8791_v13 = vld [vmem:[#allocation11 + $0x1b0] sm:$0xff]  }
 0x33a   : > { %v8785_v49 = vld [vmem:[#allocation11 + $0x198] sm:$0xff]  }
 0x33b   : > { %8128 = vmatprep.mubr.bf16.mxu1 %v6975_v33  ;;  %v3989_v16 = vrot.slane %v3988_v34, 4  ;;  %v4004_v45 = vsel %vm9333_vm2, %v3999_v54, %v4003_v17  ;;  %v11894_v54 = vld [vmem:[#allocation32_spill] sm:$0xff]  ;;  %v8792_v6 = vld [vmem:[#allocation11 + $0x1f8] sm:$0xff]  }
 0x33c   : > { %8129 = vmatmul.mubr.bf16.vlgmr.msra.gmra.mrb[96].mxu1 %v11890_v10  ;;  %v8789_v33 = vld [vmem:[#allocation11 + $0x1a8] sm:$0xff]   ;;  %v8793_v34 = vld [vmem:[#allocation11 + $0x1b8] sm:$0xff]   ;;  %v8794_v10 = vld [vmem:[#allocation11 + $0x200] sm:$0xff]  }
 0x33d   : > { %8132 = vmatprep.mubr.bf16.mxu1 %v11891_v48  ;;  %7785 = vmatpush3.bf16.msra.mxu1 %v8777_v2  ;;  %v3994_v35 = vsel %vm9333_vm2, %v3989_v16, %v3993_v30  ;;  %v8787_v30 = vld [vmem:[#allocation11 + $0x1a0] sm:$0xff]   ;;  %v8790_v2 = vld [vmem:[#allocation11 + $0x1f0] sm:$0xff]  }
 0x33e   : > { %7786 = vmatprep.subr.bf16.mxu1 %v8780_v39  ;;  %v6939_v11 = vcombine.low %v3994_v35, %v4004_v45  ;;  %v8820_v17 = vld [vmem:[#allocation2 + $0x18] sm:$0xff]   ;;  %v11895_v39 = vld [vmem:[#allocation35_spill] sm:$0xff]  ;;  %v8821_v16 = vld [vmem:[#allocation2 + $0x24] sm:$0xff]  }
 0x340   : > { %5617 = vmatprep.mubr.bf16.mxu0 %v6939_v11 }
 0x341   : > { %7787 = vmatpush3.bf16.msra.mxu1 %v8781_v25  ;;  %5618 = vmatmul.mubr.bf16.vlgmr.msra.gmra.mrb[224].mxu0 %v8779_v55  ;;  %v3173_v25 = vld [vmem:[#allocation2 + $0xcc] sm:$0x1] }
 0x342   : > { %7788 = vmatprep.subr.bf16.mxu1 %v8782_v1  ;;  %5625 = vmatprep.mubr.bf16.mxu0 %v11892_v8  ;;  %v3174_v35 = vsel %vm10223_vm8, 0, %v3173_v25 }
 0x343   : > { %3175 = vst [vmem:[#allocation2 + $0xcc] sm:$0x1] %v3174_v35 }
 0x344   : > { %8133 = vmatmul.mubr.bf16.gmra.mrb[100].mxu1 %v10689_v52 }
 0x345   : > { %8136 = vmatprep.mubr.bf16.mxu1 %v11893_v50  ;;  %7789 = vmatpush3.bf16.msra.mxu1 %v8783_v53  ;;  %v8822_v53 = vld [vmem:[#allocation2 + $0x30] sm:$0xff]  }
 0x346   : > { %7790 = vmatprep.subr.bf16.mxu1 %v8784_v62 }
 0x349   : > { %7791 = vmatpush3.bf16.msra.mxu1 %v8785_v49  ;;  %5626 = vmatmul.mubr.bf16.gmra.mrb[228].mxu0 %v8819_v20  ;;  %v3229_v49 = vld [vmem:[#allocation2 + $0xd4] sm:$0x1] }
 0x34a   : > { %7792 = vmatprep.subr.bf16.mxu1 %v8786_v14  ;;  %5633 = vmatprep.mubr.bf16.mxu0 %v11894_v54  ;;  %v3230_v0 = vsel %vm10237_vm10, 0, %v3229_v49  ;;  %v11184_v14 = vld [vmem:[#allocation2 + $0x3c] sm:$0xff]  }
 0x34b   : > { %3231 = vst [vmem:[#allocation2 + $0xd4] sm:$0x1] %v3230_v0  ;;  %v8797_v49 = vld [vmem:[#allocation11 + $0x218] sm:$0xff]  }
 0x34c   : > { %8137 = vmatmul.mubr.bf16.gmra.mrb[104].mxu1 %v10786_v41  ;;  %v8826_v0 = vld [vmem:[#allocation2 + $0x60] sm:$0xff]  }
 0x34d   : > { %8140 = vmatprep.mubr.bf16.mxu1 %v10829_v44  ;;  %7793 = vmatpush3.bf16.msra.mxu1 %v8787_v30 }
 0x34e   : > { %7794 = vmatprep.subr.bf16.mxu1 %v8788_v61 }
 0x351   : > { %7795 = vmatpush3.bf16.msra.mxu1 %v8789_v33  ;;  %5634 = vmatmul.mubr.bf16.gmra.mrb[232].mxu0 %v8820_v17 }
 0x352   : > { %7796 = vmatprep.subr.bf16.mxu1 %v8790_v2  ;;  %5641 = vmatprep.mubr.bf16.mxu0 %v11895_v39 }
 0x354   : > { %8141 = vmatmul.mubr.bf16.gmra.mrb[108].mxu1 %v10878_v15 }
 0x355   : > { %8144 = vmatprep.mubr.bf16.mxu1 %v10910_v40  ;;  %7797 = vmatpush3.bf16.msra.mxu1 %v8791_v13 }
 0x356   : > { %7798 = vmatprep.subr.bf16.mxu1 %v8792_v6  ;;  %v8795_v6 = vld [vmem:[#allocation11 + $0x208] sm:$0xff]  }
 0x359   : > { %7799 = vmatpush3.bf16.msra.mxu1 %v8793_v34  ;;  %5642 = vmatmul.mubr.bf16.gmra.mrb[236].mxu0 %v8821_v16 }
 0x35a   : > { %8160 = vmatprep.subr.bf16.mxu1 %v8794_v10  ;;  %5649 = vmatprep.mubr.bf16.mxu0 %v10775_v37 }
 0x35c   : > { %8145 = vmatmul.mubr.bf16.gmra.mrb[112].mxu1 %v10943_v58 }
 0x35d   : > { %8148 = vmatprep.mubr.bf16.mxu1 %v10983_v4  ;;  %v7528_v45 = vpop.f32.mrb[160].mxu0 }
 0x35e   : > { %v7529_v1 = vpop.f32.mrb[161].mxu0 }
 0x35f   : > { %v11175_v55 = vadd.f32 %v7529_v1, %v7528_v45  ;;  %v7531_v11 = vpop.f32.mrb[162].mxu0  ;;  %v11200_v45 = vld [vmem:[#allocation2 + $0x54] sm:$0xff]  }
 0x360   : > { %v7532_v62 = vpop.f32.mrb[163].mxu0 }
 0x361   : > { %5650 = vmatmul.mubr.bf16.gmra.mrb[240].mxu0 %v8822_v53  ;;  %v11179_v8 = vadd.f32 %v7532_v62, %v7531_v11  ;;  %v8796_v62 = vld [vmem:[#allocation11 + $0x210] sm:$0xff]  }
 0x362   : > { %5657 = vmatprep.mubr.bf16.mxu0 %v10823_v12 }
 0x364   : > { %8149 = vmatmul.mubr.bf16.gmra.mrb[116].mxu1 %v11025_v38 }
 0x365   : > { %8152 = vmatprep.mubr.bf16.mxu1 %v11058_v22 }
 0x369   : > { %5658 = vmatmul.mubr.bf16.gmra.mrb[244].mxu0 %v11184_v14 }
 0x36a   : > { %5665 = vmatprep.mubr.bf16.mxu0 %v10861_v23 }
 0x36c   : > { %8153 = vmatmul.mubr.bf16.gmra.mrb[120].mxu1 %v11077_v31  ;;  %v7534_v30 = vpop.f32.mrb[164].mxu0 }
 0x36d   : > { %8156 = vmatprep.mubr.bf16.mxu1 %v11092_v46  ;;  %v7535_v61 = vpop.f32.mrb[165].mxu0 }
 0x36e   : > { %v11190_v20 = vadd.f32 %v7535_v61, %v7534_v30  ;;  %v7537_v33 = vpop.f32.mrb[166].mxu0 }
 0x36f   : > { %v7538_v2 = vpop.f32.mrb[167].mxu0 }
 0x370   : > { %v11192_v13 = vadd.f32 %v7538_v2, %v7537_v33 }
 0x371   : > { %5666 = vmatmul.mubr.bf16.gmra.mrb[248].mxu0 %v11194_v21 }
 0x372   : > { %5673 = vmatprep.mubr.bf16.mxu0 %v10913_v32 }
 0x374   : > { %8157 = vmatmul.mubr.bf16.gmra.mrb[124].mxu1 %v11109_v43 }
 0x375   : > { %6180 = vmatprep.mubr.bf16.mxu1 %v11894_v54 }
 0x377   : > { %v7540_v34 = vpop.f32.mrb[168].mxu0 }
 0x378   : > { %v7541_v25 = vpop.f32.mrb[169].mxu0 }
 0x379   : > { %5674 = vmatmul.mubr.bf16.gmra.mrb[252].mxu0 %v11200_v45  ;;  %v11204_v1 = vadd.f32 %v7541_v25, %v7540_v34  ;;  %v7543_v35 = vpop.f32.mrb[170].mxu0  ;;  %v8801_v34 = vld [vmem:[#allocation11 + $0x238] sm:$0xff]  }
 0x37a   : > { %5681 = vmatprep.mubr.bf16.mxu0 %v10941_v26  ;;  %v7544_v11 = vpop.f32.mrb[171].mxu0 }
 0x37b   : > { %v11207_v54 = vadd.f32 %v7544_v11, %v7543_v35 }
 0x37c   : > { %6181 = vmatmul.mubr.bf16.vlgmr.msra.gmra.mrb[128].mxu1 %v8820_v17 }
 0x37d   : > { %6188 = vmatprep.mubr.bf16.mxu1 %v11895_v39  ;;  %8161 = vmatpush3.bf16.msra.mxu1 %v8794_v10  ;;  %v8798_v39 = vld [vmem:[#allocation11 + $0x220] sm:$0xff]  }
 0x37e   : > { %8162 = vmatprep.subr.bf16.mxu1 %v8795_v6 }
 0x381   : > { %8163 = vmatpush3.bf16.msra.mxu1 %v8795_v6  ;;  %5682 = vmatmul.mubr.bf16.gmra.mrb[0].mxu0 %v8826_v0  ;;  %v8799_v6 = vld [vmem:[#allocation11 + $0x228] sm:$0xff]  }
 0x382   : > { %8164 = vmatprep.subr.bf16.mxu1 %v8796_v62  ;;  %5689 = vmatprep.mubr.bf16.mxu0 %v10971_v59 }
 0x384   : > { %6189 = vmatmul.mubr.bf16.gmra.mrb[132].mxu1 %v8821_v16  ;;  %v7546_v17 = vpop.f32.mrb[172].mxu0 }
 0x385   : > { %6196 = vmatprep.mubr.bf16.mxu1 %v10775_v37  ;;  %8165 = vmatpush3.bf16.msra.mxu1 %v8796_v62  ;;  %v7547_v10 = vpop.f32.mrb[173].mxu0  ;;  %v8800_v37 = vld [vmem:[#allocation11 + $0x230] sm:$0xff]  }
 0x386   : > { %8166 = vmatprep.subr.bf16.mxu1 %v8797_v49  ;;  %v11211_v30 = vadd.f32 %v7547_v10, %v7546_v17  ;;  %v7549_v61 = vpop.f32.mrb[174].mxu0 }
 0x387   : > { %v7550_v33 = vpop.f32.mrb[175].mxu0 }
 0x388   : > { %v11213_v2 = vadd.f32 %v7550_v33, %v7549_v61 }
 0x389   : > { %8167 = vmatpush3.bf16.msra.mxu1 %v8797_v49  ;;  %5690 = vmatmul.mubr.bf16.gmra.mrb[4].mxu0 %v10981_v7 }
 0x38a   : > { %8168 = vmatprep.subr.bf16.mxu1 %v8798_v39  ;;  %5697 = vmatprep.mubr.bf16.mxu0 %v11019_v63 }
 0x38c   : > { %6197 = vmatmul.mubr.bf16.gmra.mrb[136].mxu1 %v8822_v53 }
 0x38d   : > { %6204 = vmatprep.mubr.bf16.mxu1 %v10823_v12  ;;  %8169 = vmatpush3.bf16.msra.mxu1 %v8798_v39 }
 0x38e   : > { %8170 = vmatprep.subr.bf16.mxu1 %v8799_v6 }
 0x391   : > { %8171 = vmatpush3.bf16.msra.mxu1 %v8799_v6  ;;  %v7552_v16 = vpop.f32.mrb[176].mxu0  ;;  %5698 = vmatmul.mubr.bf16.gmra.mrb[8].mxu0 %v11023_v47 }
 0x392   : > { %8172 = vmatprep.subr.bf16.mxu1 %v8800_v37  ;;  %v7553_v25 = vpop.f32.mrb[177].mxu0  ;;  %5705 = vmatprep.mubr.bf16.mxu0 %v11052_v28 }
 0x393   : > { %v11221_v7 = vadd.f32 %v7553_v25, %v7552_v16  ;;  %v7555_v35 = vpop.f32.mrb[178].mxu0 }
 0x394   : > { %6205 = vmatmul.mubr.bf16.gmra.mrb[140].mxu1 %v11184_v14  ;;  %v7556_v12 = vpop.f32.mrb[179].mxu0 }
 0x395   : > { %6212 = vmatprep.mubr.bf16.mxu1 %v10861_v23  ;;  %8173 = vmatpush3.bf16.msra.mxu1 %v8800_v37  ;;  %v11224_v53 = vadd.f32 %v7556_v12, %v7555_v35 }
 0x396   : > { %8174 = vmatprep.subr.bf16.mxu1 %v8801_v34 }
 0x399   : > { %8175 = vmatpush3.bf16.msra.mxu1 %v8801_v34  ;;  %5706 = vmatmul.mubr.bf16.gmra.mrb[12].mxu0 %v11056_v56 }
 0x39a   : > { %5713 = vmatprep.mubr.bf16.mxu0 %v11079_v60 }
 0x39c   : > { %6213 = vmatmul.mubr.bf16.gmra.mrb[144].mxu1 %v11194_v21  ;;  %v7558_v14 = vpop.f32.mrb[180].mxu0 }
 0x39d   : > { %6220 = vmatprep.mubr.bf16.mxu1 %v10913_v32  ;;  %v7559_v11 = vpop.f32.mrb[181].mxu0 }
 0x39e   : > { %v11230_v62 = vadd.f32 %v7559_v11, %v7558_v14  ;;  %v7561_v49 = vpop.f32.mrb[182].mxu0 }
 0x39f   : > { %v7562_v23 = vpop.f32.mrb[183].mxu0 }
 0x3a0   : > { %v11232_v17 = vadd.f32 %v7562_v23, %v7561_v49  ;;  %v3978_v23 = vld [vmem:[#allocation2 + $0xcc] sm:$0xf] }
 0x3a1   : > { %5714 = vmatmul.mubr.bf16.gmra.mrb[16].mxu0 %v11081_v29 }
 0x3a2   : > { %5721 = vmatprep.mubr.bf16.mxu0 %v11097_v24 }
 0x3a4   : > { %6221 = vmatmul.mubr.bf16.gmra.mrb[148].mxu1 %v11200_v45 }
 0x3a5   : > { %6228 = vmatprep.mubr.bf16.mxu1 %v10941_v26  ;;  %v8827_v26 = vld [vmem:[#allocation2 + $0x6c] sm:$0xff]  }
 0x3a9   : > { %5722 = vmatmul.mubr.bf16.gmra.mrb[20].mxu0 %v11099_v5 }
 0x3aa   : > { %5729 = vmatprep.mubr.bf16.mxu0 %v11113_v27  ;;  %v7564_v32 = vpop.f32.mrb[184].mxu0 }
 0x3ab   : > { %v7565_v21 = vpop.f32.mrb[185].mxu0 }
 0x3ac   : > { %6229 = vmatmul.mubr.bf16.gmra.mrb[152].mxu1 %v8826_v0  ;;  %v11241_v39 = vadd.f32 %v7565_v21, %v7564_v32  ;;  %v7567_v10 = vpop.f32.mrb[186].mxu0  ;;  %v4390_v21 = vshrl.u32 %v3978_v23, 16 }
 0x3ad   : > { %6236 = vmatprep.mubr.bf16.mxu1 %v10971_v59  ;;  %v7568_v61 = vpop.f32.mrb[187].mxu0 }
 0x3ae   : > { %v11243_v33 = vadd.f32 %v7568_v61, %v7567_v10  ;;  %v4393_v10 = vshll.u32 %v3978_v23, 16 }
 0x3b1   : > { %5730 = vmatmul.mubr.bf16.gmra.mrb[24].mxu0 %v11121_v9 }
 0x3b2   : > { %5737 = vmatprep.mubr.bf16.mxu0 %v11130_v18 }
 0x3b4   : > { %6237 = vmatmul.mubr.bf16.gmra.mrb[156].mxu1 %v8827_v26  ;;  %v4392_v26 = vrot.slane %v4390_v21, 4 }
 0x3b5   : > { %6244 = vmatprep.mubr.bf16.mxu1 %v11019_v63  ;;  %v7570_v45 = vpop.f32.mrb[188].mxu0 }
 0x3b6   : > { %v7571_v0 = vpop.f32.mrb[189].mxu0 }
 0x3b7   : > { %v11248_v6 = vadd.f32 %v7571_v0, %v7570_v45  ;;  %v7573_v59 = vpop.f32.mrb[190].mxu0 }
 0x3b8   : > { %v7574_v37 = vpop.f32.mrb[191].mxu0 }
 0x3b9   : > { %5738 = vmatmul.mubr.bf16.gmra.mrb[28].mxu0 %v11140_v36  ;;  %v11251_v16 = vadd.f32 %v7574_v37, %v7573_v59  ;;  %v3980_v59 = vld [vmem:[#allocation2 + $0xd4] sm:$0x1] }
 0x3bc   : > { %6245 = vmatmul.mubr.bf16.gmra.mrb[160].mxu1 %v11023_v47 }
 0x3bd   : > { %6252 = vmatprep.mubr.bf16.mxu1 %v11052_v28 }
 0x3c1   : > { %v7576_v34 = vpop.f32.mrb[192].mxu0 }
 0x3c2   : > { %v7577_v25 = vpop.f32.mrb[193].mxu0 }
 0x3c3   : > { %v11257_v63 = vadd.f32 %v7577_v25, %v7576_v34  ;;  %v7579_v35 = vpop.f32.mrb[194].mxu0 }
 0x3c4   : > { %6253 = vmatmul.mubr.bf16.gmra.mrb[164].mxu1 %v11056_v56  ;;  %v7580_v12 = vpop.f32.mrb[195].mxu0  ;;  %v3979_v56 = vld [vmem:[#allocation2 + $0xd0] sm:$0xf] }
 0x3c5   : > { %6260 = vmatprep.mubr.bf16.mxu1 %v11079_v60  ;;  %v11259_v14 = vadd.f32 %v7580_v12, %v7579_v35  ;;  %v4399_v61 = vshll.u32 %v3979_v56, 16 }
 0x3c7   : > { %v4401_v45 = vrot.slane %v4399_v61, 5 }
 0x3cc   : > { %6261 = vmatmul.mubr.bf16.gmra.mrb[168].mxu1 %v11081_v29  ;;  %v4403_v29 = vshrl.u32 %v3979_v56, 16 }
 0x3cd   : > { %6268 = vmatprep.mubr.bf16.mxu1 %v11097_v24  ;;  %v4395_v24 = vrot.slane %v4393_v10, 5 }
 0x3ce   : > { %v4405_v0 = vrot.slane %v4403_v29, 4 }
 0x3cf   : > { %v7582_v11 = vpop.f32.mrb[196].mxu0  ;;  %v4396_v34 = vor.u32 %v4395_v24, %v4392_v26 }
 0x3d0   : > { %v7583_v47 = vpop.f32.mrb[197].mxu0  ;;  %v4406_v25 = vor.u32 %v4405_v0, %v4401_v45 }
 0x3d1   : > { %v11263_v49 = vadd.f32 %v7583_v47, %v7582_v11  ;;  %v7585_v28 = vpop.f32.mrb[198].mxu0 }
 0x3d2   : > { %v7586_v60 = vpop.f32.mrb[199].mxu0  ;;  %v4407_v23 = vrot.slane %v4406_v25, 4 }
 0x3d3   : > { %v11267_v32 = vadd.f32 %v7586_v60, %v7585_v28  ;;  %v4397_v28 = vrot.slane %v4396_v34, 4 }
 0x3d4   : > { %6269 = vmatmul.mubr.bf16.gmra.mrb[172].mxu1 %v11099_v5 }
 0x3d5   : > { %6276 = vmatprep.mubr.bf16.mxu1 %v11113_v27  ;;  %v4409_v27 = vshll.u32 %v3980_v59, 16 }
 0x3d7   : > { %v4411_v56 = vrot.slane %v4409_v27, 5 }
 0x3db   : > { %v7588_v37 = vpop.f32.mrb[200].mxu0 }
 0x3dc   : > { %6277 = vmatmul.mubr.bf16.gmra.mrb[176].mxu1 %v11121_v9  ;;  %v7589_v5 = vpop.f32.mrb[201].mxu0  ;;  %v4402_v9 = vsel %vm9333_vm2, %v4397_v28, %v4401_v45 }
 0x3dd   : > { %6284 = vmatprep.mubr.bf16.mxu1 %v11130_v18  ;;  %v11271_v35 = vadd.f32 %v7589_v5, %v7588_v37  ;;  %v7591_v12 = vpop.f32.mrb[202].mxu0  ;;  %v4412_v18 = vsel %vm9333_vm2, %v4407_v23, %v4411_v56 }
 0x3de   : > { %v7592_v11 = vpop.f32.mrb[203].mxu0  ;;  %v6956_v10 = vcombine.low %v4402_v9, %v4412_v18 }
 0x3df   : > { %v11273_v47 = vadd.f32 %v7592_v11, %v7591_v12 }
 0x3e4   : > { %6285 = vmatmul.mubr.bf16.gmra.mrb[180].mxu1 %v11140_v36  ;;  %v8802_v36 = vld [vmem:[#allocation2 + $0xcc] sm:$0xff]  }
 0x3e5   : > { %6292 = vmatprep.mubr.bf16.mxu1 %v11138_v19 }
 0x3e6   : > { %v7594_v60 = vpop.f32.mrb[204].mxu0 }
 0x3e7   : > { %v7595_v21 = vpop.f32.mrb[205].mxu0 }
 0x3e8   : > { %v11281_v61 = vadd.f32 %v7595_v21, %v7594_v60  ;;  %v7597_v29 = vpop.f32.mrb[206].mxu0 }
 0x3e9   : > { %v7598_v26 = vpop.f32.mrb[207].mxu0 }
 0x3ea   : > { %v11284_v24 = vadd.f32 %v7598_v26, %v7597_v29 }
 0x3ec   : > { %6293 = vmatmul.mubr.bf16.gmra.mrb[184].mxu1 %v11148_v51 }
 0x3ed   : > { %6300 = vmatprep.mubr.bf16.mxu1 %v6956_v10 }
 0x3f0   : > { %v7600_v19 = vpop.f32.mrb[208].mxu0 }
 0x3f1   : > { %v7601_v0 = vpop.f32.mrb[209].mxu0 }
 0x3f2   : > { %v11286_v59 = vadd.f32 %v7601_v0, %v7600_v19  ;;  %v7603_v45 = vpop.f32.mrb[210].mxu0 }
 0x3f3   : > { %v7604_v3 = vpop.f32.mrb[211].mxu0 }
 0x3f4   : > { %6301 = vmatmul.mubr.bf16.gmra.mrb[188].mxu1 %v8802_v36  ;;  %v11289_v37 = vadd.f32 %v7604_v3, %v7603_v45 }
 0x3f5   : > { %8176 = vmatprep.mubr.bf16.mxu1 %v11891_v48 }
 0x3f8   : > { %v7606_v5 = vpop.f32.mrb[212].mxu0 }
 0x3f9   : > { %v7607_v34 = vpop.f32.mrb[213].mxu0 }
 0x3fa   : > { %v11291_v25 = vadd.f32 %v7607_v34, %v7606_v5  ;;  %v7609_v51 = vpop.f32.mrb[214].mxu0 }
 0x3fb   : > { %v7610_v27 = vpop.f32.mrb[215].mxu0 }
 0x3fc   : > { %8177 = vmatmul.mubr.bf16.vlgmr.msra.gmra.mrb[96].mxu1 %v10689_v52  ;;  %v11295_v12 = vadd.f32 %v7610_v27, %v7609_v51  ;;  %v4555_v51 = vld [vmem:[#allocation2 + $0xd0] sm:$0xf]  ;;  %v4556_v27 = vld [vmem:[#allocation2 + $0xd4] sm:$0x1] }
 0x3fd   : > { %8180 = vmatprep.mubr.bf16.mxu1 %v11893_v50 }
 0x400   : > { %v7612_v11 = vpop.f32.mrb[216].mxu0 }
 0x401   : > { %v7613_v28 = vpop.f32.mrb[217].mxu0 }
 0x402   : > { %v11297_v23 = vadd.f32 %v7613_v28, %v7612_v11  ;;  %v7615_v56 = vpop.f32.mrb[218].mxu0 }
 0x403   : > { %v7616_v48 = vpop.f32.mrb[219].mxu0 }
 0x404   : > { %8181 = vmatmul.mubr.bf16.gmra.mrb[100].mxu1 %v10786_v41  ;;  %v11301_v9 = vadd.f32 %v7616_v48, %v7615_v56 }
 0x405   : > { %8184 = vmatprep.mubr.bf16.mxu1 %v10829_v44 }
 0x408   : > { %v7618_v18 = vpop.f32.mrb[220].mxu0 }
 0x409   : > { %v7619_v60 = vpop.f32.mrb[221].mxu0 }
 0x40a   : > { %v11303_v52 = vadd.f32 %v7619_v60, %v7618_v18  ;;  %v7621_v21 = vpop.f32.mrb[222].mxu0  ;;  %v4735_v60 = vrot.slane %v4556_v27, 5 }
 0x40b   : > { %v7622_v50 = vpop.f32.mrb[223].mxu0 }
 0x40c   : > { %8185 = vmatmul.mubr.bf16.gmra.mrb[104].mxu1 %v10878_v15  ;;  %v11307_v10 = vadd.f32 %v7622_v50, %v7621_v21 }
 0x40d   : > { %8188 = vmatprep.mubr.bf16.mxu1 %v10910_v40 }
 0x414   : > { %8189 = vmatmul.mubr.bf16.gmra.mrb[108].mxu1 %v10943_v58  ;;  %v7664_v41 = vpop.f32.mrb[224].mxu0 }
 0x415   : > { %8192 = vmatprep.mubr.bf16.mxu1 %v10983_v4  ;;  %v7665_v44 = vpop.f32.mrb[225].mxu0 }
 0x416   : > { %v7666_v29 = vadd.f32 %v7665_v44, %v7664_v41  ;;  %v7667_v26 = vpop.f32.mrb[226].mxu0 }
 0x417   : > { %v7668_v36 = vpop.f32.mrb[227].mxu0 }
 0x418   : > { %v11312_v19 = vadd.f32 %v7666_v29, %v11175_v55  ;;  %v7669_v0 = vadd.f32 %v7668_v36, %v7667_v26 }
 0x41a   : > { %v11315_v15 = vadd.f32 %v7669_v0, %v11179_v8 }
 0x41c   : > { %8193 = vmatmul.mubr.bf16.gmra.mrb[112].mxu1 %v11025_v38  ;;  %v7670_v40 = vpop.f32.mrb[228].mxu0  ;;  %v4732_v38 = vrot.slane %v4555_v51, 5 }
 0x41d   : > { %8196 = vmatprep.mubr.bf16.mxu1 %v11058_v22  ;;  %v7671_v58 = vpop.f32.mrb[229].mxu0  ;;  %v4554_v22 = vld [vmem:[#allocation2 + $0xcc] sm:$0xe] }
 0x41e   : > { %v7672_v45 = vadd.f32 %v7671_v58, %v7670_v40  ;;  %v7673_v4 = vpop.f32.mrb[230].mxu0  ;;  %v6974_v18 = vrot.slane %v4554_v22, 9 }
 0x41f   : > { %v7674_v3 = vpop.f32.mrb[231].mxu0 }
 0x420   : > { %v11320_v5 = vadd.f32 %v7672_v45, %v11190_v20  ;;  %v7675_v34 = vadd.f32 %v7674_v3, %v7673_v4  ;;  %v4734_v20 = vrot.slane %v4732_v38, 4 }
 0x422   : > { %v11323_v55 = vadd.f32 %v7675_v34, %v11192_v13 }
 0x424   : > { %8197 = vmatmul.mubr.bf16.gmra.mrb[116].mxu1 %v11077_v31  ;;  %v7676_v8 = vpop.f32.mrb[232].mxu0  ;;  %v4733_v31 = vsel %vm9791_vm5, %v6974_v18, %v4732_v38 }
 0x425   : > { %8200 = vmatprep.mubr.bf16.mxu1 %v11092_v46  ;;  %v7677_v11 = vpop.f32.mrb[233].mxu0  ;;  %v4736_v46 = vsel %vm9791_vm5, %v4734_v20, %v4735_v60 }
 0x426   : > { %v7678_v28 = vadd.f32 %v7677_v11, %v7676_v8  ;;  %v7679_v56 = vpop.f32.mrb[234].mxu0 }
 0x427   : > { %v7680_v48 = vpop.f32.mrb[235].mxu0 }
 0x428   : > { %v11328_v21 = vadd.f32 %v7678_v28, %v11204_v1  ;;  %v7681_v13 = vadd.f32 %v7680_v48, %v7679_v56  ;;  %v6992_v1 = vcombine.low %v4733_v31, %v4736_v46 }
 0x42a   : > { %v11331_v50 = vadd.f32 %v7681_v13, %v11207_v54 }
 0x42c   : > { %8201 = vmatmul.mubr.bf16.gmra.mrb[120].mxu1 %v11109_v43  ;;  %v7682_v41 = vpop.f32.mrb[236].mxu0 }
 0x42d   : > { %8204 = vmatprep.mubr.bf16.mxu1 %v11123_v42  ;;  %v7683_v44 = vpop.f32.mrb[237].mxu0 }
 0x42e   : > { %v7684_v29 = vadd.f32 %v7683_v44, %v7682_v41  ;;  %v7685_v26 = vpop.f32.mrb[238].mxu0 }
 0x42f   : > { %v7686_v36 = vpop.f32.mrb[239].mxu0 }
 0x430   : > { %v11340_v0 = vadd.f32 %v7684_v29, %v11211_v30  ;;  %v7687_v54 = vadd.f32 %v7686_v36, %v7685_v26 }
 0x432   : > { %v11343_v43 = vadd.f32 %v7687_v54, %v11213_v2 }
 0x434   : > { %8205 = vmatmul.mubr.bf16.gmra.mrb[124].mxu1 %v6992_v1  ;;  %v7688_v42 = vpop.f32.mrb[240].mxu0 }
 0x435   : > { %v7689_v40 = vpop.f32.mrb[241].mxu0 }
 0x436   : > { %v7690_v58 = vadd.f32 %v7689_v40, %v7688_v42  ;;  %v7691_v45 = vpop.f32.mrb[242].mxu0 }
 0x437   : > { %v7692_v57 = vpop.f32.mrb[243].mxu0 }
 0x438   : > { %v11346_v4 = vadd.f32 %v7690_v58, %v11221_v7  ;;  %v7693_v3 = vadd.f32 %v7692_v57, %v7691_v45 }
 0x43a   : > { %v11349_v34 = vadd.f32 %v7693_v3, %v11224_v53 }
 0x43c   : > { %v7694_v51 = vpop.f32.mrb[244].mxu0 }
 0x43d   : > { %v7695_v30 = vpop.f32.mrb[245].mxu0 }
 0x43e   : > { %v7696_v38 = vadd.f32 %v7695_v30, %v7694_v51  ;;  %v7697_v8 = vpop.f32.mrb[246].mxu0 }
 0x43f   : > { %v7698_v22 = vpop.f32.mrb[247].mxu0 }
 0x440   : > { %v11352_v2 = vadd.f32 %v7696_v38, %v11230_v62  ;;  %v7699_v27 = vadd.f32 %v7698_v22, %v7697_v8 }
 0x442   : > { %v11355_v11 = vadd.f32 %v7699_v27, %v11232_v17 }
 0x444   : > { %v7700_v28 = vpop.f32.mrb[248].mxu0 }
 0x445   : > { %v7701_v56 = vpop.f32.mrb[249].mxu0 }
 0x446   : > { %v7702_v7 = vadd.f32 %v7701_v56, %v7700_v28  ;;  %v7703_v48 = vpop.f32.mrb[250].mxu0 }
 0x447   : > { %v7704_v18 = vpop.f32.mrb[251].mxu0 }
 0x448   : > { %v11358_v53 = vadd.f32 %v7702_v7, %v11241_v39  ;;  %v7705_v20 = vadd.f32 %v7704_v18, %v7703_v48 }
 0x44a   : > { %v11361_v60 = vadd.f32 %v7705_v20, %v11243_v33 }
 0x44c   : > { %v7706_v13 = vpop.f32.mrb[252].mxu0 }
 0x44d   : > { %v7707_v31 = vpop.f32.mrb[253].mxu0 }
 0x44e   : > { %v7708_v46 = vadd.f32 %v7707_v31, %v7706_v13  ;;  %v7709_v41 = vpop.f32.mrb[254].mxu0 }
 0x44f   : > { %v7800_v62 = vpop.f32.mrb[128].mxu1  ;;  %v7710_v17 = vpop.f32.mrb[255].mxu0 }
 0x450   : > { %v7801_v44 = vpop.f32.mrb[129].mxu1  ;;  %v11364_v1 = vadd.f32 %v7708_v46, %v11248_v6  ;;  %v7711_v36 = vadd.f32 %v7710_v17, %v7709_v41 }
 0x451   : > { %v7802_v29 = vadd.f32 %v7801_v44, %v7800_v62  ;;  %v7803_v26 = vpop.f32.mrb[130].mxu1 }
 0x452   : > { %v7804_v54 = vpop.f32.mrb[131].mxu1  ;;  %v11370_v33 = vadd.f32 %v7711_v36, %v11251_v16 }
 0x453   : > { %v7805_v39 = vadd.f32 %v7804_v54, %v7803_v26  ;;  %v11367_v42 = vadd.f32 %v11312_v19, %v7802_v29 }
 0x454   : > { %v7712_v58 = vpop.f32.mrb[0].mxu0 }
 0x455   : > { %v11373_v40 = vadd.f32 %v11315_v15, %v7805_v39  ;;  %v7713_v45 = vpop.f32.mrb[1].mxu0 }
 0x456   : > { %v7714_v3 = vadd.f32 %v7713_v45, %v7712_v58  ;;  %v7715_v51 = vpop.f32.mrb[2].mxu0 }
 0x457   : > { %v7806_v57 = vpop.f32.mrb[132].mxu1  ;;  %v7716_v6 = vpop.f32.mrb[3].mxu0 }
 0x458   : > { %v7807_v30 = vpop.f32.mrb[133].mxu1  ;;  %v11376_v22 = vadd.f32 %v7714_v3, %v11257_v63  ;;  %v7717_v19 = vadd.f32 %v7716_v6, %v7715_v51 }
 0x459   : > { %v7808_v38 = vadd.f32 %v7807_v30, %v7806_v57  ;;  %v7809_v8 = vpop.f32.mrb[134].mxu1 }
 0x45a   : > { %v7810_v27 = vpop.f32.mrb[135].mxu1  ;;  %v11382_v15 = vadd.f32 %v7717_v19, %v11259_v14 }
 0x45b   : > { %v7811_v28 = vadd.f32 %v7810_v27, %v7809_v8  ;;  %v11379_v16 = vadd.f32 %v11320_v5, %v7808_v38 }
 0x45c   : > { %v7718_v7 = vpop.f32.mrb[4].mxu0 }
 0x45d   : > { %v11385_v56 = vadd.f32 %v11323_v55, %v7811_v28  ;;  %v7719_v48 = vpop.f32.mrb[5].mxu0 }
 0x45e   : > { %v7720_v20 = vadd.f32 %v7719_v48, %v7718_v7  ;;  %v7721_v13 = vpop.f32.mrb[6].mxu0 }
 0x45f   : > { %v7812_v18 = vpop.f32.mrb[136].mxu1  ;;  %v7722_v63 = vpop.f32.mrb[7].mxu0 }
 0x460   : > { %v7813_v31 = vpop.f32.mrb[137].mxu1  ;;  %v11388_v41 = vadd.f32 %v7720_v20, %v11263_v49  ;;  %v7723_v5 = vadd.f32 %v7722_v63, %v7721_v13 }
 0x461   : > { %v7814_v62 = vadd.f32 %v7813_v31, %v7812_v18  ;;  %v7815_v46 = vpop.f32.mrb[138].mxu1 }
 0x462   : > { %v7816_v44 = vpop.f32.mrb[139].mxu1  ;;  %v11394_v55 = vadd.f32 %v7723_v5, %v11267_v32 }
 0x463   : > { %v7817_v17 = vadd.f32 %v7816_v44, %v7815_v46  ;;  %v11391_v14 = vadd.f32 %v11328_v21, %v7814_v62 }
 0x464   : > { %v7724_v26 = vpop.f32.mrb[8].mxu0 }
 0x465   : > { %v11397_v29 = vadd.f32 %v11331_v50, %v7817_v17  ;;  %v7725_v36 = vpop.f32.mrb[9].mxu0 }
 0x466   : > { %v7726_v39 = vadd.f32 %v7725_v36, %v7724_v26  ;;  %v7727_v58 = vpop.f32.mrb[10].mxu0 }
 0x467   : > { %v7818_v54 = vpop.f32.mrb[140].mxu1  ;;  %v7728_v49 = vpop.f32.mrb[11].mxu0 }
 0x468   : > { %v7819_v45 = vpop.f32.mrb[141].mxu1  ;;  %v11400_v51 = vadd.f32 %v7726_v39, %v11271_v35  ;;  %v7729_v21 = vadd.f32 %v7728_v49, %v7727_v58 }
 0x469   : > { %v7820_v57 = vadd.f32 %v7819_v45, %v7818_v54  ;;  %v7821_v3 = vpop.f32.mrb[142].mxu1 }
 0x46a   : > { %v7822_v30 = vpop.f32.mrb[143].mxu1  ;;  %v11406_v50 = vadd.f32 %v7729_v21, %v11273_v47 }
 0x46b   : > { %v7823_v6 = vadd.f32 %v7822_v30, %v7821_v3  ;;  %v11403_v32 = vadd.f32 %v11340_v0, %v7820_v57 }
 0x46c   : > { %v7730_v8 = vpop.f32.mrb[12].mxu0 }
 0x46d   : > { %v11409_v38 = vadd.f32 %v11343_v43, %v7823_v6  ;;  %v7731_v19 = vpop.f32.mrb[13].mxu0 }
 0x46e   : > { %v7732_v28 = vadd.f32 %v7731_v19, %v7730_v8  ;;  %v7733_v7 = vpop.f32.mrb[14].mxu0 }
 0x46f   : > { %v7824_v27 = vpop.f32.mrb[144].mxu1  ;;  %v7734_v35 = vpop.f32.mrb[15].mxu0 }
 0x470   : > { %v7825_v48 = vpop.f32.mrb[145].mxu1  ;;  %v11412_v13 = vadd.f32 %v7732_v28, %v11281_v61  ;;  %v7735_v0 = vadd.f32 %v7734_v35, %v7733_v7 }
 0x471   : > { %v7826_v18 = vadd.f32 %v7825_v48, %v7824_v27  ;;  %v7827_v20 = vpop.f32.mrb[146].mxu1 }
 0x472   : > { %v7828_v31 = vpop.f32.mrb[147].mxu1  ;;  %v11418_v43 = vadd.f32 %v7735_v0, %v11284_v24 }
 0x473   : > { %v7829_v63 = vadd.f32 %v7828_v31, %v7827_v20  ;;  %v11415_v47 = vadd.f32 %v11346_v4, %v7826_v18 }
 0x474   : > { %v7736_v46 = vpop.f32.mrb[16].mxu0 }
 0x475   : > { %v11421_v62 = vadd.f32 %v11349_v34, %v7829_v63  ;;  %v7737_v5 = vpop.f32.mrb[17].mxu0 }
 0x476   : > { %v7738_v17 = vadd.f32 %v7737_v5, %v7736_v46  ;;  %v7739_v26 = vpop.f32.mrb[18].mxu0 }
 0x477   : > { %v7830_v44 = vpop.f32.mrb[148].mxu1  ;;  %v7740_v61 = vpop.f32.mrb[19].mxu0 }
 0x478   : > { %v7831_v36 = vpop.f32.mrb[149].mxu1  ;;  %v11424_v58 = vadd.f32 %v7738_v17, %v11286_v59  ;;  %v7741_v4 = vadd.f32 %v7740_v61, %v7739_v26 }
 0x479   : > { %v7832_v54 = vadd.f32 %v7831_v36, %v7830_v44  ;;  %v7833_v39 = vpop.f32.mrb[150].mxu1 }
 0x47a   : > { %v7834_v45 = vpop.f32.mrb[151].mxu1  ;;  %v11430_v34 = vadd.f32 %v7741_v4, %v11289_v37 }
 0x47b   : > { %v7835_v49 = vadd.f32 %v7834_v45, %v7833_v39  ;;  %v11427_v24 = vadd.f32 %v11352_v2, %v7832_v54 }
 0x47c   : > { %v7742_v3 = vpop.f32.mrb[20].mxu0 }
 0x47d   : > { %v11433_v57 = vadd.f32 %v11355_v11, %v7835_v49  ;;  %v7743_v21 = vpop.f32.mrb[21].mxu0 }
 0x47e   : > { %v7744_v6 = vadd.f32 %v7743_v21, %v7742_v3  ;;  %v7745_v8 = vpop.f32.mrb[22].mxu0 }
 0x47f   : > { %v7836_v30 = vpop.f32.mrb[152].mxu1  ;;  %v7746_v59 = vpop.f32.mrb[23].mxu0 }
 0x480   : > { %v7837_v19 = vpop.f32.mrb[153].mxu1  ;;  %v11436_v7 = vadd.f32 %v7744_v6, %v11291_v25  ;;  %v7747_v2 = vadd.f32 %v7746_v59, %v7745_v8 }
 0x481   : > { %v7838_v27 = vadd.f32 %v7837_v19, %v7836_v30  ;;  %v7839_v28 = vpop.f32.mrb[154].mxu1 }
 0x482   : > { %v7840_v48 = vpop.f32.mrb[155].mxu1  ;;  %v11442_v11 = vadd.f32 %v7747_v2, %v11295_v12 }
 0x483   : > { %v7841_v35 = vadd.f32 %v7840_v48, %v7839_v28  ;;  %v11439_v37 = vadd.f32 %v11358_v53, %v7838_v27 }
 0x484   : > { %v7748_v20 = vpop.f32.mrb[24].mxu0 }
 0x485   : > { %v11445_v18 = vadd.f32 %v11361_v60, %v7841_v35  ;;  %v7749_v0 = vpop.f32.mrb[25].mxu0 }
 0x486   : > { %v7750_v63 = vadd.f32 %v7749_v0, %v7748_v20  ;;  %v7751_v46 = vpop.f32.mrb[26].mxu0 }
 0x487   : > { %v7842_v31 = vpop.f32.mrb[156].mxu1  ;;  %v7752_v25 = vpop.f32.mrb[27].mxu0 }
 0x488   : > { %v7843_v5 = vpop.f32.mrb[157].mxu1  ;;  %v11448_v26 = vadd.f32 %v7750_v63, %v11297_v23  ;;  %v7753_v53 = vadd.f32 %v7752_v25, %v7751_v46 }
 0x489   : > { %v7844_v44 = vadd.f32 %v7843_v5, %v7842_v31  ;;  %v7845_v17 = vpop.f32.mrb[158].mxu1 }
 0x48a   : > { %v7846_v36 = vpop.f32.mrb[159].mxu1  ;;  %v11454_v60 = vadd.f32 %v7753_v53, %v11301_v9 }
 0x48b   : > { %v7847_v61 = vadd.f32 %v7846_v36, %v7845_v17  ;;  %v11451_v12 = vadd.f32 %v11364_v1, %v7844_v44 }
 0x48c   : > { %v7754_v39 = vpop.f32.mrb[28].mxu0 }
 0x48d   : > { %v11457_v54 = vadd.f32 %v11370_v33, %v7847_v61  ;;  %v7755_v4 = vpop.f32.mrb[29].mxu0 }
 0x48e   : > { %v7756_v49 = vadd.f32 %v7755_v4, %v7754_v39  ;;  %v7757_v3 = vpop.f32.mrb[30].mxu0 }
 0x48f   : > { %v7848_v45 = vpop.f32.mrb[160].mxu1  ;;  %v7758_v23 = vpop.f32.mrb[31].mxu0 }
 0x490   : > { %v7849_v21 = vpop.f32.mrb[161].mxu1  ;;  %v8420_v8 = vadd.f32 %v7756_v49, %v11303_v52  ;;  %v7759_v19 = vadd.f32 %v7758_v23, %v7757_v3 }
 0x491   : > { %v7850_v30 = vadd.f32 %v7849_v21, %v7848_v45  ;;  %v7851_v6 = vpop.f32.mrb[162].mxu1 }
 0x492   : > { %v7852_v1 = vpop.f32.mrb[163].mxu1  ;;  %v8426_v33 = vadd.f32 %v7759_v19, %v11307_v10 }
 0x493   : > { %v7853_v59 = vadd.f32 %v7852_v1, %v7851_v6  ;;  %v11461_v9 = vadd.f32 %v11376_v22, %v7850_v30 }
 0x495   : > { %v11465_v27 = vadd.f32 %v11382_v15, %v7853_v59 }
 0x497   : > { %v7854_v28 = vpop.f32.mrb[164].mxu1 }
 0x498   : > { %v7855_v2 = vpop.f32.mrb[165].mxu1 }
 0x499   : > { %v7856_v48 = vadd.f32 %v7855_v2, %v7854_v28  ;;  %v7857_v35 = vpop.f32.mrb[166].mxu1 }
 0x49a   : > { %v7858_v20 = vpop.f32.mrb[167].mxu1 }
 0x49b   : > { %v7859_v0 = vadd.f32 %v7858_v20, %v7857_v35  ;;  %v11468_v31 = vadd.f32 %v11388_v41, %v7856_v48 }
 0x49d   : > { %v11471_v52 = vadd.f32 %v11394_v55, %v7859_v0 }
 0x49f   : > { %v7860_v63 = vpop.f32.mrb[168].mxu1 }
 0x4a0   : > { %v7861_v22 = vpop.f32.mrb[169].mxu1 }
 0x4a1   : > { %v7862_v46 = vadd.f32 %v7861_v22, %v7860_v63  ;;  %v7863_v5 = vpop.f32.mrb[170].mxu1 }
 0x4a2   : > { %v7864_v10 = vpop.f32.mrb[171].mxu1 }
 0x4a3   : > { %v7865_v25 = vadd.f32 %v7864_v10, %v7863_v5  ;;  %v11474_v15 = vadd.f32 %v11400_v51, %v7862_v46 }
 0x4a5   : > { %v11477_v44 = vadd.f32 %v11406_v50, %v7865_v25 }
 0x4a7   : > { %v7866_v17 = vpop.f32.mrb[172].mxu1 }
 0x4a8   : > { %v7867_v53 = vpop.f32.mrb[173].mxu1 }
 0x4a9   : > { %v7868_v36 = vadd.f32 %v7867_v53, %v7866_v17  ;;  %v7869_v41 = vpop.f32.mrb[174].mxu1 }
 0x4aa   : > { %v7870_v61 = vpop.f32.mrb[175].mxu1 }
 0x4ab   : > { %v7871_v39 = vadd.f32 %v7870_v61, %v7869_v41  ;;  %v11480_v55 = vadd.f32 %v11412_v13, %v7868_v36  ;;  %v11507_v41 = vld [vmem:[#allocation13] ss:$0 sm:$0xff] }
 0x4ad   : > { %v11483_v4 = vadd.f32 %v11418_v43, %v7871_v39 }
 0x4af   : > { %v7872_v45 = vpop.f32.mrb[176].mxu1 }
 0x4b0   : > { %v7873_v49 = vpop.f32.mrb[177].mxu1 }
 0x4b1   : > { %v7874_v3 = vadd.f32 %v7873_v49, %v7872_v45  ;;  %v7875_v51 = vpop.f32.mrb[178].mxu1 }
 0x4b2   : > { %v7876_v21 = vpop.f32.mrb[179].mxu1 }
 0x4b3   : > { %v7877_v23 = vadd.f32 %v7876_v21, %v7875_v51  ;;  %v11486_v50 = vadd.f32 %v11424_v58, %v7874_v3 }
 0x4b5   : > { %v11489_v30 = vadd.f32 %v11430_v34, %v7877_v23 }
 0x4b7   : > { %v7878_v6 = vpop.f32.mrb[180].mxu1 }
 0x4b8   : > { %v7879_v19 = vpop.f32.mrb[181].mxu1 }
 0x4b9   : > { %v7880_v1 = vadd.f32 %v7879_v19, %v7878_v6  ;;  %v7881_v13 = vpop.f32.mrb[182].mxu1 }
 0x4ba   : > { %v7882_v59 = vpop.f32.mrb[183].mxu1 }
 0x4bb   : > { %v7883_v28 = vadd.f32 %v7882_v59, %v7881_v13  ;;  %v11492_v43 = vadd.f32 %v11436_v7, %v7880_v1 }
 0x4bd   : > { %v11495_v2 = vadd.f32 %v11442_v11, %v7883_v28 }
 0x4bf   : > { %v7884_v48 = vpop.f32.mrb[184].mxu1 }
 0x4c0   : > { %v7885_v35 = vpop.f32.mrb[185].mxu1 }
 0x4c1   : > { %v7886_v20 = vadd.f32 %v7885_v35, %v7884_v48  ;;  %v7887_v58 = vpop.f32.mrb[186].mxu1 }
 0x4c2   : > { %v7888_v0 = vpop.f32.mrb[187].mxu1 }
 0x4c3   : > { %v7889_v34 = vadd.f32 %v7888_v0, %v7887_v58  ;;  %v11498_v63 = vadd.f32 %v11448_v26, %v7886_v20 }
 0x4c5   : > { %v11501_v22 = vadd.f32 %v11454_v60, %v7889_v34 }
 0x4c7   : > { %v7890_v46 = vpop.f32.mrb[188].mxu1 }
 0x4c8   : > { %v7891_v5 = vpop.f32.mrb[189].mxu1 }
 0x4c9   : > { %v7892_v7 = vadd.f32 %v7891_v5, %v7890_v46  ;;  %v7893_v10 = vpop.f32.mrb[190].mxu1 }
 0x4ca   : > { %v7894_v25 = vpop.f32.mrb[191].mxu1 }
 0x4cb   : > { %v7895_v11 = vadd.f32 %v7894_v25, %v7893_v10  ;;  %v11503_v17 = vadd.f32 %v8420_v8, %v7892_v7 }
 0x4cd   : > { %v11505_v53 = vadd.f32 %v8426_v33, %v7895_v11 }
 0x4cf   : > { %v8178_v36 = vpop.f32.mrb[96].mxu1 }
 0x4d0   : > { %v8338_v26 = vadd.f32 %v11379_v16, %v8178_v36  ;;  %v6343_v61 = vpop.f32.mrb[97].mxu1 }
 0x4d1   : > { %v8341_v60 = vadd.f32 %v11367_v42, %v6343_v61  ;;  %v8179_v39 = vpop.f32.mrb[98].mxu1 }
 0x4d2   : > { %v6511_v45 = vadd.f32 %v8338_v26, %v11507_v41  ;;  %v8344_v49 = vadd.f32 %v11385_v56, %v8179_v39  ;;  %v6346_v3 = vpop.f32.mrb[99].mxu1 }
 0x4d3   : > { %v6509_v8 = vadd.f32 %v8341_v60, %v11507_v41  ;;  %v8347_v33 = vadd.f32 %v11373_v40, %v6346_v3 }
 0x4d4   : > { %v6543_v51 = vmax.f32 %v6511_v45, 0.0  ;;  %v6512_v21 = vadd.f32 %v8344_v49, %v11507_v41 }
 0x4d5   : > { %v6541_v23 = vmax.f32 %v6509_v8, 0.0  ;;  %v6510_v6 = vadd.f32 %v8347_v33, %v11507_v41 }
 0x4d6   : > { %6575 = vst [vmem:[%s11518_s26 + $0x10] sm:$0xff] %v6543_v51  ;;  %v6544_v42 = vmax.f32 %v6512_v21, 0.0 }
 0x4d7   : > { %6573 = vst [vmem:[%s11518_s26] sm:$0xff] %v6541_v23  ;;  %v6542_v16 = vmax.f32 %v6510_v6, 0.0  ;;  %v8182_v56 = vpop.f32.mrb[100].mxu1 }
 0x4d8   : > { %6576 = vst [vmem:[%s11518_s26 + $0x18] sm:$0xff] %v6544_v42  ;;  %v8350_v40 = vadd.f32 %v11403_v32, %v8182_v56  ;;  %v6359_v19 = vpop.f32.mrb[101].mxu1 }
 0x4d9   : > { %6574 = vst [vmem:[%s11518_s26 + $0x8] sm:$0xff] %v6542_v16  ;;  %v8353_v1 = vadd.f32 %v11391_v14, %v6359_v19  ;;  %v8183_v13 = vpop.f32.mrb[102].mxu1 }
 0x4da   : > { %v6515_v59 = vadd.f32 %v8350_v40, %v11507_v41  ;;  %v8356_v28 = vadd.f32 %v11409_v38, %v8183_v13  ;;  %v6362_v48 = vpop.f32.mrb[103].mxu1 }
 0x4db   : > { %v6513_v35 = vadd.f32 %v8353_v1, %v11507_v41  ;;  %v8359_v20 = vadd.f32 %v11397_v29, %v6362_v48 }
 0x4dc   : > { %v6547_v58 = vmax.f32 %v6515_v59, 0.0  ;;  %v6516_v32 = vadd.f32 %v8356_v28, %v11507_v41 }
 0x4dd   : > { %v6545_v0 = vmax.f32 %v6513_v35, 0.0  ;;  %v6514_v34 = vadd.f32 %v8359_v20, %v11507_v41 }
 0x4de   : > { %6579 = vst [vmem:[%s11518_s26 + $0x30] sm:$0xff] %v6547_v58  ;;  %v6548_v14 = vmax.f32 %v6516_v32, 0.0 }
 0x4df   : > { %6577 = vst [vmem:[%s11518_s26 + $0x20] sm:$0xff] %v6545_v0  ;;  %v6546_v46 = vmax.f32 %v6514_v34, 0.0  ;;  %v8186_v5 = vpop.f32.mrb[104].mxu1 }
 0x4e0   : > { %6580 = vst [vmem:[%s11518_s26 + $0x38] sm:$0xff] %v6548_v14  ;;  %v8362_v38 = vadd.f32 %v11427_v24, %v8186_v5  ;;  %v6375_v7 = vpop.f32.mrb[105].mxu1 }
 0x4e1   : > { %6578 = vst [vmem:[%s11518_s26 + $0x28] sm:$0xff] %v6546_v46  ;;  %v8365_v29 = vadd.f32 %v11415_v47, %v6375_v7  ;;  %v8187_v10 = vpop.f32.mrb[106].mxu1 }
 0x4e2   : > { %v6519_v25 = vadd.f32 %v8362_v38, %v11507_v41  ;;  %v8368_v11 = vadd.f32 %v11433_v57, %v8187_v10  ;;  %v6378_v36 = vpop.f32.mrb[107].mxu1 }
 0x4e3   : > { %v6517_v26 = vadd.f32 %v8365_v29, %v11507_v41  ;;  %v8371_v61 = vadd.f32 %v11421_v62, %v6378_v36 }
 0x4e4   : > { %v6551_v60 = vmax.f32 %v6519_v25, 0.0  ;;  %v6520_v24 = vadd.f32 %v8368_v11, %v11507_v41 }
 0x4e5   : > { %v6549_v39 = vmax.f32 %v6517_v26, 0.0  ;;  %v6518_v45 = vadd.f32 %v8371_v61, %v11507_v41 }
 0x4e6   : > { %6583 = vst [vmem:[%s11518_s26 + $0x50] sm:$0xff] %v6551_v60  ;;  %v6552_v47 = vmax.f32 %v6520_v24, 0.0 }
 0x4e7   : > { %6581 = vst [vmem:[%s11518_s26 + $0x40] sm:$0xff] %v6549_v39  ;;  %v6550_v49 = vmax.f32 %v6518_v45, 0.0  ;;  %v8190_v3 = vpop.f32.mrb[108].mxu1 }
 0x4e8   : > { %6584 = vst [vmem:[%s11518_s26 + $0x58] sm:$0xff] %v6552_v47  ;;  %v8374_v57 = vadd.f32 %v11451_v12, %v8190_v3  ;;  %v6391_v8 = vpop.f32.mrb[109].mxu1 }
 0x4e9   : > { %6582 = vst [vmem:[%s11518_s26 + $0x48] sm:$0xff] %v6550_v49  ;;  %v8377_v62 = vadd.f32 %v11439_v37, %v6391_v8  ;;  %v8191_v33 = vpop.f32.mrb[110].mxu1 }
 0x4ea   : > { %v6523_v51 = vadd.f32 %v8374_v57, %v11507_v41  ;;  %v8380_v21 = vadd.f32 %v11457_v54, %v8191_v33  ;;  %v6394_v23 = vpop.f32.mrb[111].mxu1 }
 0x4eb   : > { %v6521_v6 = vadd.f32 %v8377_v62, %v11507_v41  ;;  %v8383_v42 = vadd.f32 %v11445_v18, %v6394_v23 }
 0x4ec   : > { %v6555_v16 = vmax.f32 %v6523_v51, 0.0  ;;  %v6524_v12 = vadd.f32 %v8380_v21, %v11507_v41 }
 0x4ed   : > { %v6553_v56 = vmax.f32 %v6521_v6, 0.0  ;;  %v6522_v40 = vadd.f32 %v8383_v42, %v11507_v41 }
 0x4ee   : > { %6587 = vst [vmem:[%s11518_s26 + $0x70] sm:$0xff] %v6555_v16  ;;  %v6556_v37 = vmax.f32 %v6524_v12, 0.0 }
 0x4ef   : > { %6585 = vst [vmem:[%s11518_s26 + $0x60] sm:$0xff] %v6553_v56  ;;  %v6554_v19 = vmax.f32 %v6522_v40, 0.0  ;;  %v8194_v1 = vpop.f32.mrb[112].mxu1 }
 0x4f0   : > { %6588 = vst [vmem:[%s11518_s26 + $0x78] sm:$0xff] %v6556_v37  ;;  %v8386_v54 = vadd.f32 %v11468_v31, %v8194_v1  ;;  %v6407_v13 = vpop.f32.mrb[113].mxu1 }
 0x4f1   : > { %6586 = vst [vmem:[%s11518_s26 + $0x68] sm:$0xff] %v6554_v19  ;;  %v8389_v18 = vadd.f32 %v11461_v9, %v6407_v13  ;;  %v8195_v59 = vpop.f32.mrb[114].mxu1 }
 0x4f2   : > { %v6527_v28 = vadd.f32 %v8386_v54, %v11507_v41  ;;  %v8392_v48 = vadd.f32 %v11471_v52, %v8195_v59  ;;  %v6410_v35 = vpop.f32.mrb[115].mxu1 }
 0x4f3   : > { %v6525_v20 = vadd.f32 %v8389_v18, %v11507_v41  ;;  %v8395_v58 = vadd.f32 %v11465_v27, %v6410_v35 }
 0x4f4   : > { %v6559_v32 = vmax.f32 %v6527_v28, 0.0  ;;  %v6528_v31 = vadd.f32 %v8392_v48, %v11507_v41 }
 0x4f5   : > { %v6557_v0 = vmax.f32 %v6525_v20, 0.0  ;;  %v6526_v34 = vadd.f32 %v8395_v58, %v11507_v41 }
 0x4f6   : > { %6591 = vst [vmem:[%s11518_s26 + $0x90] sm:$0xff] %v6559_v32  ;;  %v6560_v9 = vmax.f32 %v6528_v31, 0.0 }
 0x4f7   : > { %6589 = vst [vmem:[%s11518_s26 + $0x80] sm:$0xff] %v6557_v0  ;;  %v6558_v14 = vmax.f32 %v6526_v34, 0.0  ;;  %v8198_v46 = vpop.f32.mrb[116].mxu1 }
 0x4f8   : > { %6592 = vst [vmem:[%s11518_s26 + $0x98] sm:$0xff] %v6560_v9  ;;  %v8398_v52 = vadd.f32 %v11480_v55, %v8198_v46  ;;  %v6423_v5 = vpop.f32.mrb[117].mxu1 }
 0x4f9   : > { %6590 = vst [vmem:[%s11518_s26 + $0x88] sm:$0xff] %v6558_v14  ;;  %v8401_v27 = vadd.f32 %v11474_v15, %v6423_v5  ;;  %v8199_v38 = vpop.f32.mrb[118].mxu1 }
 0x4fa   : > { %v6531_v7 = vadd.f32 %v8398_v52, %v11507_v41  ;;  %v8404_v29 = vadd.f32 %v11483_v4, %v8199_v38  ;;  %v6426_v10 = vpop.f32.mrb[119].mxu1 }
 0x4fb   : > { %v6529_v25 = vadd.f32 %v8401_v27, %v11507_v41  ;;  %v8407_v11 = vadd.f32 %v11477_v44, %v6426_v10 }
 0x4fc   : > { %v6563_v36 = vmax.f32 %v6531_v7, 0.0  ;;  %v6532_v55 = vadd.f32 %v8404_v29, %v11507_v41 }
 0x4fd   : > { %v6561_v26 = vmax.f32 %v6529_v25, 0.0  ;;  %v6530_v61 = vadd.f32 %v8407_v11, %v11507_v41 }
 0x4fe   : > { %6595 = vst [vmem:[%s11518_s26 + $0xb0] sm:$0xff] %v6563_v36  ;;  %v6564_v15 = vmax.f32 %v6532_v55, 0.0 }
 0x4ff   : > { %6593 = vst [vmem:[%s11518_s26 + $0xa0] sm:$0xff] %v6561_v26  ;;  %v6562_v60 = vmax.f32 %v6530_v61, 0.0  ;;  %v8202_v24 = vpop.f32.mrb[120].mxu1 }
 0x500   : > { %6596 = vst [vmem:[%s11518_s26 + $0xb8] sm:$0xff] %v6564_v15  ;;  %v8410_v4 = vadd.f32 %v11492_v43, %v8202_v24  ;;  %v6439_v39 = vpop.f32.mrb[121].mxu1 }
 0x501   : > { %6594 = vst [vmem:[%s11518_s26 + $0xa8] sm:$0xff] %v6562_v60  ;;  %v8413_v44 = vadd.f32 %v11486_v50, %v6439_v39  ;;  %v8203_v45 = vpop.f32.mrb[122].mxu1 }
 0x502   : > { %v6535_v47 = vadd.f32 %v8410_v4, %v11507_v41  ;;  %v8416_v49 = vadd.f32 %v11495_v2, %v8203_v45  ;;  %v6442_v3 = vpop.f32.mrb[123].mxu1 }
 0x503   : > { %v6533_v57 = vadd.f32 %v8413_v44, %v11507_v41  ;;  %v8419_v8 = vadd.f32 %v11489_v30, %v6442_v3 }
 0x504   : > { %v6567_v62 = vmax.f32 %v6535_v47, 0.0  ;;  %v6536_v43 = vadd.f32 %v8416_v49, %v11507_v41 }
 0x505   : > { %v6565_v33 = vmax.f32 %v6533_v57, 0.0  ;;  %v6534_v51 = vadd.f32 %v8419_v8, %v11507_v41 }
 0x506   : > { %6599 = vst [vmem:[%s11518_s26 + $0xd0] sm:$0xff] %v6567_v62  ;;  %v6568_v50 = vmax.f32 %v6536_v43, 0.0 }
 0x507   : > { %6597 = vst [vmem:[%s11518_s26 + $0xc0] sm:$0xff] %v6565_v33  ;;  %v6566_v21 = vmax.f32 %v6534_v51, 0.0  ;;  %v8206_v23 = vpop.f32.mrb[124].mxu1 }
 0x508   : > { %6600 = vst [vmem:[%s11518_s26 + $0xd8] sm:$0xff] %v6568_v50  ;;  %v8422_v2 = vadd.f32 %v11503_v17, %v8206_v23  ;;  %v6455_v6 = vpop.f32.mrb[125].mxu1 }
 0x509   : > { %6598 = vst [vmem:[%s11518_s26 + $0xc8] sm:$0xff] %v6566_v21  ;;  %v8425_v30 = vadd.f32 %v11498_v63, %v6455_v6  ;;  %v8207_v42 = vpop.f32.mrb[126].mxu1 }
 0x50a   : > { %v6539_v16 = vadd.f32 %v8422_v2, %v11507_v41  ;;  %v8428_v12 = vadd.f32 %v11505_v53, %v8207_v42  ;;  %v6458_v56 = vpop.f32.mrb[127].mxu1 }
 0x50b   : > { %v6537_v40 = vadd.f32 %v8425_v30, %v11507_v41  ;;  %v8431_v37 = vadd.f32 %v11501_v22, %v6458_v56 }
 0x50c   : > { %v6571_v17 = vmax.f32 %v6539_v16, 0.0  ;;  %v6540_v63 = vadd.f32 %v8428_v12, %v11507_v41 }
 0x50d   : > { %v6569_v19 = vmax.f32 %v6537_v40, 0.0  ;;  %v6538_v1 = vadd.f32 %v8431_v37, %v11507_v41 }
 0x50e   : > { %6603 = vst [vmem:[%s11518_s26 + $0xf0] sm:$0xff] %v6571_v17  ;;  %v6572_v54 = vmax.f32 %v6540_v63, 0.0 }
 0x50f   : > { %6601 = vst [vmem:[%s11518_s26 + $0xe0] sm:$0xff] %v6569_v19  ;;  %v6570_v22 = vmax.f32 %v6538_v1, 0.0 }
 0x510   : > { %6604 = vst [vmem:[%s11518_s26 + $0xf8] sm:$0xff] %v6572_v54 }
 0x511   : > { %6602 = vst [vmem:[%s11518_s26 + $0xe8] sm:$0xff] %v6570_v22 }
 0x512   : > { %8983 = shalt.err (!%p8980_p13)
}
 0x513   : > { %s8984_s30 = scalar_lea.hbm %s11610_s17, 4096  ;;  %s8988_s16 = scalar_lea.hbm %s11664_s5, 8192 }
 0x514   : > { %p8985_p9 = scmp.ne.s32.totalorder %s11610_s17, %s8984_s30  ;;  %p8989_p6 = scmp.lt.u32.totalorder %s11610_s17, %s11664_s5 }
 0x515   : > { %p8990_p4 = scmp.lt.u32.totalorder %s8988_s16, %s8984_s30  ;;  %p8992_p3 = scmp.lt.u32.totalorder %s8984_s30, %s11610_s17 }
 0x516   : > { %p8986_p0 = pnand %p8985_p9, %p9252_p10 }
 0x517   : > { %p8991_p8 = por %p8990_p4, %p8989_p6 }
 0x518   : > { %p8987_p11 = pneg %p8986_p0 }
 0x519   : > { %p8993_p5 = por %p8992_p3, %p8991_p8 }
 0x51b   : > { %p8994_p7 = pnand %p8993_p5, %p8987_p11 }
 0x51d   : > { %8997 = shalt.err (!%p8994_p7)
}
 0x51e   : > { %s9055_s27 = smov 128   ;;  %s9056_s8 = smov 8  }
 0x51f   : > { %8549 = dma.vmem_to_hbm [thread:$0]  (%p9252_p10), %s11612_s13, 4096, %s11610_s17, %s6606_s22, %s9055_s27, %s9055_s27, %s9056_s8  }
 0x520 PF: > { %s6634_s28 = sand.u32 1, %s9032_s18   ;;  %p11896_p12 = scmp.ne.s32.totalorder %s11710_s25, 0 }
 0x521   : > { %p11897_p1 = scmp.ge.s32.totalorder %s9044_s21, 2  ;;  %s6635_s11 = scalar_lea.sflag [#allocation7], %s6634_s28 }
 0x523   : > { %p8569_p2 = pnand %p11897_p1, %p11896_p12 }
 0x525   : > { %9027 = dma.done.wait (!%p8569_p2), %s6635_s11, 4096  }
 0x526   : > { %9029 = vsyncadd (!%p8569_p2), %s6635_s11, 4294963200  ;;  %p20_p13 = scmp.ge.s32.totalorder %s9242_s14, 4   ;;  %s11898_s18 = smov %s9036_s19 }
 0x527   : > { %s11899_s19 = smov %s9040_s20  ;;  %s11900_s20 = smov %s9258_s10 }
 0x528   : > { %s11901_s21 = smov %s9242_s14  ;;  %22 = sbr.rel (!%p20_p13) target bundleno = 7 (0x7), region = 107 }
 0x52f   :  { %6640 = vsyncpa [#allocation6], 1 }
 0x530   :  { %6642 = vsyncpa [#allocation6 + $0x1], 1 }
 0x531   :  { %6643 = vsyncpa [#allocation9], 1 }
 0x532   :  { %6644 = vsyncpa [#allocation12], 1 }
 0x533   :  { %6645 = vsyncpa [#allocation7], 1 }
 0x534   :  { %6647 = vsyncpa [#allocation7 + $0x1], 1 }

</bundles_post_ra>
